<compile_context>
chip_gen: v6e
topology: v6e:2x2x1
jax: 0.10.0
libtpu: 0.0.40
codegen_flags: <defaults>
</compile_context>

<pallas_src>
import jax
import jax.numpy as jnp
from jax import lax
from jax.experimental import pallas as pl
from jax.experimental.pallas import tpu as pltpu

H = W = 28
KH = KW = 3
C_OUT = 32
POOL = 2
PH, PW = H // POOL, W // POOL          # 14, 14
Q = PH * PW                            # 196 pooled pixels per channel
FC_IN = C_OUT * Q                      # 6272 = 49 * 128
HIDDEN = 128
CLASSES = 10

N_TAP = 4 * 4                          # (a, c) slabs, a = di+dy, c = dj+dx in 0..3
MAX_TB_CONV = 8                        # images per stage-1 grid step
MAX_TB_FC = 128                        # images per stage-2 grid step (v7x: batch-parallel)


def _batch_tile(batch, max_tile):
    tb = min(batch, max_tile)
    while batch % tb:
        tb -= 1
    return tb


# ---------------- Pallas kernels ----------------

def conv_pool_kernel(s_ref, w_ref, b_ref, o_ref):
    # s_ref: (TB, 16, 196)  strided tap slabs
    # w_ref: (128, 16)      row t*32+c: conv weights of channel c for pool tap t
    # b_ref: (32, 1)        conv bias
    # o_ref: (TB, 32, 196)  pooled activation, channel-major (== torch flatten order)
    w = w_ref[...]
    bias = b_ref[...]
    for b in range(s_ref.shape[0]):                     # TB <= 8, static unroll
        r = jnp.dot(w, s_ref[b], preferred_element_type=jnp.float32)      # (128, 196)
        m = jnp.maximum(jnp.maximum(r[0:32], r[32:64]),
                        jnp.maximum(r[64:96], r[96:128]))                  # 2x2 max-pool
        o_ref[b] = jnp.maximum(m + bias, 0.0)


def fc_kernel(x_ref, w1_ref, b1_ref, w2_ref, b2_ref, o_ref):
    # x_ref: (TB, 6272)  w1_ref: (6272, 128)  b1_ref: (1, 128)
    # w2_ref: (128, 10)  b2_ref: (1, 10)      o_ref: (TB, 10)
    h = jnp.dot(x_ref[...], w1_ref[...], preferred_element_type=jnp.float32)
    h = jnp.maximum(h + b1_ref[...], 0.0)
    o_ref[...] = jnp.dot(h, w2_ref[...], preferred_element_type=jnp.float32) + b2_ref[...]


# ---------------- pallas_call wrappers ----------------

def conv_pool_pallas(s, wstack, bconv):
    B = s.shape[0]
    tb = _batch_tile(B, MAX_TB_CONV)
    return pl.pallas_call(
        conv_pool_kernel,
        out_shape=jax.ShapeDtypeStruct((B, C_OUT, Q), jnp.float32),
        grid=(B // tb,),
        in_specs=[
            pl.BlockSpec((tb, N_TAP, Q), lambda i: (i, 0, 0)),
            pl.BlockSpec((POOL * POOL * C_OUT, N_TAP), lambda i: (0, 0)),
            pl.BlockSpec((C_OUT, 1), lambda i: (0, 0)),
        ],
        out_specs=pl.BlockSpec((tb, C_OUT, Q), lambda i: (i, 0, 0)),
        compiler_params=pltpu.CompilerParams(dimension_semantics=("parallel",)),
    )(s, wstack, bconv)


def fc_pallas(x, w1, b1, w2, b2):
    B = x.shape[0]
    tb = _batch_tile(B, MAX_TB_FC)
    return pl.pallas_call(
        fc_kernel,
        out_shape=jax.ShapeDtypeStruct((B, CLASSES), jnp.float32),
        grid=(B // tb,),
        in_specs=[
            pl.BlockSpec((tb, FC_IN), lambda i: (i, 0)),
            pl.BlockSpec((FC_IN, HIDDEN), lambda i: (0, 0)),
            pl.BlockSpec((1, HIDDEN), lambda i: (0, 0)),
            pl.BlockSpec((HIDDEN, CLASSES), lambda i: (0, 0)),
            pl.BlockSpec((1, CLASSES), lambda i: (0, 0)),
        ],
        out_specs=pl.BlockSpec((tb, CLASSES), lambda i: (i, 0)),
        compiler_params=pltpu.CompilerParams(dimension_semantics=("parallel",)),
    )(x, w1, b1, w2, b2)


# ---------------- glue (plain JAX: layout plumbing only) ----------------

def pool_conv_tap_slabs(x_nchw):
    # (B,1,28,28) -> (B, 16, 196):  S[b, a*4+c, i*14+j] = xpad[b, 2i+a, 2j+c]
    # TODO(synk): could fuse this slab build into the pallas_call input DMA via
    # allow_input_fusion; kept as plain XLA ops for robustness.
    B = x_nchw.shape[0]
    xp = jnp.pad(x_nchw[:, 0], ((0, 0), (1, 1), (1, 1)))          # (B, 30, 30)
    slabs = [xp[:, a:a + H:POOL, c:c + W:POOL]                    # (B, 14, 14) each
             for a in range(4) for c in range(4)]
    return jnp.stack(slabs, axis=1).reshape(B, N_TAP, Q)


def build_conv_wstack(wc):
    # wc: (32, 3, 3) == torch conv.weight[:, 0]  ->  (128, 16):
    # row t*32+c, col a*4+cc holds wc[c, a-di, cc-dj] for pool tap t=(di,dj), else 0,
    # so W @ S computes conv at (2i+di+dy, 2j+dj+dx) for all four pool taps at once.
    ws = jnp.zeros((POOL * POOL, C_OUT, 4, 4), wc.dtype)
    for di in range(POOL):
        for dj in range(POOL):
            ws = ws.at[di * POOL + dj, :, di:di + KH, dj:dj + KW].set(wc)
    return ws.reshape(POOL * POOL * C_OUT, N_TAP)


def prepare_params(params):
    # one-time repack of canonical (torch-layout) params into kernel-friendly layouts
    wc, bc, w1, b1, w2, b2 = params
    return (build_conv_wstack(wc),          # (128, 16)
            bc.reshape(C_OUT, 1),           # (32, 1)
            w1,                             # (6272, 128) float32
            b1.reshape(1, HIDDEN),          # (1, 128)
            w2,                             # (128, 10)
            b2.reshape(1, CLASSES))         # (1, 10)


def simple_cnn_forward(x_nchw, kernel_params):
    wstack, bconv, w1, b1, w2, b2 = kernel_params
    B = x_nchw.shape[0]
    s = pool_conv_tap_slabs(x_nchw)                # layout plumbing (4x the 3 KiB image)
    pooled = conv_pool_pallas(s, wstack, bconv)    # (B, 32, 196)
    flat = pooled.reshape(B, FC_IN)                # free bitcast; == torch x.view(B, -1)
    return fc_pallas(flat, w1, b1, w2, b2)         # (B, 10)


# ---------------- deterministic synthetic parameters & reference ----------------

def init_params(key):
    ks = jax.random.split(key, 6)
    # wc[c, dy, dx] == torch conv.weight[c, 0, dy, dx]
    wc = jax.random.normal(ks[0], (C_OUT, KH, KW), jnp.float32) * 0.1
    bc = jax.random.normal(ks[1], (C_OUT,), jnp.float32) * 0.1
    # w1 == torch fc[0].weight.T ; w2 == torch fc[2].weight.T
    w1 = jax.random.normal(ks[2], (FC_IN, HIDDEN), jnp.float32) * 0.02
    b1 = jax.random.normal(ks[3], (HIDDEN,), jnp.float32) * 0.02
    w2 = jax.random.normal(ks[4], (HIDDEN, CLASSES), jnp.float32) * 0.05
    b2 = jax.random.normal(ks[5], (CLASSES,), jnp.float32) * 0.05
    return wc, bc, w1, b1, w2, b2


def reference_forward(x_nchw, params):
    # plain-JAX reproduction of the PyTorch forward (NCHW), full float32.
    wc, bc, w1, b1, w2, b2 = params
    B = x_nchw.shape[0]
    y = lax.conv_general_dilated(
        x_nchw, wc[:, None, :, :], window_strides=(1, 1), padding=((1, 1), (1, 1)),
        dimension_numbers=("NCHW", "OIHW", "NCHW"),
        precision=lax.Precision.HIGHEST)
    y = jnp.maximum(y + bc.reshape(1, C_OUT, 1, 1), 0.0)
    y = y.reshape(B, C_OUT, PH, POOL, PW, POOL).max(axis=(3, 5))
    y = y.reshape(B, -1)
    h = jnp.maximum(jnp.dot(y, w1, precision=lax.Precision.HIGHEST) + b1, 0.0)
    return jnp.dot(h, w2, precision=lax.Precision.HIGHEST) + b2


if __name__ == "__main__":
    key = jax.random.PRNGKey(0)
    kx, kp = jax.random.split(key)
    x = jax.random.normal(kx, (2, 1, H, W), jnp.float32)     # NCHW, like PyTorch
    params = init_params(kp)
    kparams = prepare_params(params)

    fwd = jax.jit(simple_cnn_forward)
    out = jax.block_until_ready(fwd(x, kparams))
    ref = jax.block_until_ready(reference_forward(x, params))

    assert out.shape == (2, CLASSES), out.shape
    assert jnp.allclose(out, ref, rtol=1e-4, atol=1e-4), (out, ref)
    print("KERNEL_OK")
</pallas_src>

<mosaic_0001>
module attributes {stable_mosaic.version = 11 : i64} {
  func.func @conv_pool_kernel(%arg0: i32, %arg1: memref<2x16x196xf32, #tpu.memory_space<vmem>>, %arg2: memref<128x16xf32, #tpu.memory_space<vmem>>, %arg3: memref<32x1xf32, #tpu.memory_space<vmem>>, %arg4: memref<2x32x196xf32, #tpu.memory_space<vmem>>) attributes {dimension_semantics = [#tpu.dimension_semantics<parallel>], iteration_bounds = array<i64: 1>, scalar_prefetch = 0 : i64, scratch_operands = 0 : i64, tpu.core_type = #tpu.core_type<tc>, window_params = [{transform_indices = @transform_0, window_bounds = array<i64: 2, 16, 196>}, {pipeline_mode = #tpu.pipeline_mode<synchronous>, transform_indices = @transform_1, window_bounds = array<i64: 128, 16>}, {pipeline_mode = #tpu.pipeline_mode<synchronous>, transform_indices = @transform_2, window_bounds = array<i64: 32, 1>}, {transform_indices = @transform_3, window_bounds = array<i64: 2, 32, 196>}]} {
    %c0 = arith.constant 0 : index
    %c0_0 = arith.constant 0 : index
    %0 = vector.load %arg2[%c0, %c0_0] : memref<128x16xf32, #tpu.memory_space<vmem>>, vector<128x16xf32>
    %c0_1 = arith.constant 0 : index
    %c0_2 = arith.constant 0 : index
    %1 = vector.load %arg3[%c0_1, %c0_2] : memref<32x1xf32, #tpu.memory_space<vmem>>, vector<32x1xf32>
    %c0_3 = arith.constant 0 : index
    %c0_4 = arith.constant 0 : index
    %c0_5 = arith.constant 0 : index
    %2 = vector.load %arg1[%c0_3, %c0_4, %c0_5] : memref<2x16x196xf32, #tpu.memory_space<vmem>>, vector<1x16x196xf32>
    %3 = vector.shape_cast %2 : vector<1x16x196xf32> to vector<16x196xf32>
    %cst = arith.constant dense<0.000000e+00> : vector<128x196xf32>
    %4 = tpu.matmul %0, %3, %cst {dimension_numbers = #tpu.dot_dimension_numbers<[1], [0], [0], [1], [0, 0, 1, 1], [], []>} : vector<128x16xf32>, vector<16x196xf32>, vector<128x196xf32> -> vector<128x196xf32>
    %5 = vector.extract_strided_slice %4 {offsets = [0, 0], sizes = [32, 196], strides = [1, 1]} : vector<128x196xf32> to vector<32x196xf32>
    %6 = vector.extract_strided_slice %4 {offsets = [32, 0], sizes = [32, 196], strides = [1, 1]} : vector<128x196xf32> to vector<32x196xf32>
    %7 = arith.maximumf %5, %6 : vector<32x196xf32>
    %8 = vector.extract_strided_slice %4 {offsets = [64, 0], sizes = [32, 196], strides = [1, 1]} : vector<128x196xf32> to vector<32x196xf32>
    %9 = vector.extract_strided_slice %4 {offsets = [96, 0], sizes = [32, 196], strides = [1, 1]} : vector<128x196xf32> to vector<32x196xf32>
    %10 = arith.maximumf %8, %9 : vector<32x196xf32>
    %11 = arith.maximumf %7, %10 : vector<32x196xf32>
    %12 = vector.broadcast %1 : vector<32x1xf32> to vector<32x196xf32>
    %13 = arith.addf %11, %12 : vector<32x196xf32>
    %cst_6 = arith.constant 0.000000e+00 : f32
    %14 = vector.broadcast %cst_6 : f32 to vector<32x196xf32>
    %15 = arith.maximumf %13, %14 : vector<32x196xf32>
    %c0_7 = arith.constant 0 : index
    %c0_8 = arith.constant 0 : index
    %c0_9 = arith.constant 0 : index
    %16 = vector.load %arg4[%c0_7, %c0_8, %c0_9] : memref<2x32x196xf32, #tpu.memory_space<vmem>>, vector<1x32x196xf32>
    %17 = vector.shape_cast %16 : vector<1x32x196xf32> to vector<32x196xf32>
    %18 = vector.shape_cast %15 : vector<32x196xf32> to vector<1x32x196xf32>
    tpu.vector_store %arg4[%c0_7, %c0_8, %c0_9], %18 {strides = array<i32>} : memref<2x32x196xf32, #tpu.memory_space<vmem>>, vector<1x32x196xf32>,
    %c1 = arith.constant 1 : index
    %c0_10 = arith.constant 0 : index
    %c0_11 = arith.constant 0 : index
    %19 = vector.load %arg1[%c1, %c0_10, %c0_11] : memref<2x16x196xf32, #tpu.memory_space<vmem>>, vector<1x16x196xf32>
    %20 = vector.shape_cast %19 : vector<1x16x196xf32> to vector<16x196xf32>
    %cst_12 = arith.constant dense<0.000000e+00> : vector<128x196xf32>
    %21 = tpu.matmul %0, %20, %cst_12 {dimension_numbers = #tpu.dot_dimension_numbers<[1], [0], [0], [1], [0, 0, 1, 1], [], []>} : vector<128x16xf32>, vector<16x196xf32>, vector<128x196xf32> -> vector<128x196xf32>
    %22 = vector.extract_strided_slice %21 {offsets = [0, 0], sizes = [32, 196], strides = [1, 1]} : vector<128x196xf32> to vector<32x196xf32>
    %23 = vector.extract_strided_slice %21 {offsets = [32, 0], sizes = [32, 196], strides = [1, 1]} : vector<128x196xf32> to vector<32x196xf32>
    %24 = arith.maximumf %22, %23 : vector<32x196xf32>
    %25 = vector.extract_strided_slice %21 {offsets = [64, 0], sizes = [32, 196], strides = [1, 1]} : vector<128x196xf32> to vector<32x196xf32>
    %26 = vector.extract_strided_slice %21 {offsets = [96, 0], sizes = [32, 196], strides = [1, 1]} : vector<128x196xf32> to vector<32x196xf32>
    %27 = arith.maximumf %25, %26 : vector<32x196xf32>
    %28 = arith.maximumf %24, %27 : vector<32x196xf32>
    %29 = vector.broadcast %1 : vector<32x1xf32> to vector<32x196xf32>
    %30 = arith.addf %28, %29 : vector<32x196xf32>
    %cst_13 = arith.constant 0.000000e+00 : f32
    %31 = vector.broadcast %cst_13 : f32 to vector<32x196xf32>
    %32 = arith.maximumf %30, %31 : vector<32x196xf32>
    %c1_14 = arith.constant 1 : index
    %c0_15 = arith.constant 0 : index
    %c0_16 = arith.constant 0 : index
    %33 = vector.load %arg4[%c1_14, %c0_15, %c0_16] : memref<2x32x196xf32, #tpu.memory_space<vmem>>, vector<1x32x196xf32>
    %34 = vector.shape_cast %33 : vector<1x32x196xf32> to vector<32x196xf32>
    %35 = vector.shape_cast %32 : vector<32x196xf32> to vector<1x32x196xf32>
    tpu.vector_store %arg4[%c1_14, %c0_15, %c0_16], %35 {strides = array<i32>} : memref<2x32x196xf32, #tpu.memory_space<vmem>>, vector<1x32x196xf32>,
    return
  }
  func.func @transform_0(%arg0: i32) -> (i32, i32, i32) {
    %c0_i32 = arith.constant 0 : i32
    %c0_i32_0 = arith.constant 0 : i32
    %c0_i32_1 = arith.constant 0 : i32
    return %arg0, %c0_i32, %c0_i32_0 : i32, i32, i32
  }
  func.func @transform_1(%arg0: i32) -> (i32, i32) {
    %c0_i32 = arith.constant 0 : i32
    %c0_i32_0 = arith.constant 0 : i32
    %c0_i32_1 = arith.constant 0 : i32
    return %c0_i32, %c0_i32_0 : i32, i32
  }
  func.func @transform_2(%arg0: i32) -> (i32, i32) {
    %c0_i32 = arith.constant 0 : i32
    %c0_i32_0 = arith.constant 0 : i32
    %c0_i32_1 = arith.constant 0 : i32
    return %c0_i32, %c0_i32_0 : i32, i32
  }
  func.func @transform_3(%arg0: i32) -> (i32, i32, i32) {
    %c0_i32 = arith.constant 0 : i32
    %c0_i32_0 = arith.constant 0 : i32
    %c0_i32_1 = arith.constant 0 : i32
    return %arg0, %c0_i32, %c0_i32_0 : i32, i32, i32
  }
}

module attributes {stable_mosaic.version = 11 : i64} {
  func.func @fc_kernel(%arg0: i32, %arg1: memref<2x6272xf32, #tpu.memory_space<vmem>>, %arg2: memref<6272x128xf32, #tpu.memory_space<vmem>>, %arg3: memref<1x128xf32, #tpu.memory_space<vmem>>, %arg4: memref<128x10xf32, #tpu.memory_space<vmem>>, %arg5: memref<1x10xf32, #tpu.memory_space<vmem>>, %arg6: memref<2x10xf32, #tpu.memory_space<vmem>>) attributes {dimension_semantics = [#tpu.dimension_semantics<parallel>], iteration_bounds = array<i64: 1>, scalar_prefetch = 0 : i64, scratch_operands = 0 : i64, tpu.core_type = #tpu.core_type<tc>, window_params = [{transform_indices = @transform_0, window_bounds = array<i64: 2, 6272>}, {pipeline_mode = #tpu.pipeline_mode<synchronous>, transform_indices = @transform_1, window_bounds = array<i64: 6272, 128>}, {pipeline_mode = #tpu.pipeline_mode<synchronous>, transform_indices = @transform_2, window_bounds = array<i64: 1, 128>}, {pipeline_mode = #tpu.pipeline_mode<synchronous>, transform_indices = @transform_3, window_bounds = array<i64: 128, 10>}, {pipeline_mode = #tpu.pipeline_mode<synchronous>, transform_indices = @transform_4, window_bounds = array<i64: 1, 10>}, {transform_indices = @transform_5, window_bounds = array<i64: 2, 10>}]} {
    %c0 = arith.constant 0 : index
    %c0_0 = arith.constant 0 : index
    %0 = vector.load %arg1[%c0, %c0_0] : memref<2x6272xf32, #tpu.memory_space<vmem>>, vector<2x6272xf32>
    %c0_1 = arith.constant 0 : index
    %c0_2 = arith.constant 0 : index
    %1 = vector.load %arg2[%c0_1, %c0_2] : memref<6272x128xf32, #tpu.memory_space<vmem>>, vector<6272x128xf32>
    %cst = arith.constant dense<0.000000e+00> : vector<2x128xf32>
    %2 = tpu.matmul %0, %1, %cst {dimension_numbers = #tpu.dot_dimension_numbers<[1], [0], [0], [1], [0, 0, 1, 1], [], []>} : vector<2x6272xf32>, vector<6272x128xf32>, vector<2x128xf32> -> vector<2x128xf32>
    %c0_3 = arith.constant 0 : index
    %c0_4 = arith.constant 0 : index
    %3 = vector.load %arg3[%c0_3, %c0_4] : memref<1x128xf32, #tpu.memory_space<vmem>>, vector<1x128xf32>
    %4 = vector.broadcast %3 : vector<1x128xf32> to vector<2x128xf32>
    %5 = arith.addf %2, %4 : vector<2x128xf32>
    %cst_5 = arith.constant 0.000000e+00 : f32
    %6 = vector.broadcast %cst_5 : f32 to vector<2x128xf32>
    %7 = arith.maximumf %5, %6 : vector<2x128xf32>
    %c0_6 = arith.constant 0 : index
    %c0_7 = arith.constant 0 : index
    %8 = vector.load %arg4[%c0_6, %c0_7] : memref<128x10xf32, #tpu.memory_space<vmem>>, vector<128x10xf32>
    %cst_8 = arith.constant dense<0.000000e+00> : vector<2x10xf32>
    %9 = tpu.matmul %7, %8, %cst_8 {dimension_numbers = #tpu.dot_dimension_numbers<[1], [0], [0], [1], [0, 0, 1, 1], [], []>} : vector<2x128xf32>, vector<128x10xf32>, vector<2x10xf32> -> vector<2x10xf32>
    %c0_9 = arith.constant 0 : index
    %c0_10 = arith.constant 0 : index
    %10 = vector.load %arg5[%c0_9, %c0_10] : memref<1x10xf32, #tpu.memory_space<vmem>>, vector<1x10xf32>
    %11 = vector.broadcast %10 : vector<1x10xf32> to vector<2x10xf32>
    %12 = arith.addf %9, %11 : vector<2x10xf32>
    %c0_11 = arith.constant 0 : index
    %c0_12 = arith.constant 0 : index
    %13 = vector.load %arg6[%c0_11, %c0_12] : memref<2x10xf32, #tpu.memory_space<vmem>>, vector<2x10xf32>
    tpu.vector_store %arg6[%c0_11, %c0_12], %12 {strides = array<i32>} : memref<2x10xf32, #tpu.memory_space<vmem>>, vector<2x10xf32>,
    return
  }
  func.func @transform_0(%arg0: i32) -> (i32, i32) {
    %c0_i32 = arith.constant 0 : i32
    %c0_i32_0 = arith.constant 0 : i32
    return %arg0, %c0_i32 : i32, i32
  }
  func.func @transform_1(%arg0: i32) -> (i32, i32) {
    %c0_i32 = arith.constant 0 : i32
    %c0_i32_0 = arith.constant 0 : i32
    %c0_i32_1 = arith.constant 0 : i32
    return %c0_i32, %c0_i32_0 : i32, i32
  }
  func.func @transform_2(%arg0: i32) -> (i32, i32) {
    %c0_i32 = arith.constant 0 : i32
    %c0_i32_0 = arith.constant 0 : i32
    %c0_i32_1 = arith.constant 0 : i32
    return %c0_i32, %c0_i32_0 : i32, i32
  }
  func.func @transform_3(%arg0: i32) -> (i32, i32) {
    %c0_i32 = arith.constant 0 : i32
    %c0_i32_0 = arith.constant 0 : i32
    %c0_i32_1 = arith.constant 0 : i32
    return %c0_i32, %c0_i32_0 : i32, i32
  }
  func.func @transform_4(%arg0: i32) -> (i32, i32) {
    %c0_i32 = arith.constant 0 : i32
    %c0_i32_0 = arith.constant 0 : i32
    %c0_i32_1 = arith.constant 0 : i32
    return %c0_i32, %c0_i32_0 : i32, i32
  }
  func.func @transform_5(%arg0: i32) -> (i32, i32) {
    %c0_i32 = arith.constant 0 : i32
    %c0_i32_0 = arith.constant 0 : i32
    return %arg0, %c0_i32 : i32, i32
  }
}

</mosaic_0001>

<bundles_post_ra>
// kernel: simple_cnn_forward.2
= control target key start
LH: loop header
LB: loop body
LE: loop exit
PB: predicated region body
PF: predicated region fallthrough
CT: control target
= control target key end

     0   :  { %v584_v3 = vmov 0.0   ;;  %vm38_vm0 = vcmask 130048   ;;  %v585_v11 = vmov 0   ;;  %vm309_vm1 = vcmask 556032   ;;  %s936_s0 = inlined_call_operand.vmem [shape: f32[2,16,196], index: 0, kind: input, shape index: {}]   ;;  %s937_s1 = inlined_call_operand.vmem [shape: f32[128,16], index: 1, kind: input, shape index: {}]   ;;  %s938_s2 = inlined_call_operand.vmem [shape: f32[32,1], index: 2, kind: input, shape index: {}]   ;;  %s939_s3 = inlined_call_operand.vmem [shape: f32[2,32,196], index: 3, kind: output, shape index: {}]  }
   0x1   :  { %v37_v0 = vld [vmem:[%s936_s0 + $0x18] sm:$0xff]  ;;  %v36_v2 = vld [vmem:[%s936_s0 + $0x10] sm:$0xff]  ;;  %151 = vmatprep.mubr.f32.mxu0 %v584_v3  ;;  %386 = vmatprep.mubr.f32.mxu1 %v584_v3  ;;  %v35_v5 = vld [vmem:[%s936_s0 + $0x8] sm:$0xff] }
   0x2   :  { %v555_v1 = vld [vmem:[%s936_s0 + $0x38] sm:$0xff]  ;;  %115 = vmatprep.subr.mxu0 %v37_v0  ;;  %v554_v4 = vld [vmem:[%s936_s0 + $0x30] sm:$0xff]  ;;  %v553_v6 = vld [vmem:[%s936_s0 + $0x28] sm:$0xff]  ;;  %582 = vset.pattern.permute.xlu0 %v585_v11 }
   0x3   :  { %350 = vmatprep.subr.mxu1 %v555_v1  ;;  %116 = vmatpush1.msra.mxu0 %v36_v2  ;;  %v34_v7 = vld [vmem:[%s936_s0] sm:$0xff]  ;;  %v15_v10 = vld [vmem:[%s937_s1 + $0x8] sm:$0xff]  ;;  %v32_v13 = vld [vmem:[%s938_s2 + $0x10] sm:$0xff] }
   0x4   :  { %351 = vmatpush1.msra.mxu1 %v554_v4  ;;  %v552_v8 = vld [vmem:[%s936_s0 + $0x20] sm:$0xff]  ;;  %117 = vmatprep.subr.mxu0 %v35_v5  ;;  %v16_v14 = vld [vmem:[%s937_s1 + $0x10] sm:$0xff]  ;;  %v31_v15 = vld [vmem:[%s938_s2 + $0x8] sm:$0xff] }
   0x5   :  { %v14_v9 = vld [vmem:[%s937_s1] sm:$0xff]  ;;  %352 = vmatprep.subr.mxu1 %v553_v6  ;;  %118 = vmatpush1.msra.mxu0 %v34_v7  ;;  %v33_v16 = vld [vmem:[%s938_s2 + $0x18] sm:$0xff]  ;;  %v19_v19 = vld [vmem:[%s937_s1 + $0x28] sm:$0xff] }
   0x6   :  { %353 = vmatpush1.msra.mxu1 %v552_v8  ;;  %536 = vmatmul.mubr.msk.f32.vlgmr.msra.gmra.mxu0 %vm38_vm0, %v14_v9  ;;  %v30_v12 = vld [vmem:[%s938_s2] sm:$0xff]  ;;  %v17_v17 = vld [vmem:[%s937_s1 + $0x18] sm:$0xff]  ;;  %v20_v20 = vld [vmem:[%s937_s1 + $0x30] sm:$0xff] }
   0x7   :  { %556 = vmatmul.mubr.msk.f32.vlgmr.msra.gmra.mxu1 %vm38_vm0, %v14_v9  ;;  %157 = vmatprep.mubr.f32.mxu0 %v584_v3  ;;  %v18_v18 = vld [vmem:[%s937_s1 + $0x20] sm:$0xff]  ;;  %v21_v21 = vld [vmem:[%s937_s1 + $0x38] sm:$0xff]  ;;  %v23_v23 = vld [vmem:[%s937_s1 + $0x48] sm:$0xff] }
   0x8   :  { %392 = vmatprep.mubr.f32.mxu1 %v584_v3  ;;  %583 = vset.pattern.permute.xlu1 %v585_v11  ;;  %v22_v22 = vld [vmem:[%s937_s1 + $0x40] sm:$0xff]  ;;  %v24_v24 = vld [vmem:[%s937_s1 + $0x50] sm:$0xff]  ;;  %v25_v25 = vld [vmem:[%s937_s1 + $0x58] sm:$0xff] }
   0x9   :  { %274 = vperm.xlu0 %582, %v30_v12   ;;  %284 = vperm.xlu1 %583, %v32_v13   ;;  %v26_v26 = vld [vmem:[%s937_s1 + $0x60] sm:$0xff]  ;;  %v27_v27 = vld [vmem:[%s937_s1 + $0x68] sm:$0xff]  ;;  %v28_v28 = vld [vmem:[%s937_s1 + $0x70] sm:$0xff] }
   0xa   :  { %537 = vmatmul.mubr.msk.f32.gmra.mxu0 %vm38_vm0, %v15_v10  ;;  %v29_v29 = vld [vmem:[%s937_s1 + $0x78] sm:$0xff] }
   0xb   :  { %557 = vmatmul.mubr.msk.f32.gmra.mxu1 %vm38_vm0, %v15_v10  ;;  %163 = vmatprep.mubr.f32.mxu0 %v584_v3 }
   0xc   :  { %398 = vmatprep.mubr.f32.mxu1 %v584_v3 }
   0xd   :  { %279 = vperm.xlu0 %582, %v31_v15   ;;  %289 = vperm.xlu1 %583, %v33_v16  }
   0xe   :  { %538 = vmatmul.mubr.msk.f32.gmra.mxu0 %vm38_vm0, %v16_v14 }
   0xf   :  { %558 = vmatmul.mubr.msk.f32.gmra.mxu1 %vm38_vm0, %v16_v14  ;;  %169 = vmatprep.mubr.f32.mxu0 %v584_v3 }
  0x10   :  { %404 = vmatprep.mubr.f32.mxu1 %v584_v3 }
  0x12   :  { %539 = vmatmul.mubr.msk.f32.gmra.mxu0 %vm38_vm0, %v17_v17 }
  0x13   :  { %559 = vmatmul.mubr.msk.f32.gmra.mxu1 %vm38_vm0, %v17_v17  ;;  %175 = vmatprep.mubr.f32.mxu0 %v584_v3 }
  0x14   :  { %410 = vmatprep.mubr.f32.mxu1 %v584_v3 }
  0x16   :  { %540 = vmatmul.mubr.msk.f32.gmra.mxu0 %vm38_vm0, %v18_v18 }
  0x17   :  { %560 = vmatmul.mubr.msk.f32.gmra.mxu1 %vm38_vm0, %v18_v18  ;;  %181 = vmatprep.mubr.f32.mxu0 %v584_v3 }
  0x18   :  { %416 = vmatprep.mubr.f32.mxu1 %v584_v3 }
  0x1a   :  { %541 = vmatmul.mubr.msk.f32.gmra.mxu0 %vm38_vm0, %v19_v19 }
  0x1b   :  { %561 = vmatmul.mubr.msk.f32.gmra.mxu1 %vm38_vm0, %v19_v19  ;;  %187 = vmatprep.mubr.f32.mxu0 %v584_v3 }
  0x1c   :  { %422 = vmatprep.mubr.f32.mxu1 %v584_v3 }
  0x1e   :  { %542 = vmatmul.mubr.msk.f32.gmra.mxu0 %vm38_vm0, %v20_v20 }
  0x1f   :  { %562 = vmatmul.mubr.msk.f32.gmra.mxu1 %vm38_vm0, %v20_v20  ;;  %193 = vmatprep.mubr.f32.mxu0 %v584_v3 }
  0x20   :  { %428 = vmatprep.mubr.f32.mxu1 %v584_v3 }
  0x22   :  { %543 = vmatmul.mubr.msk.f32.gmra.mxu0 %vm38_vm0, %v21_v21 }
  0x23   :  { %563 = vmatmul.mubr.msk.f32.gmra.mxu1 %vm38_vm0, %v21_v21  ;;  %199 = vmatprep.mubr.f32.mxu0 %v584_v3 }
  0x24   :  { %434 = vmatprep.mubr.f32.mxu1 %v584_v3 }
  0x26   :  { %544 = vmatmul.mubr.msk.f32.gmra.mxu0 %vm38_vm0, %v22_v22 }
  0x27   :  { %564 = vmatmul.mubr.msk.f32.gmra.mxu1 %vm38_vm0, %v22_v22  ;;  %205 = vmatprep.mubr.f32.mxu0 %v584_v3 }
  0x28   :  { %440 = vmatprep.mubr.f32.mxu1 %v584_v3 }
  0x2a   :  { %545 = vmatmul.mubr.msk.f32.gmra.mxu0 %vm38_vm0, %v23_v23 }
  0x2b   :  { %565 = vmatmul.mubr.msk.f32.gmra.mxu1 %vm38_vm0, %v23_v23  ;;  %211 = vmatprep.mubr.f32.mxu0 %v584_v3 }
  0x2c   :  { %446 = vmatprep.mubr.f32.mxu1 %v584_v3 }
  0x2e   :  { %546 = vmatmul.mubr.msk.f32.gmra.mxu0 %vm38_vm0, %v24_v24 }
  0x2f   :  { %566 = vmatmul.mubr.msk.f32.gmra.mxu1 %vm38_vm0, %v24_v24  ;;  %217 = vmatprep.mubr.f32.mxu0 %v584_v3 }
  0x30   :  { %452 = vmatprep.mubr.f32.mxu1 %v584_v3 }
  0x32   :  { %547 = vmatmul.mubr.msk.f32.gmra.mxu0 %vm38_vm0, %v25_v25 }
  0x33   :  { %567 = vmatmul.mubr.msk.f32.gmra.mxu1 %vm38_vm0, %v25_v25  ;;  %223 = vmatprep.mubr.f32.mxu0 %v584_v3 }
  0x34   :  { %458 = vmatprep.mubr.f32.mxu1 %v584_v3 }
  0x36   :  { %548 = vmatmul.mubr.msk.f32.gmra.mxu0 %vm38_vm0, %v26_v26 }
  0x37   :  { %568 = vmatmul.mubr.msk.f32.gmra.mxu1 %vm38_vm0, %v26_v26  ;;  %229 = vmatprep.mubr.f32.mxu0 %v584_v3 }
  0x38   :  { %464 = vmatprep.mubr.f32.mxu1 %v584_v3 }
  0x3a   :  { %549 = vmatmul.mubr.msk.f32.gmra.mxu0 %vm38_vm0, %v27_v27 }
  0x3b   :  { %569 = vmatmul.mubr.msk.f32.gmra.mxu1 %vm38_vm0, %v27_v27  ;;  %235 = vmatprep.mubr.f32.mxu0 %v584_v3 }
  0x3c   :  { %470 = vmatprep.mubr.f32.mxu1 %v584_v3 }
  0x3e   :  { %550 = vmatmul.mubr.msk.f32.gmra.mxu0 %vm38_vm0, %v28_v28 }
  0x3f   :  { %570 = vmatmul.mubr.msk.f32.gmra.mxu1 %vm38_vm0, %v28_v28  ;;  %241 = vmatprep.mubr.f32.mxu0 %v584_v3 }
  0x40   :  { %476 = vmatprep.mubr.f32.mxu1 %v584_v3 }
  0x42   :  { %551 = vmatmul.mubr.msk.f32.gmra.mxu0 %vm38_vm0, %v29_v29 }
  0x43   :  { %571 = vmatmul.mubr.msk.f32.gmra.mxu1 %vm38_vm0, %v29_v29 }
  0x84   :  { %v275_v24 = vpop.permute.xlu0 %274 }
  0xc6   :  { %v754_v30 = vpop.f32.mrf.mxu0 }
  0xc7   :  { %v756_v31 = vpop.f32.mrf.mxu1 }
  0xc8   :  { %v758_v32 = vpop.f32.mrf.mxu0 }
  0xc9   :  { %v760_v33 = vpop.f32.mrf.mxu1 }
  0xca   :  { %v762_v34 = vpop.f32.mrf.mxu0 }
  0xcb   :  { %v764_v35 = vpop.f32.mrf.mxu1 }
  0xcc   :  { %v766_v36 = vpop.f32.mrf.mxu0 }
  0xcd   :  { %v768_v37 = vpop.f32.mrf.mxu1 }
  0xce   :  { %v770_v38 = vpop.f32.mrf.mxu0 }
  0xcf   :  { %v772_v39 = vpop.f32.mrf.mxu1 }
  0xd0   :  { %v774_v40 = vpop.f32.mrf.mxu0 }
  0xd1   :  { %v776_v41 = vpop.f32.mrf.mxu1 }
  0xd2   :  { %v778_v42 = vpop.f32.mrf.mxu0 }
  0xd3   :  { %v780_v43 = vpop.f32.mrf.mxu1 }
  0xd4   :  { %v782_v44 = vpop.f32.mrf.mxu0 }
  0xd5   :  { %v784_v45 = vpop.f32.mrf.mxu1 }
  0xd6   :  { %v177_v46 = vpop.f32.mrf.mxu0 }
  0xd7   :  { %v412_v47 = vpop.f32.mrf.mxu1  ;;  %v248_v14 = vmax.f32 %v754_v30, %v177_v46 }
  0xd8   :  { %v179_v48 = vpop.f32.mrf.mxu0  ;;  %v483_v15 = vmax.f32 %v756_v31, %v412_v47 }
  0xd9   :  { %v414_v49 = vpop.f32.mrf.mxu1  ;;  %v249_v16 = vmax.f32 %v758_v32, %v179_v48 }
  0xda   :  { %v786_v50 = vpop.f32.mrf.mxu0  ;;  %v484_v17 = vmax.f32 %v760_v33, %v414_v49 }
  0xdb   :  { %v788_v51 = vpop.f32.mrf.mxu1  ;;  %v250_v20 = vmax.f32 %v762_v34, %v786_v50 }
  0xdc   :  { %v790_v52 = vpop.f32.mrf.mxu0  ;;  %v485_v21 = vmax.f32 %v764_v35, %v788_v51 }
  0xdd   :  { %v792_v53 = vpop.f32.mrf.mxu1  ;;  %v251_v25 = vmax.f32 %v766_v36, %v790_v52 }
  0xde   :  { %v794_v54 = vpop.f32.mrf.mxu0  ;;  %v486_v26 = vmax.f32 %v768_v37, %v792_v53 }
  0xdf   :  { %v796_v55 = vpop.f32.mrf.mxu1  ;;  %v252_v27 = vmax.f32 %v770_v38, %v794_v54 }
  0xe0   :  { %v798_v56 = vpop.f32.mrf.mxu0  ;;  %v487_v28 = vmax.f32 %v772_v39, %v796_v55 }
  0xe1   :  { %v800_v57 = vpop.f32.mrf.mxu1  ;;  %v253_v35 = vmax.f32 %v774_v40, %v798_v56 }
  0xe2   :  { %v802_v58 = vpop.f32.mrf.mxu0  ;;  %v488_v36 = vmax.f32 %v776_v41, %v800_v57 }
  0xe3   :  { %v804_v59 = vpop.f32.mrf.mxu1  ;;  %v254_v37 = vmax.f32 %v778_v42, %v802_v58 }
  0xe4   :  { %v806_v60 = vpop.f32.mrf.mxu0  ;;  %v489_v38 = vmax.f32 %v780_v43, %v804_v59 }
  0xe5   :  { %v808_v61 = vpop.f32.mrf.mxu1  ;;  %v255_v51 = vmax.f32 %v782_v44, %v806_v60 }
  0xe6   :  { %v201_v62 = vpop.f32.mrf.mxu0  ;;  %v490_v40 = vmax.f32 %v784_v45, %v808_v61 }
  0xe7   :  { %v436_v63 = vpop.f32.mrf.mxu1 }
  0xe8   :  { %v203_v0 = vpop.f32.mrf.mxu0 }
  0xe9   :  { %v438_v1 = vpop.f32.mrf.mxu1 }
  0xea   :  { %v207_v2 = vpop.f32.mrf.mxu0 }
  0xeb   :  { %v442_v3 = vpop.f32.mrf.mxu1 }
  0xec   :  { %v810_v4 = vpop.f32.mrf.mxu0 }
  0xed   :  { %v812_v5 = vpop.f32.mrf.mxu1 }
  0xee   :  { %v814_v6 = vpop.f32.mrf.mxu0 }
  0xef   :  { %v816_v7 = vpop.f32.mrf.mxu1 }
  0xf0   :  { %v818_v8 = vpop.f32.mrf.mxu0 }
  0xf1   :  { %v820_v9 = vpop.f32.mrf.mxu1 }
  0xf2   :  { %v822_v10 = vpop.f32.mrf.mxu0 }
  0xf3   :  { %v824_v11 = vpop.f32.mrf.mxu1 }
  0xf4   :  { %v826_v12 = vpop.f32.mrf.mxu0 }
  0xf5   :  { %v828_v13 = vpop.f32.mrf.mxu1 }
  0xf6   :  { %v225_v18 = vpop.f32.mrf.mxu0 }
  0xf7   :  { %v460_v19 = vpop.f32.mrf.mxu1  ;;  %v256_v22 = vmax.f32 %v201_v62, %v225_v18 }
  0xf8   :  { %v491_v23 = vmax.f32 %v436_v63, %v460_v19  ;;  %v227_v29 = vpop.f32.mrf.mxu0  ;;  %v280_v63 = vpop.permute.xlu0 %279 }
  0xf9   :  { %v462_v30 = vpop.f32.mrf.mxu1  ;;  %v264_v31 = vmax.f32 %v248_v14, %v256_v22  ;;  %v257_v33 = vmax.f32 %v203_v0, %v227_v29  ;;  %v285_v29 = vpop.permute.xlu1 %284 }
  0xfa   :  { %v499_v32 = vmax.f32 %v483_v15, %v491_v23  ;;  %v492_v34 = vmax.f32 %v438_v1, %v462_v30  ;;  %v231_v46 = vpop.f32.mrf.mxu0 }
  0xfb   :  { %v466_v39 = vpop.f32.mrf.mxu1  ;;  %v265_v47 = vmax.f32 %v249_v16, %v257_v33  ;;  %v292_v49 = vadd.f32 %v275_v24, %v264_v31  ;;  %v258_v52 = vmax.f32 %v207_v2, %v231_v46 }
  0xfc   :  { %v500_v48 = vmax.f32 %v484_v17, %v492_v34  ;;  %v507_v50 = vadd.f32 %v499_v32, %v275_v24  ;;  %v493_v41 = vmax.f32 %v442_v3, %v466_v39  ;;  %v233_v53 = vpop.f32.mrf.mxu0 }
  0xfd   :  { %v468_v54 = vpop.f32.mrf.mxu1  ;;  %v293_v55 = vadd.f32 %v275_v24, %v265_v47  ;;  %v300_v56 = vmax.f32 %v292_v49, 0.0  ;;  %v266_v0 = vmax.f32 %v250_v20, %v258_v52  ;;  %v259_v14 = vmax.f32 %v810_v4, %v233_v53  ;;  %v290_v42 = vpop.permute.xlu1 %289 }
  0xfe   :  { %v508_v57 = vadd.f32 %v500_v48, %v275_v24  ;;  %v515_v62 = vmax.f32 %v507_v50, 0.0  ;;  %v501_v1 = vmax.f32 %v485_v21, %v493_v41  ;;  %v494_v15 = vmax.f32 %v812_v5, %v468_v54  ;;  %v237_v16 = vpop.f32.mrf.mxu0 }
  0xff   :  { %v472_v17 = vpop.f32.mrf.mxu1  ;;  %v301_v18 = vmax.f32 %v293_v55, 0.0  ;;  %308 = vst [vmem:[%s939_s3] sm:$0xff] %v300_v56  ;;  %v260_v3 = vmax.f32 %v814_v6, %v237_v16  ;;  %v267_v20 = vmax.f32 %v251_v25, %v259_v14  ;;  %v294_v21 = vadd.f32 %v280_v63, %v266_v0 }
 0x100   :  { %v516_v2 = vmax.f32 %v508_v57, 0.0  ;;  %572 = vst [vmem:[%s939_s3 + $0x40] sm:$0xff] %v515_v62  ;;  %v495_v19 = vmax.f32 %v816_v7, %v472_v17  ;;  %v502_v4 = vmax.f32 %v486_v26, %v494_v15  ;;  %v509_v5 = vadd.f32 %v501_v1, %v280_v63  ;;  %v239_v22 = vpop.f32.mrf.mxu0 }
 0x101   :  { %v474_v23 = vpop.f32.mrf.mxu1  ;;  %310 = vst.msk [vmem:[%s939_s3 + $0x8] sm:$0xff] %vm309_vm1, %v301_v18  ;;  %v268_v24 = vmax.f32 %v252_v27, %v260_v3  ;;  %v261_v7 = vmax.f32 %v818_v8, %v239_v22  ;;  %v295_v26 = vadd.f32 %v280_v63, %v267_v20  ;;  %v302_v30 = vmax.f32 %v294_v21, 0.0 }
 0x102   :  { %573 = vst.msk [vmem:[%s939_s3 + $0x48] sm:$0xff] %vm309_vm1, %v516_v2  ;;  %v503_v6 = vmax.f32 %v487_v28, %v495_v19  ;;  %v496_v25 = vmax.f32 %v820_v9, %v474_v23  ;;  %v510_v31 = vadd.f32 %v502_v4, %v280_v63  ;;  %v517_v32 = vmax.f32 %v509_v5, 0.0  ;;  %v243_v33 = vpop.f32.mrf.mxu0 }
 0x103   :  { %v478_v34 = vpop.f32.mrf.mxu1  ;;  %v296_v46 = vadd.f32 %v285_v29, %v268_v24  ;;  %v269_v47 = vmax.f32 %v253_v35, %v261_v7  ;;  %v303_v49 = vmax.f32 %v295_v26, 0.0  ;;  %311 = vst [vmem:[%s939_s3 + $0x10] sm:$0xff] %v302_v30  ;;  %v262_v8 = vmax.f32 %v822_v10, %v243_v33 }
 0x104   :  { %v511_v39 = vadd.f32 %v503_v6, %v285_v29  ;;  %v504_v48 = vmax.f32 %v488_v36, %v496_v25  ;;  %v518_v27 = vmax.f32 %v510_v31, 0.0  ;;  %574 = vst [vmem:[%s939_s3 + $0x50] sm:$0xff] %v517_v32  ;;  %v497_v9 = vmax.f32 %v824_v11, %v478_v34  ;;  %v245_v28 = vpop.f32.mrf.mxu0 }
 0x105   :  { %v480_v50 = vpop.f32.mrf.mxu1  ;;  %v304_v52 = vmax.f32 %v296_v46, 0.0  ;;  %v297_v35 = vadd.f32 %v285_v29, %v269_v47  ;;  %312 = vst.msk [vmem:[%s939_s3 + $0x18] sm:$0xff] %vm309_vm1, %v303_v49  ;;  %v270_v10 = vmax.f32 %v254_v37, %v262_v8  ;;  %v263_v53 = vmax.f32 %v826_v12, %v245_v28 }
 0x106   :  { %v519_v41 = vmax.f32 %v511_v39, 0.0  ;;  %v512_v36 = vadd.f32 %v504_v48, %v285_v29  ;;  %575 = vst.msk [vmem:[%s939_s3 + $0x58] sm:$0xff] %vm309_vm1, %v518_v27  ;;  %v505_v11 = vmax.f32 %v489_v38, %v497_v9  ;;  %v498_v54 = vmax.f32 %v828_v13, %v480_v50 }
 0x107   :  { %313 = vst [vmem:[%s939_s3 + $0x20] sm:$0xff] %v304_v52  ;;  %v305_v55 = vmax.f32 %v297_v35, 0.0  ;;  %v298_v58 = vadd.f32 %v290_v42, %v270_v10  ;;  %v271_v43 = vmax.f32 %v255_v51, %v263_v53 }
 0x108   :  { %576 = vst [vmem:[%s939_s3 + $0x60] sm:$0xff] %v519_v41  ;;  %v520_v56 = vmax.f32 %v512_v36, 0.0  ;;  %v513_v37 = vadd.f32 %v505_v11, %v290_v42  ;;  %v506_v59 = vmax.f32 %v490_v40, %v498_v54 }
 0x109   :  { %314 = vst.msk [vmem:[%s939_s3 + $0x28] sm:$0xff] %vm309_vm1, %v305_v55  ;;  %v306_v12 = vmax.f32 %v298_v58, 0.0  ;;  %v299_v38 = vadd.f32 %v290_v42, %v271_v43 }
 0x10a   :  { %577 = vst.msk [vmem:[%s939_s3 + $0x68] sm:$0xff] %vm309_vm1, %v520_v56  ;;  %v521_v13 = vmax.f32 %v513_v37, 0.0  ;;  %v514_v57 = vadd.f32 %v506_v59, %v290_v42 }
 0x10b   :  { %315 = vst [vmem:[%s939_s3 + $0x30] sm:$0xff] %v306_v12  ;;  %v307_v44 = vmax.f32 %v299_v38, 0.0 }
 0x10c   :  { %578 = vst [vmem:[%s939_s3 + $0x70] sm:$0xff] %v521_v13  ;;  %v522_v45 = vmax.f32 %v514_v57, 0.0 }
 0x10d   :  { %316 = vst.msk [vmem:[%s939_s3 + $0x38] sm:$0xff] %vm309_vm1, %v307_v44 }
 0x10e   :  { %579 = vst.msk [vmem:[%s939_s3 + $0x78] sm:$0xff] %vm309_vm1, %v522_v45 }

// kernel: simple_cnn_forward.3
= control target key start
LH: loop header
LB: loop body
LE: loop exit
PB: predicated region body
PF: predicated region fallthrough
CT: control target
= control target key end

     0   :  { %10 = vsyncpa [#allocation3], 0  ;;  %s4249_s0 = inlined_call_operand.vmem [shape: f32[2,6272], index: 0, kind: input, shape index: {}]   ;;  %s4250_s1 = inlined_call_operand.hbm [shape: f32[6272,128], index: 1, kind: input, shape index: {}]   ;;  %s4251_s2 = inlined_call_operand.hbm [shape: f32[1,128], index: 2, kind: input, shape index: {}]   ;;  %s4252_s3 = inlined_call_operand.vmem [shape: f32[128,10], index: 3, kind: input, shape index: {}]   ;;  %s4253_s4 = inlined_call_operand.hbm [shape: f32[1,10], index: 4, kind: input, shape index: {}]   ;;  %s4254_s5 = inlined_call_operand.hbm [shape: f32[2,10], index: 5, kind: output, shape index: {}]  }
   0x1   :  { %11 = vsyncpa [#allocation6], 0 }
   0x2   :  { %12 = vsyncpa [#allocation4], 0  ;;  %s4051_s18 = smov [#allocation5]   ;;  %s4052_s20 = smov [#allocation2]  }
   0x3   :  { %s33_s19 = sshll.u32 %s4051_s18, 4  ;;  %s20_s21 = sshll.u32 %s4052_s20, 4  ;;  %s34_s19 = int_to_ptr.vmem [resolvable:$true] %s33_s19  ;;  %s21_s21 = int_to_ptr.vmem [resolvable:$true] %s20_s21 }
   0x4   :  { %s3973_s22 = scalar_lea.vmem %s34_s19, 16  ;;  %s3977_s23 = scalar_lea.vmem %s34_s19, 32 }
   0x5   :  { %p3974_p0 = scmp.ne.s32.totalorder %s34_s19, %s3973_s22  ;;  %p3978_p1 = scmp.lt.s32.totalorder %s34_s19, %s34_s19 }
   0x6   :  { %p3979_p2 = scmp.lt.s32.totalorder %s3977_s23, %s3973_s22 }
   0x8   :  { %p3980_p3 = por %p3979_p2, %p3978_p1 }
   0xa   :  { %p3981_p4 = pnand %p3980_p3, %p3974_p0 }
   0xc   :  { %3984 = shalt.err (!%p3981_p4)
}
   0xd   :  { %36 = dma.hbm_to_vmem [thread:$0]  %s4251_s2, 16, %s34_s19, [#allocation6]  }
   0xe   :  { %s3993_s26 = scalar_lea.vmem %s21_s21, 100352  ;;  %p3998_p6 = scmp.lt.s32.totalorder %s21_s21, %s21_s21 }
   0xf   :  { %p3994_p5 = scmp.ne.s32.totalorder %s21_s21, %s3993_s26  ;;  %p3999_p7 = scmp.lt.s32.totalorder %s3993_s26, %s3993_s26 }
  0x11   :  { %p4000_p8 = por %p3999_p7, %p3998_p6 }
  0x13   :  { %p4001_p9 = pnand %p4000_p8, %p3994_p5 }
  0x15   :  { %4004 = shalt.err (!%p4001_p9)
}
  0x16   :  { %s4053_s27 = smov 128   ;;  %s4054_s28 = smov 8  }
  0x17   :  { %26 = dma.hbm_to_vmem [thread:$0]  %s4250_s1, 100352, %s21_s21, [#allocation3], %s4053_s27, %s4053_s27, %s4054_s28  }
  0x18   :  { %s4055_s6 = smov [#allocation7]  }
  0x19   :  { %s45_s7 = sshll.u32 %s4055_s6, 4  ;;  %s46_s7 = int_to_ptr.vmem [resolvable:$true] %s45_s7 }
  0x1a   :  { %s4013_s8 = scalar_lea.vmem %s46_s7, 16  ;;  %s4017_s9 = scalar_lea.vmem %s46_s7, 32 }
  0x1b   :  { %p4014_p10 = scmp.ne.s32.totalorder %s46_s7, %s4013_s8  ;;  %p4018_p11 = scmp.lt.s32.totalorder %s46_s7, %s46_s7 }
  0x1c   :  { %p4019_p12 = scmp.lt.s32.totalorder %s4017_s9, %s4013_s8 }
  0x1e   :  { %p4020_p13 = por %p4019_p12, %p4018_p11 }
  0x20   :  { %p4021_p0 = pnand %p4020_p13, %p4014_p10 }
  0x22   :  { %4024 = shalt.err (!%p4021_p0)
}
  0x23   :  { %48 = dma.hbm_to_vmem [thread:$0]  %s4253_s4, 16, %s46_s7, [#allocation6]  }
  0x24   :  { %4045 = dma.done.wait [#allocation3], 100352  }
  0x25   :  { %4046 = vsyncadd [#allocation3], 4294866944 }
  0x26   :  { %4047 = dma.done.wait [#allocation6], 32  }
  0x27   :  { %4048 = vsyncadd [#allocation6], 4294967264  ;;  %v102_v0 = vld [vmem:[#allocation2 + $0xf8] sm:$0xff]  ;;  %v101_v2 = vld [vmem:[#allocation2 + $0xf0] sm:$0xff]  ;;  %v4056_v27 = vmov 1983009808   ;;  %v879_v29 = vlaneseq }
  0x28   :  { %v86_v1 = vld [vmem:[#allocation2 + $0x78] sm:$0xff]  ;;  %3000 = vmatprep.subr.mxu0 %v102_v0  ;;  %v85_v4 = vld [vmem:[#allocation2 + $0x70] sm:$0xff]  ;;  %v100_v6 = vld [vmem:[#allocation2 + $0xe8] sm:$0xff]  ;;  %v877_v28 = vunpack.c.l.s4 %v4056_v27  ;;  %vm4058_vm0 = vmmov 0   ;;  %vm2979_vm1 = vcmask 74752  }
  0x29   :  { %v134_v3 = vld [vmem:[#allocation2 + $0x1f8] sm:$0xff]  ;;  %3001 = vmatpush3.msra.mxu0 %v86_v1  ;;  %v133_v7 = vld [vmem:[#allocation2 + $0x1f0] sm:$0xff]  ;;  %v84_v8 = vld [vmem:[#allocation2 + $0x68] sm:$0xff]  ;;  %v880_v39 = vshrl.u32 %v879_v29, 7 }
  0x2a   :  { %v118_v5 = vld [vmem:[#allocation2 + $0x178] sm:$0xff]  ;;  %3035 = vmatprep.subr.mxu1 %v134_v3  ;;  %3002 = vmatprep.subr.mxu0 %v101_v2  ;;  %v117_v9 = vld [vmem:[#allocation2 + $0x170] sm:$0xff]  ;;  %v132_v10 = vld [vmem:[#allocation2 + $0x1e8] sm:$0xff]  ;;  %v878_v38 = vunpack.c.0.s8 %v877_v28 }
  0x2b   :  { %3036 = vmatpush3.msra.mxu1 %v118_v5  ;;  %3003 = vmatpush3.msra.mxu0 %v85_v4  ;;  %v99_v11 = vld [vmem:[#allocation2 + $0xe0] sm:$0xff]  ;;  %v116_v12 = vld [vmem:[#allocation2 + $0x168] sm:$0xff]  ;;  %v98_v15 = vld [vmem:[#allocation2 + $0xd8] sm:$0xff] }
  0x2c   :  { %3037 = vmatprep.subr.mxu1 %v133_v7  ;;  %3004 = vmatprep.subr.mxu0 %v100_v6  ;;  %v83_v13 = vld [vmem:[#allocation2 + $0x60] sm:$0xff]  ;;  %v82_v17 = vld [vmem:[#allocation2 + $0x58] sm:$0xff]  ;;  %v97_v19 = vld [vmem:[#allocation2 + $0xd0] sm:$0xff]  ;;  %v4099_v48 = vsub.s32 %v878_v38, %v880_v39 }
  0x2d   :  { %3038 = vmatpush3.msra.mxu1 %v117_v9  ;;  %v131_v14 = vld [vmem:[#allocation2 + $0x1e0] sm:$0xff]  ;;  %3005 = vmatpush3.msra.mxu0 %v84_v8  ;;  %v130_v18 = vld [vmem:[#allocation2 + $0x1d8] sm:$0xff]  ;;  %v81_v21 = vld [vmem:[#allocation2 + $0x50] sm:$0xff] }
  0x2e   :  { %3039 = vmatprep.subr.mxu1 %v132_v10  ;;  %v115_v16 = vld [vmem:[#allocation2 + $0x160] sm:$0xff]  ;;  %3006 = vmatprep.subr.mxu0 %v99_v11  ;;  %v114_v20 = vld [vmem:[#allocation2 + $0x158] sm:$0xff]  ;;  %v129_v22 = vld [vmem:[#allocation2 + $0x1d0] sm:$0xff] }
  0x2f   :  { %3040 = vmatpush3.msra.mxu1 %v116_v12  ;;  %3007 = vmatpush3.msra.mxu0 %v83_v13  ;;  %v96_v23 = vld [vmem:[#allocation2 + $0xc8] sm:$0xff]  ;;  %v113_v24 = vld [vmem:[#allocation2 + $0x150] sm:$0xff]  ;;  %v95_v30 = vld [vmem:[#allocation2 + $0xc0] sm:$0xff] }
  0x30   :  { %3041 = vmatprep.subr.mxu1 %v131_v14  ;;  %3008 = vmatprep.subr.mxu0 %v98_v15  ;;  %v80_v25 = vld [vmem:[#allocation2 + $0x48] sm:$0xff]  ;;  %v79_v32 = vld [vmem:[#allocation2 + $0x40] sm:$0xff]  ;;  %v94_v34 = vld [vmem:[#allocation2 + $0xb8] sm:$0xff] }
  0x31   :  { %3042 = vmatpush3.msra.mxu1 %v115_v16  ;;  %3009 = vmatpush3.msra.mxu0 %v82_v17  ;;  %v128_v26 = vld [vmem:[#allocation2 + $0x1c8] sm:$0xff]  ;;  %v127_v33 = vld [vmem:[#allocation2 + $0x1c0] sm:$0xff]  ;;  %v78_v36 = vld [vmem:[#allocation2 + $0x38] sm:$0xff] }
  0x32   :  { %3043 = vmatprep.subr.mxu1 %v130_v18  ;;  %3010 = vmatprep.subr.mxu0 %v97_v19  ;;  %v112_v31 = vld [vmem:[#allocation2 + $0x148] sm:$0xff]  ;;  %v111_v35 = vld [vmem:[#allocation2 + $0x140] sm:$0xff]  ;;  %v126_v37 = vld [vmem:[#allocation2 + $0x1b8] sm:$0xff] }
  0x33   :  { %3044 = vmatpush3.msra.mxu1 %v114_v20  ;;  %3011 = vmatpush3.msra.mxu0 %v81_v21  ;;  %v93_v40 = vld [vmem:[#allocation2 + $0xb0] sm:$0xff]  ;;  %v110_v41 = vld [vmem:[#allocation2 + $0x138] sm:$0xff]  ;;  %v92_v44 = vld [vmem:[#allocation2 + $0xa8] sm:$0xff] }
  0x34   :  { %3045 = vmatprep.subr.mxu1 %v129_v22  ;;  %3012 = vmatprep.subr.mxu0 %v96_v23  ;;  %v77_v42 = vld [vmem:[#allocation2 + $0x30] sm:$0xff]  ;;  %v76_v46 = vld [vmem:[#allocation2 + $0x28] sm:$0xff]  ;;  %v91_v49 = vld [vmem:[#allocation2 + $0xa0] sm:$0xff] }
  0x35   :  { %3046 = vmatpush3.msra.mxu1 %v113_v24  ;;  %3013 = vmatpush3.msra.mxu0 %v80_v25  ;;  %v125_v43 = vld [vmem:[#allocation2 + $0x1b0] sm:$0xff]  ;;  %v124_v47 = vld [vmem:[#allocation2 + $0x1a8] sm:$0xff]  ;;  %v58_v51 = vld [vmem:[%s4249_s0] sm:$0xff] }
  0x36   :  { %3047 = vmatprep.subr.mxu1 %v128_v26  ;;  %3014 = vmatprep.subr.mxu0 %v95_v30  ;;  %v109_v45 = vld [vmem:[#allocation2 + $0x130] sm:$0xff]  ;;  %v108_v50 = vld [vmem:[#allocation2 + $0x128] sm:$0xff]  ;;  %v75_v52 = vld [vmem:[#allocation2 + $0x20] sm:$0xff]  ;;  %v882_v58 = vrot.slane %v58_v51, %v4099_v48  ;;  %v875_v59 = vcombine.high %v58_v51, %v58_v51 }
  0x37   :  { %3048 = vmatpush3.msra.mxu1 %v112_v31  ;;  %3015 = vmatpush3.msra.mxu0 %v79_v32  ;;  %v123_v53 = vld [vmem:[#allocation2 + $0x1a0] sm:$0xff]  ;;  %v90_v54 = vld [vmem:[#allocation2 + $0x98] sm:$0xff]  ;;  %v89_v60 = vld [vmem:[#allocation2 + $0x90] sm:$0xff] }
  0x38   :  { %3049 = vmatprep.subr.mxu1 %v127_v33  ;;  %3016 = vmatprep.subr.mxu0 %v94_v34  ;;  %v107_v55 = vld [vmem:[#allocation2 + $0x120] sm:$0xff]  ;;  %v74_v56 = vld [vmem:[#allocation2 + $0x18] sm:$0xff]  ;;  %v73_v62 = vld [vmem:[#allocation2 + $0x10] sm:$0xff]  ;;  %v890_v4 = vcombine.high %v882_v58, %v882_v58  ;;  %v889_v5 = vrot.slane %v875_v59, %v4099_v48 }
  0x39   :  { %3050 = vmatpush3.msra.mxu1 %v111_v35  ;;  %3017 = vmatpush3.msra.mxu0 %v78_v36  ;;  %v122_v57 = vld [vmem:[#allocation2 + $0x198] sm:$0xff]  ;;  %v121_v63 = vld [vmem:[#allocation2 + $0x190] sm:$0xff]  ;;  %v88_v0 = vld [vmem:[#allocation2 + $0x88] sm:$0xff] }
  0x3a   :  { %3051 = vmatprep.subr.mxu1 %v126_v37  ;;  %3018 = vmatprep.subr.mxu0 %v93_v40  ;;  %v106_v61 = vld [vmem:[#allocation2 + $0x118] sm:$0xff]  ;;  %v105_v1 = vld [vmem:[#allocation2 + $0x110] sm:$0xff]  ;;  %v72_v2 = vld [vmem:[#allocation2 + $0x8] sm:$0xff]  ;;  %v891_v12 = vcombine.high %v889_v5, %v889_v5 }
  0x3b   :  { %3052 = vmatpush3.msra.mxu1 %v110_v41  ;;  %3019 = vmatpush3.msra.mxu0 %v77_v42  ;;  %v120_v3 = vld [vmem:[#allocation2 + $0x188] sm:$0xff]  ;;  %v87_v6 = vld [vmem:[#allocation2 + $0x80] sm:$0xff]  ;;  %v166_v10 = vld [vmem:[#allocation2 + $0x2f8] sm:$0xff] }
  0x3c   :  { %3053 = vmatprep.subr.mxu1 %v125_v43  ;;  %3020 = vmatprep.subr.mxu0 %v92_v44  ;;  %v71_v7 = vld [vmem:[#allocation2] sm:$0xff]  ;;  %v104_v8 = vld [vmem:[#allocation2 + $0x108] sm:$0xff]  ;;  %v150_v13 = vld [vmem:[#allocation2 + $0x278] sm:$0xff] }
  0x3d   :  { %3054 = vmatpush3.msra.mxu1 %v109_v45  ;;  %3021 = vmatpush3.msra.mxu0 %v76_v46  ;;  %v119_v9 = vld [vmem:[#allocation2 + $0x180] sm:$0xff]  ;;  %v165_v14 = vld [vmem:[#allocation2 + $0x2f0] sm:$0xff]  ;;  %v198_v15 = vld [vmem:[#allocation2 + $0x3f8] sm:$0xff] }
  0x3e   :  { %3055 = vmatprep.subr.mxu1 %v124_v47  ;;  %3022 = vmatprep.subr.mxu0 %v91_v49  ;;  %v103_v11 = vld [vmem:[#allocation2 + $0x100] sm:$0xff]  ;;  %v149_v16 = vld [vmem:[#allocation2 + $0x270] sm:$0xff]  ;;  %v182_v17 = vld [vmem:[#allocation2 + $0x378] sm:$0xff] }
  0x3f   :  { %3056 = vmatpush3.msra.mxu1 %v108_v50  ;;  %3023 = vmatpush3.msra.mxu0 %v75_v52  ;;  %v164_v18 = vld [vmem:[#allocation2 + $0x2e8] sm:$0xff]  ;;  %v197_v19 = vld [vmem:[#allocation2 + $0x3f0] sm:$0xff]  ;;  %v163_v22 = vld [vmem:[#allocation2 + $0x2e0] sm:$0xff] }
  0x40   :  { %3057 = vmatprep.subr.mxu1 %v123_v53  ;;  %3024 = vmatprep.subr.mxu0 %v90_v54  ;;  %v148_v20 = vld [vmem:[#allocation2 + $0x268] sm:$0xff]  ;;  %v181_v21 = vld [vmem:[#allocation2 + $0x370] sm:$0xff]  ;;  %v147_v24 = vld [vmem:[#allocation2 + $0x260] sm:$0xff] }
  0x41   :  { %3058 = vmatpush3.msra.mxu1 %v107_v55  ;;  %3025 = vmatpush3.msra.mxu0 %v74_v56  ;;  %v196_v23 = vld [vmem:[#allocation2 + $0x3e8] sm:$0xff]  ;;  %v162_v26 = vld [vmem:[#allocation2 + $0x2d8] sm:$0xff]  ;;  %v195_v27 = vld [vmem:[#allocation2 + $0x3e0] sm:$0xff] }
  0x42   :  { %3059 = vmatprep.subr.mxu1 %v122_v57  ;;  %3026 = vmatprep.subr.mxu0 %v89_v60  ;;  %v180_v25 = vld [vmem:[#allocation2 + $0x368] sm:$0xff]  ;;  %v146_v28 = vld [vmem:[#allocation2 + $0x258] sm:$0xff]  ;;  %v179_v29 = vld [vmem:[#allocation2 + $0x360] sm:$0xff] }
  0x43   :  { %3060 = vmatpush3.msra.mxu1 %v106_v61  ;;  %3027 = vmatpush3.msra.mxu0 %v73_v62  ;;  %v161_v30 = vld [vmem:[#allocation2 + $0x2d0] sm:$0xff]  ;;  %v194_v31 = vld [vmem:[#allocation2 + $0x3d8] sm:$0xff]  ;;  %v160_v34 = vld [vmem:[#allocation2 + $0x2c8] sm:$0xff] }
  0x44   :  { %3061 = vmatprep.subr.mxu1 %v121_v63  ;;  %3028 = vmatprep.subr.mxu0 %v88_v0  ;;  %v145_v32 = vld [vmem:[#allocation2 + $0x250] sm:$0xff]  ;;  %v178_v33 = vld [vmem:[#allocation2 + $0x358] sm:$0xff]  ;;  %v144_v36 = vld [vmem:[#allocation2 + $0x248] sm:$0xff] }
  0x45   :  { %3062 = vmatpush3.msra.mxu1 %v105_v1  ;;  %3029 = vmatpush3.msra.mxu0 %v72_v2  ;;  %v193_v35 = vld [vmem:[#allocation2 + $0x3d0] sm:$0xff]  ;;  %v159_v38 = vld [vmem:[#allocation2 + $0x2c0] sm:$0xff]  ;;  %v192_v39 = vld [vmem:[#allocation2 + $0x3c8] sm:$0xff] }
  0x46   :  { %3063 = vmatprep.subr.mxu1 %v120_v3  ;;  %3030 = vmatprep.subr.mxu0 %v87_v6  ;;  %v177_v37 = vld [vmem:[#allocation2 + $0x350] sm:$0xff]  ;;  %v143_v40 = vld [vmem:[#allocation2 + $0x240] sm:$0xff]  ;;  %v176_v41 = vld [vmem:[#allocation2 + $0x348] sm:$0xff] }
  0x47   :  { %1199 = vmatprep.mubr.f32.mxu0 %v890_v4  ;;  %3031 = vmatpush3.msra.mxu0 %v71_v7  ;;  %v158_v42 = vld [vmem:[#allocation2 + $0x2b8] sm:$0xff]  ;;  %v191_v43 = vld [vmem:[#allocation2 + $0x3c0] sm:$0xff]  ;;  %v157_v46 = vld [vmem:[#allocation2 + $0x2b0] sm:$0xff] }
  0x48   :  { %3064 = vmatpush3.msra.mxu1 %v104_v8  ;;  %1200 = vmatmul.mubr.f32.vlgmr.msra.gmra.mxu0 %v882_v58  ;;  %v142_v44 = vld [vmem:[#allocation2 + $0x238] sm:$0xff]  ;;  %v175_v45 = vld [vmem:[#allocation2 + $0x340] sm:$0xff]  ;;  %v141_v49 = vld [vmem:[#allocation2 + $0x230] sm:$0xff] }
  0x49   :  { %3065 = vmatprep.subr.mxu1 %v119_v9  ;;  %3070 = vmatprep.subr.mxu0 %v166_v10  ;;  %v190_v47 = vld [vmem:[#allocation2 + $0x3b8] sm:$0xff]  ;;  %v156_v51 = vld [vmem:[#allocation2 + $0x2a8] sm:$0xff]  ;;  %v189_v52 = vld [vmem:[#allocation2 + $0x3b0] sm:$0xff] }
  0x4a   :  { %3066 = vmatpush3.msra.mxu1 %v103_v11  ;;  %1269 = vmatprep.mubr.f32.mxu1 %v891_v12  ;;  %v174_v50 = vld [vmem:[#allocation2 + $0x338] sm:$0xff]  ;;  %v140_v53 = vld [vmem:[#allocation2 + $0x228] sm:$0xff]  ;;  %v173_v54 = vld [vmem:[#allocation2 + $0x330] sm:$0xff] }
  0x4b   :  { %3071 = vmatpush3.msra.mxu0 %v150_v13  ;;  %1270 = vmatmul.mubr.f32.vlgmr.msra.gmra.mxu1 %v889_v5  ;;  %v155_v55 = vld [vmem:[#allocation2 + $0x2a0] sm:$0xff]  ;;  %v188_v56 = vld [vmem:[#allocation2 + $0x3a8] sm:$0xff]  ;;  %v154_v60 = vld [vmem:[#allocation2 + $0x298] sm:$0xff] }
  0x4c   :  { %3072 = vmatprep.subr.mxu0 %v165_v14  ;;  %3105 = vmatprep.subr.mxu1 %v198_v15  ;;  %v139_v57 = vld [vmem:[#allocation2 + $0x220] sm:$0xff]  ;;  %v59_v58 = vld [vmem:[%s4249_s0 + $0x8] sm:$0xff]  ;;  %v138_v62 = vld [vmem:[#allocation2 + $0x218] sm:$0xff] }
  0x4d   :  { %3073 = vmatpush3.msra.mxu0 %v149_v16  ;;  %3106 = vmatpush3.msra.mxu1 %v182_v17  ;;  %v172_v59 = vld [vmem:[#allocation2 + $0x328] sm:$0xff]  ;;  %v187_v61 = vld [vmem:[#allocation2 + $0x3a0] sm:$0xff]  ;;  %v153_v0 = vld [vmem:[#allocation2 + $0x290] sm:$0xff]  ;;  %v892_v1 = vcombine.high %v59_v58, %v59_v58  ;;  %v899_v4 = vrot.slane %v59_v58, %v4099_v48 }
  0x4e   :  { %3074 = vmatprep.subr.mxu0 %v164_v18  ;;  %3107 = vmatprep.subr.mxu1 %v197_v19  ;;  %v171_v63 = vld [vmem:[#allocation2 + $0x320] sm:$0xff]  ;;  %v186_v2 = vld [vmem:[#allocation2 + $0x398] sm:$0xff]  ;;  %v137_v3 = vld [vmem:[#allocation2 + $0x210] sm:$0xff] }
  0x4f   :  { %3075 = vmatpush3.msra.mxu0 %v148_v20  ;;  %3108 = vmatpush3.msra.mxu1 %v181_v21  ;;  %v170_v5 = vld [vmem:[#allocation2 + $0x318] sm:$0xff]  ;;  %v152_v6 = vld [vmem:[#allocation2 + $0x288] sm:$0xff]  ;;  %v185_v7 = vld [vmem:[#allocation2 + $0x390] sm:$0xff]  ;;  %v906_v11 = vrot.slane %v892_v1, %v4099_v48  ;;  %v907_v14 = vcombine.high %v899_v4, %v899_v4 }
  0x50   :  { %3076 = vmatprep.subr.mxu0 %v163_v22  ;;  %3109 = vmatprep.subr.mxu1 %v196_v23  ;;  %v136_v8 = vld [vmem:[#allocation2 + $0x208] sm:$0xff]  ;;  %v169_v9 = vld [vmem:[#allocation2 + $0x310] sm:$0xff]  ;;  %v151_v10 = vld [vmem:[#allocation2 + $0x280] sm:$0xff] }
  0x51   :  { %3077 = vmatpush3.msra.mxu0 %v147_v24  ;;  %3110 = vmatpush3.msra.mxu1 %v180_v25  ;;  %v184_v12 = vld [vmem:[#allocation2 + $0x388] sm:$0xff]  ;;  %v135_v13 = vld [vmem:[#allocation2 + $0x200] sm:$0xff]  ;;  %v230_v17 = vld [vmem:[#allocation2 + $0x4f8] sm:$0xff]  ;;  %v908_v19 = vcombine.high %v906_v11, %v906_v11 }
  0x52   :  { %3078 = vmatprep.subr.mxu0 %v162_v26  ;;  %3111 = vmatprep.subr.mxu1 %v195_v27  ;;  %v168_v15 = vld [vmem:[#allocation2 + $0x308] sm:$0xff]  ;;  %v183_v16 = vld [vmem:[#allocation2 + $0x380] sm:$0xff]  ;;  %v214_v20 = vld [vmem:[#allocation2 + $0x478] sm:$0xff] }
  0x53   :  { %3079 = vmatpush3.msra.mxu0 %v146_v28  ;;  %3112 = vmatpush3.msra.mxu1 %v179_v29  ;;  %v167_v18 = vld [vmem:[#allocation2 + $0x300] sm:$0xff]  ;;  %v229_v21 = vld [vmem:[#allocation2 + $0x4f0] sm:$0xff]  ;;  %v262_v22 = vld [vmem:[#allocation2 + $0x5f8] sm:$0xff] }
  0x54   :  { %3080 = vmatprep.subr.mxu0 %v161_v30  ;;  %3113 = vmatprep.subr.mxu1 %v194_v31  ;;  %v213_v23 = vld [vmem:[#allocation2 + $0x470] sm:$0xff]  ;;  %v246_v24 = vld [vmem:[#allocation2 + $0x578] sm:$0xff]  ;;  %v228_v25 = vld [vmem:[#allocation2 + $0x4e8] sm:$0xff] }
  0x55   :  { %3081 = vmatpush3.msra.mxu0 %v145_v32  ;;  %3114 = vmatpush3.msra.mxu1 %v178_v33  ;;  %v261_v26 = vld [vmem:[#allocation2 + $0x5f0] sm:$0xff]  ;;  %v212_v27 = vld [vmem:[#allocation2 + $0x468] sm:$0xff]  ;;  %v227_v29 = vld [vmem:[#allocation2 + $0x4e0] sm:$0xff] }
  0x56   :  { %3082 = vmatprep.subr.mxu0 %v160_v34  ;;  %3115 = vmatprep.subr.mxu1 %v193_v35  ;;  %v245_v28 = vld [vmem:[#allocation2 + $0x570] sm:$0xff]  ;;  %v260_v30 = vld [vmem:[#allocation2 + $0x5e8] sm:$0xff]  ;;  %v211_v31 = vld [vmem:[#allocation2 + $0x460] sm:$0xff] }
  0x57   :  { %3083 = vmatpush3.msra.mxu0 %v144_v36  ;;  %3116 = vmatpush3.msra.mxu1 %v177_v37  ;;  %v244_v32 = vld [vmem:[#allocation2 + $0x568] sm:$0xff]  ;;  %v226_v33 = vld [vmem:[#allocation2 + $0x4d8] sm:$0xff]  ;;  %v259_v34 = vld [vmem:[#allocation2 + $0x5e0] sm:$0xff] }
  0x58   :  { %3084 = vmatprep.subr.mxu0 %v159_v38  ;;  %3117 = vmatprep.subr.mxu1 %v192_v39  ;;  %v210_v35 = vld [vmem:[#allocation2 + $0x458] sm:$0xff]  ;;  %v243_v36 = vld [vmem:[#allocation2 + $0x560] sm:$0xff]  ;;  %v225_v37 = vld [vmem:[#allocation2 + $0x4d0] sm:$0xff] }
  0x59   :  { %3085 = vmatpush3.msra.mxu0 %v143_v40  ;;  %3118 = vmatpush3.msra.mxu1 %v176_v41  ;;  %v258_v38 = vld [vmem:[#allocation2 + $0x5d8] sm:$0xff]  ;;  %v209_v39 = vld [vmem:[#allocation2 + $0x450] sm:$0xff]  ;;  %v224_v41 = vld [vmem:[#allocation2 + $0x4c8] sm:$0xff] }
  0x5a   :  { %3086 = vmatprep.subr.mxu0 %v158_v42  ;;  %3119 = vmatprep.subr.mxu1 %v191_v43  ;;  %v242_v40 = vld [vmem:[#allocation2 + $0x558] sm:$0xff]  ;;  %v257_v42 = vld [vmem:[#allocation2 + $0x5d0] sm:$0xff]  ;;  %v208_v43 = vld [vmem:[#allocation2 + $0x448] sm:$0xff] }
  0x5b   :  { %3087 = vmatpush3.msra.mxu0 %v142_v44  ;;  %3120 = vmatpush3.msra.mxu1 %v175_v45  ;;  %v241_v44 = vld [vmem:[#allocation2 + $0x550] sm:$0xff]  ;;  %v223_v45 = vld [vmem:[#allocation2 + $0x4c0] sm:$0xff]  ;;  %v220_v58 = vld [vmem:[#allocation2 + $0x4a8] sm:$0xff] }
  0x5c   :  { %3088 = vmatprep.subr.mxu0 %v157_v46  ;;  %3121 = vmatprep.subr.mxu1 %v190_v47  ;;  %v256_v46 = vld [vmem:[#allocation2 + $0x5c8] sm:$0xff]  ;;  %v207_v47 = vld [vmem:[#allocation2 + $0x440] sm:$0xff]  ;;  %v60_v1 = vld [vmem:[%s4249_s0 + $0x10] sm:$0xff] }
  0x5d   :  { %3089 = vmatpush3.msra.mxu0 %v141_v49  ;;  %3122 = vmatpush3.msra.mxu1 %v174_v50  ;;  %v240_v49 = vld [vmem:[#allocation2 + $0x548] sm:$0xff]  ;;  %v222_v50 = vld [vmem:[#allocation2 + $0x4b8] sm:$0xff] }
  0x5e   :  { %3090 = vmatprep.subr.mxu0 %v156_v51  ;;  %3123 = vmatprep.subr.mxu1 %v189_v52  ;;  %v255_v51 = vld [vmem:[#allocation2 + $0x5c0] sm:$0xff]  ;;  %v206_v52 = vld [vmem:[#allocation2 + $0x438] sm:$0xff] }
  0x5f   :  { %3091 = vmatpush3.msra.mxu0 %v140_v53  ;;  %3124 = vmatpush3.msra.mxu1 %v173_v54  ;;  %v239_v53 = vld [vmem:[#allocation2 + $0x540] sm:$0xff]  ;;  %v221_v54 = vld [vmem:[#allocation2 + $0x4b0] sm:$0xff] }
  0x60   :  { %3092 = vmatprep.subr.mxu0 %v155_v55  ;;  %3125 = vmatprep.subr.mxu1 %v188_v56  ;;  %v254_v55 = vld [vmem:[#allocation2 + $0x5b8] sm:$0xff]  ;;  %v205_v56 = vld [vmem:[#allocation2 + $0x430] sm:$0xff] }
  0x61   :  { %3093 = vmatpush3.msra.mxu0 %v139_v57  ;;  %3126 = vmatpush3.msra.mxu1 %v172_v59  ;;  %v238_v57 = vld [vmem:[#allocation2 + $0x538] sm:$0xff]  ;;  %v253_v59 = vld [vmem:[#allocation2 + $0x5b0] sm:$0xff] }
  0x62   :  { %3094 = vmatprep.subr.mxu0 %v154_v60  ;;  %3127 = vmatprep.subr.mxu1 %v187_v61  ;;  %v204_v60 = vld [vmem:[#allocation2 + $0x428] sm:$0xff]  ;;  %v237_v61 = vld [vmem:[#allocation2 + $0x530] sm:$0xff] }
  0x63   :  { %3095 = vmatpush3.msra.mxu0 %v138_v62  ;;  %3128 = vmatpush3.msra.mxu1 %v171_v63  ;;  %v219_v62 = vld [vmem:[#allocation2 + $0x4a0] sm:$0xff]  ;;  %v252_v63 = vld [vmem:[#allocation2 + $0x5a8] sm:$0xff] }
  0x64   :  { %3096 = vmatprep.subr.mxu0 %v153_v0  ;;  %3129 = vmatprep.subr.mxu1 %v186_v2  ;;  %v203_v0 = vld [vmem:[#allocation2 + $0x420] sm:$0xff]  ;;  %v236_v2 = vld [vmem:[#allocation2 + $0x528] sm:$0xff] }
  0x65   :  { %3097 = vmatpush3.msra.mxu0 %v137_v3  ;;  %3130 = vmatpush3.msra.mxu1 %v170_v5  ;;  %v218_v3 = vld [vmem:[#allocation2 + $0x498] sm:$0xff] }
  0x66   :  { %3098 = vmatprep.subr.mxu0 %v152_v6  ;;  %3131 = vmatprep.subr.mxu1 %v185_v7  ;;  %v202_v5 = vld [vmem:[#allocation2 + $0x418] sm:$0xff]  ;;  %v235_v6 = vld [vmem:[#allocation2 + $0x520] sm:$0xff]  ;;  %v217_v7 = vld [vmem:[#allocation2 + $0x490] sm:$0xff] }
  0x67   :  { %3099 = vmatpush3.msra.mxu0 %v136_v8  ;;  %3132 = vmatpush3.msra.mxu1 %v169_v9  ;;  %v909_v8 = vcombine.high %v60_v1, %v60_v1  ;;  %v250_v9 = vld [vmem:[#allocation2 + $0x598] sm:$0xff] }
  0x68   :  { %3100 = vmatprep.subr.mxu0 %v151_v10  ;;  %3133 = vmatprep.subr.mxu1 %v184_v12  ;;  %v201_v10 = vld [vmem:[#allocation2 + $0x410] sm:$0xff]  ;;  %v234_v12 = vld [vmem:[#allocation2 + $0x518] sm:$0xff] }
  0x69   :  { %3101 = vmatpush3.msra.mxu0 %v135_v13  ;;  %1339 = vmatprep.mubr.f32.mxu0 %v907_v14  ;;  %v216_v13 = vld [vmem:[#allocation2 + $0x488] sm:$0xff]  ;;  %v249_v14 = vld [vmem:[#allocation2 + $0x590] sm:$0xff] }
  0x6a   :  { %3134 = vmatpush3.msra.mxu1 %v168_v15  ;;  %1340 = vmatmul.mubr.f32.vlgmr.msra.gmra.mxu0 %v899_v4  ;;  %v251_v4 = vld [vmem:[#allocation2 + $0x5a0] sm:$0xff]  ;;  %v200_v15 = vld [vmem:[#allocation2 + $0x408] sm:$0xff] }
  0x6b   :  { %3135 = vmatprep.subr.mxu1 %v183_v16  ;;  %3140 = vmatprep.subr.mxu0 %v230_v17  ;;  %v233_v16 = vld [vmem:[#allocation2 + $0x510] sm:$0xff]  ;;  %v215_v17 = vld [vmem:[#allocation2 + $0x480] sm:$0xff] }
  0x6c   :  { %3136 = vmatpush3.msra.mxu1 %v167_v18  ;;  %1409 = vmatprep.mubr.f32.mxu1 %v908_v19  ;;  %v923_v18 = vrot.slane %v909_v8, %v4099_v48  ;;  %v248_v19 = vld [vmem:[#allocation2 + $0x588] sm:$0xff]  ;;  %v61_v8 = vld [vmem:[%s4249_s0 + $0x18] sm:$0xff] }
  0x6d   :  { %3141 = vmatpush3.msra.mxu0 %v214_v20  ;;  %1410 = vmatmul.mubr.f32.vlgmr.msra.gmra.mxu1 %v906_v11  ;;  %v916_v11 = vrot.slane %v60_v1, %v4099_v48  ;;  %v199_v20 = vld [vmem:[#allocation2 + $0x400] sm:$0xff]  ;;  %v284_v1 = vld [vmem:[#allocation2 + $0x6a8] sm:$0xff] }
  0x6e   :  { %3142 = vmatprep.subr.mxu0 %v229_v21  ;;  %3175 = vmatprep.subr.mxu1 %v262_v22  ;;  %v232_v22 = vld [vmem:[#allocation2 + $0x508] sm:$0xff] }
  0x6f   :  { %3143 = vmatpush3.msra.mxu0 %v213_v23  ;;  %3176 = vmatpush3.msra.mxu1 %v246_v24  ;;  %v924_v21 = vcombine.high %v916_v11, %v916_v11  ;;  %v247_v23 = vld [vmem:[#allocation2 + $0x580] sm:$0xff]  ;;  %v294_v24 = vld [vmem:[#allocation2 + $0x6f8] sm:$0xff] }
  0x70   :  { %3144 = vmatprep.subr.mxu0 %v228_v25  ;;  %3177 = vmatprep.subr.mxu1 %v261_v26  ;;  %v231_v25 = vld [vmem:[#allocation2 + $0x500] sm:$0xff]  ;;  %v925_v26 = vcombine.high %v923_v18, %v923_v18 }
  0x71   :  { %3145 = vmatpush3.msra.mxu0 %v212_v27  ;;  %3178 = vmatpush3.msra.mxu1 %v245_v28  ;;  %v278_v27 = vld [vmem:[#allocation2 + $0x678] sm:$0xff]  ;;  %v293_v28 = vld [vmem:[#allocation2 + $0x6f0] sm:$0xff] }
  0x72   :  { %3146 = vmatprep.subr.mxu0 %v227_v29  ;;  %3179 = vmatprep.subr.mxu1 %v260_v30  ;;  %v326_v29 = vld [vmem:[#allocation2 + $0x7f8] sm:$0xff]  ;;  %v277_v30 = vld [vmem:[#allocation2 + $0x670] sm:$0xff] }
  0x73   :  { %3147 = vmatpush3.msra.mxu0 %v211_v31  ;;  %3180 = vmatpush3.msra.mxu1 %v244_v32  ;;  %v310_v31 = vld [vmem:[#allocation2 + $0x778] sm:$0xff]  ;;  %v292_v32 = vld [vmem:[#allocation2 + $0x6e8] sm:$0xff] }
  0x74   :  { %3148 = vmatprep.subr.mxu0 %v226_v33  ;;  %3181 = vmatprep.subr.mxu1 %v259_v34  ;;  %v325_v33 = vld [vmem:[#allocation2 + $0x7f0] sm:$0xff]  ;;  %v276_v34 = vld [vmem:[#allocation2 + $0x668] sm:$0xff] }
  0x75   :  { %3149 = vmatpush3.msra.mxu0 %v210_v35  ;;  %3182 = vmatpush3.msra.mxu1 %v243_v36  ;;  %v309_v35 = vld [vmem:[#allocation2 + $0x770] sm:$0xff]  ;;  %v291_v36 = vld [vmem:[#allocation2 + $0x6e0] sm:$0xff] }
  0x76   :  { %3150 = vmatprep.subr.mxu0 %v225_v37  ;;  %3183 = vmatprep.subr.mxu1 %v258_v38  ;;  %v324_v37 = vld [vmem:[#allocation2 + $0x7e8] sm:$0xff]  ;;  %v275_v38 = vld [vmem:[#allocation2 + $0x660] sm:$0xff] }
  0x77   :  { %3151 = vmatpush3.msra.mxu0 %v209_v39  ;;  %3184 = vmatpush3.msra.mxu1 %v242_v40  ;;  %v308_v39 = vld [vmem:[#allocation2 + $0x768] sm:$0xff]  ;;  %v290_v40 = vld [vmem:[#allocation2 + $0x6d8] sm:$0xff] }
  0x78   :  { %3152 = vmatprep.subr.mxu0 %v224_v41  ;;  %3185 = vmatprep.subr.mxu1 %v257_v42  ;;  %v323_v41 = vld [vmem:[#allocation2 + $0x7e0] sm:$0xff]  ;;  %v274_v42 = vld [vmem:[#allocation2 + $0x658] sm:$0xff] }
  0x79   :  { %3153 = vmatpush3.msra.mxu0 %v208_v43  ;;  %3186 = vmatpush3.msra.mxu1 %v241_v44  ;;  %v307_v43 = vld [vmem:[#allocation2 + $0x760] sm:$0xff]  ;;  %v289_v44 = vld [vmem:[#allocation2 + $0x6d0] sm:$0xff] }
  0x7a   :  { %3154 = vmatprep.subr.mxu0 %v223_v45  ;;  %3187 = vmatprep.subr.mxu1 %v256_v46  ;;  %v322_v45 = vld [vmem:[#allocation2 + $0x7d8] sm:$0xff]  ;;  %v273_v46 = vld [vmem:[#allocation2 + $0x650] sm:$0xff] }
  0x7b   :  { %3155 = vmatpush3.msra.mxu0 %v207_v47  ;;  %3188 = vmatpush3.msra.mxu1 %v240_v49  ;;  %v306_v47 = vld [vmem:[#allocation2 + $0x758] sm:$0xff]  ;;  %v288_v49 = vld [vmem:[#allocation2 + $0x6c8] sm:$0xff] }
  0x7c   :  { %3156 = vmatprep.subr.mxu0 %v222_v50  ;;  %3189 = vmatprep.subr.mxu1 %v255_v51  ;;  %v321_v50 = vld [vmem:[#allocation2 + $0x7d0] sm:$0xff]  ;;  %v272_v51 = vld [vmem:[#allocation2 + $0x648] sm:$0xff] }
  0x7d   :  { %3157 = vmatpush3.msra.mxu0 %v206_v52  ;;  %3190 = vmatpush3.msra.mxu1 %v239_v53  ;;  %v305_v52 = vld [vmem:[#allocation2 + $0x750] sm:$0xff]  ;;  %v287_v53 = vld [vmem:[#allocation2 + $0x6c0] sm:$0xff] }
  0x7e   :  { %3158 = vmatprep.subr.mxu0 %v221_v54  ;;  %3191 = vmatprep.subr.mxu1 %v254_v55  ;;  %v320_v54 = vld [vmem:[#allocation2 + $0x7c8] sm:$0xff]  ;;  %v271_v55 = vld [vmem:[#allocation2 + $0x640] sm:$0xff] }
  0x7f   :  { %3159 = vmatpush3.msra.mxu0 %v205_v56  ;;  %3192 = vmatpush3.msra.mxu1 %v238_v57  ;;  %v304_v56 = vld [vmem:[#allocation2 + $0x748] sm:$0xff]  ;;  %v286_v57 = vld [vmem:[#allocation2 + $0x6b8] sm:$0xff] }
  0x80   :  { %3160 = vmatprep.subr.mxu0 %v220_v58  ;;  %3193 = vmatprep.subr.mxu1 %v253_v59  ;;  %v319_v58 = vld [vmem:[#allocation2 + $0x7c0] sm:$0xff]  ;;  %v270_v59 = vld [vmem:[#allocation2 + $0x638] sm:$0xff] }
  0x81   :  { %3161 = vmatpush3.msra.mxu0 %v204_v60  ;;  %3194 = vmatpush3.msra.mxu1 %v237_v61  ;;  %v303_v60 = vld [vmem:[#allocation2 + $0x740] sm:$0xff]  ;;  %v285_v61 = vld [vmem:[#allocation2 + $0x6b0] sm:$0xff] }
  0x82   :  { %3162 = vmatprep.subr.mxu0 %v219_v62  ;;  %3195 = vmatprep.subr.mxu1 %v252_v63  ;;  %v318_v62 = vld [vmem:[#allocation2 + $0x7b8] sm:$0xff]  ;;  %v269_v63 = vld [vmem:[#allocation2 + $0x630] sm:$0xff] }
  0x83   :  { %3163 = vmatpush3.msra.mxu0 %v203_v0  ;;  %3196 = vmatpush3.msra.mxu1 %v236_v2  ;;  %v302_v0 = vld [vmem:[#allocation2 + $0x738] sm:$0xff]  ;;  %v317_v2 = vld [vmem:[#allocation2 + $0x7b0] sm:$0xff] }
  0x84   :  { %3164 = vmatprep.subr.mxu0 %v218_v3  ;;  %3197 = vmatprep.subr.mxu1 %v251_v4  ;;  %v268_v3 = vld [vmem:[#allocation2 + $0x628] sm:$0xff]  ;;  %v301_v4 = vld [vmem:[#allocation2 + $0x730] sm:$0xff] }
  0x85   :  { %3165 = vmatpush3.msra.mxu0 %v202_v5  ;;  %3198 = vmatpush3.msra.mxu1 %v235_v6  ;;  %v283_v5 = vld [vmem:[#allocation2 + $0x6a0] sm:$0xff]  ;;  %v316_v6 = vld [vmem:[#allocation2 + $0x7a8] sm:$0xff] }
  0x86   :  { %3166 = vmatprep.subr.mxu0 %v217_v7  ;;  %3199 = vmatprep.subr.mxu1 %v250_v9  ;;  %v267_v7 = vld [vmem:[#allocation2 + $0x620] sm:$0xff]  ;;  %v300_v9 = vld [vmem:[#allocation2 + $0x728] sm:$0xff] }
  0x87   :  { %3167 = vmatpush3.msra.mxu0 %v201_v10  ;;  %3200 = vmatpush3.msra.mxu1 %v234_v12  ;;  %v282_v10 = vld [vmem:[#allocation2 + $0x698] sm:$0xff] }
  0x88   :  { %3168 = vmatprep.subr.mxu0 %v216_v13  ;;  %3201 = vmatprep.subr.mxu1 %v249_v14  ;;  %v266_v12 = vld [vmem:[#allocation2 + $0x618] sm:$0xff]  ;;  %v299_v13 = vld [vmem:[#allocation2 + $0x720] sm:$0xff]  ;;  %v281_v14 = vld [vmem:[#allocation2 + $0x690] sm:$0xff] }
  0x89   :  { %3169 = vmatpush3.msra.mxu0 %v200_v15  ;;  %3202 = vmatpush3.msra.mxu1 %v233_v16  ;;  %v926_v15 = vcombine.high %v61_v8, %v61_v8  ;;  %v314_v16 = vld [vmem:[#allocation2 + $0x798] sm:$0xff] }
  0x8a   :  { %3170 = vmatprep.subr.mxu0 %v215_v17  ;;  %3203 = vmatprep.subr.mxu1 %v248_v19  ;;  %v265_v17 = vld [vmem:[#allocation2 + $0x610] sm:$0xff]  ;;  %v298_v19 = vld [vmem:[#allocation2 + $0x718] sm:$0xff] }
  0x8b   :  { %3171 = vmatpush3.msra.mxu0 %v199_v20  ;;  %1479 = vmatprep.mubr.f32.mxu0 %v924_v21  ;;  %v280_v20 = vld [vmem:[#allocation2 + $0x688] sm:$0xff]  ;;  %v313_v21 = vld [vmem:[#allocation2 + $0x790] sm:$0xff] }
  0x8c   :  { %3204 = vmatpush3.msra.mxu1 %v232_v22  ;;  %1480 = vmatmul.mubr.f32.vlgmr.msra.gmra.mxu0 %v916_v11  ;;  %v315_v11 = vld [vmem:[#allocation2 + $0x7a0] sm:$0xff]  ;;  %v264_v22 = vld [vmem:[#allocation2 + $0x608] sm:$0xff] }
  0x8d   :  { %3205 = vmatprep.subr.mxu1 %v247_v23  ;;  %3210 = vmatprep.subr.mxu0 %v294_v24  ;;  %v297_v23 = vld [vmem:[#allocation2 + $0x710] sm:$0xff]  ;;  %v279_v24 = vld [vmem:[#allocation2 + $0x680] sm:$0xff] }
  0x8e   :  { %3206 = vmatpush3.msra.mxu1 %v231_v25  ;;  %1549 = vmatprep.mubr.f32.mxu1 %v925_v26  ;;  %v940_v25 = vrot.slane %v926_v15, %v4099_v48  ;;  %v312_v26 = vld [vmem:[#allocation2 + $0x788] sm:$0xff]  ;;  %v62_v15 = vld [vmem:[%s4249_s0 + $0x20] sm:$0xff] }
  0x8f   :  { %3211 = vmatpush3.msra.mxu0 %v278_v27  ;;  %1550 = vmatmul.mubr.f32.vlgmr.msra.gmra.mxu1 %v923_v18  ;;  %v933_v18 = vrot.slane %v61_v8, %v4099_v48  ;;  %v263_v27 = vld [vmem:[#allocation2 + $0x600] sm:$0xff]  ;;  %v348_v8 = vld [vmem:[#allocation2 + $0x8a8] sm:$0xff] }
  0x90   :  { %3212 = vmatprep.subr.mxu0 %v293_v28  ;;  %3245 = vmatprep.subr.mxu1 %v326_v29  ;;  %v296_v29 = vld [vmem:[#allocation2 + $0x708] sm:$0xff] }
  0x91   :  { %3213 = vmatpush3.msra.mxu0 %v277_v30  ;;  %3246 = vmatpush3.msra.mxu1 %v310_v31  ;;  %v941_v28 = vcombine.high %v933_v18, %v933_v18  ;;  %v311_v30 = vld [vmem:[#allocation2 + $0x780] sm:$0xff]  ;;  %v358_v31 = vld [vmem:[#allocation2 + $0x8f8] sm:$0xff] }
  0x92   :  { %3214 = vmatprep.subr.mxu0 %v292_v32  ;;  %3247 = vmatprep.subr.mxu1 %v325_v33  ;;  %v295_v32 = vld [vmem:[#allocation2 + $0x700] sm:$0xff]  ;;  %v942_v33 = vcombine.high %v940_v25, %v940_v25 }
  0x93   :  { %3215 = vmatpush3.msra.mxu0 %v276_v34  ;;  %3248 = vmatpush3.msra.mxu1 %v309_v35  ;;  %v342_v34 = vld [vmem:[#allocation2 + $0x878] sm:$0xff]  ;;  %v357_v35 = vld [vmem:[#allocation2 + $0x8f0] sm:$0xff] }
  0x94   :  { %3216 = vmatprep.subr.mxu0 %v291_v36  ;;  %3249 = vmatprep.subr.mxu1 %v324_v37  ;;  %v390_v36 = vld [vmem:[#allocation2 + $0x9f8] sm:$0xff]  ;;  %v341_v37 = vld [vmem:[#allocation2 + $0x870] sm:$0xff] }
  0x95   :  { %3217 = vmatpush3.msra.mxu0 %v275_v38  ;;  %3250 = vmatpush3.msra.mxu1 %v308_v39  ;;  %v374_v38 = vld [vmem:[#allocation2 + $0x978] sm:$0xff]  ;;  %v356_v39 = vld [vmem:[#allocation2 + $0x8e8] sm:$0xff] }
  0x96   :  { %3218 = vmatprep.subr.mxu0 %v290_v40  ;;  %3251 = vmatprep.subr.mxu1 %v323_v41  ;;  %v389_v40 = vld [vmem:[#allocation2 + $0x9f0] sm:$0xff]  ;;  %v340_v41 = vld [vmem:[#allocation2 + $0x868] sm:$0xff] }
  0x97   :  { %3219 = vmatpush3.msra.mxu0 %v274_v42  ;;  %3252 = vmatpush3.msra.mxu1 %v307_v43  ;;  %v373_v42 = vld [vmem:[#allocation2 + $0x970] sm:$0xff]  ;;  %v355_v43 = vld [vmem:[#allocation2 + $0x8e0] sm:$0xff] }
  0x98   :  { %3220 = vmatprep.subr.mxu0 %v289_v44  ;;  %3253 = vmatprep.subr.mxu1 %v322_v45  ;;  %v388_v44 = vld [vmem:[#allocation2 + $0x9e8] sm:$0xff]  ;;  %v339_v45 = vld [vmem:[#allocation2 + $0x860] sm:$0xff] }
  0x99   :  { %3221 = vmatpush3.msra.mxu0 %v273_v46  ;;  %3254 = vmatpush3.msra.mxu1 %v306_v47  ;;  %v372_v46 = vld [vmem:[#allocation2 + $0x968] sm:$0xff]  ;;  %v354_v47 = vld [vmem:[#allocation2 + $0x8d8] sm:$0xff] }
  0x9a   :  { %3222 = vmatprep.subr.mxu0 %v288_v49  ;;  %3255 = vmatprep.subr.mxu1 %v321_v50  ;;  %v387_v49 = vld [vmem:[#allocation2 + $0x9e0] sm:$0xff]  ;;  %v338_v50 = vld [vmem:[#allocation2 + $0x858] sm:$0xff] }
  0x9b   :  { %3223 = vmatpush3.msra.mxu0 %v272_v51  ;;  %3256 = vmatpush3.msra.mxu1 %v305_v52  ;;  %v371_v51 = vld [vmem:[#allocation2 + $0x960] sm:$0xff]  ;;  %v353_v52 = vld [vmem:[#allocation2 + $0x8d0] sm:$0xff] }
  0x9c   :  { %3224 = vmatprep.subr.mxu0 %v287_v53  ;;  %3257 = vmatprep.subr.mxu1 %v320_v54  ;;  %v386_v53 = vld [vmem:[#allocation2 + $0x9d8] sm:$0xff]  ;;  %v337_v54 = vld [vmem:[#allocation2 + $0x850] sm:$0xff] }
  0x9d   :  { %3225 = vmatpush3.msra.mxu0 %v271_v55  ;;  %3258 = vmatpush3.msra.mxu1 %v304_v56  ;;  %v370_v55 = vld [vmem:[#allocation2 + $0x958] sm:$0xff]  ;;  %v352_v56 = vld [vmem:[#allocation2 + $0x8c8] sm:$0xff] }
  0x9e   :  { %3226 = vmatprep.subr.mxu0 %v286_v57  ;;  %3259 = vmatprep.subr.mxu1 %v319_v58  ;;  %v385_v57 = vld [vmem:[#allocation2 + $0x9d0] sm:$0xff]  ;;  %v336_v58 = vld [vmem:[#allocation2 + $0x848] sm:$0xff] }
  0x9f   :  { %3227 = vmatpush3.msra.mxu0 %v270_v59  ;;  %3260 = vmatpush3.msra.mxu1 %v303_v60  ;;  %v369_v59 = vld [vmem:[#allocation2 + $0x950] sm:$0xff]  ;;  %v351_v60 = vld [vmem:[#allocation2 + $0x8c0] sm:$0xff] }
  0xa0   :  { %3228 = vmatprep.subr.mxu0 %v285_v61  ;;  %3261 = vmatprep.subr.mxu1 %v318_v62  ;;  %v384_v61 = vld [vmem:[#allocation2 + $0x9c8] sm:$0xff]  ;;  %v335_v62 = vld [vmem:[#allocation2 + $0x840] sm:$0xff] }
  0xa1   :  { %3229 = vmatpush3.msra.mxu0 %v269_v63  ;;  %3262 = vmatpush3.msra.mxu1 %v302_v0  ;;  %v368_v63 = vld [vmem:[#allocation2 + $0x948] sm:$0xff]  ;;  %v350_v0 = vld [vmem:[#allocation2 + $0x8b8] sm:$0xff] }
  0xa2   :  { %3230 = vmatprep.subr.mxu0 %v284_v1  ;;  %3263 = vmatprep.subr.mxu1 %v317_v2  ;;  %v383_v1 = vld [vmem:[#allocation2 + $0x9c0] sm:$0xff]  ;;  %v334_v2 = vld [vmem:[#allocation2 + $0x838] sm:$0xff] }
  0xa3   :  { %3231 = vmatpush3.msra.mxu0 %v268_v3  ;;  %3264 = vmatpush3.msra.mxu1 %v301_v4  ;;  %v367_v3 = vld [vmem:[#allocation2 + $0x940] sm:$0xff]  ;;  %v349_v4 = vld [vmem:[#allocation2 + $0x8b0] sm:$0xff] }
  0xa4   :  { %3232 = vmatprep.subr.mxu0 %v283_v5  ;;  %3265 = vmatprep.subr.mxu1 %v316_v6  ;;  %v382_v5 = vld [vmem:[#allocation2 + $0x9b8] sm:$0xff]  ;;  %v333_v6 = vld [vmem:[#allocation2 + $0x830] sm:$0xff] }
  0xa5   :  { %3233 = vmatpush3.msra.mxu0 %v267_v7  ;;  %3266 = vmatpush3.msra.mxu1 %v300_v9  ;;  %v366_v7 = vld [vmem:[#allocation2 + $0x938] sm:$0xff]  ;;  %v381_v9 = vld [vmem:[#allocation2 + $0x9b0] sm:$0xff] }
  0xa6   :  { %3234 = vmatprep.subr.mxu0 %v282_v10  ;;  %3267 = vmatprep.subr.mxu1 %v315_v11  ;;  %v332_v10 = vld [vmem:[#allocation2 + $0x828] sm:$0xff]  ;;  %v365_v11 = vld [vmem:[#allocation2 + $0x930] sm:$0xff] }
  0xa7   :  { %3235 = vmatpush3.msra.mxu0 %v266_v12  ;;  %3268 = vmatpush3.msra.mxu1 %v299_v13  ;;  %v347_v12 = vld [vmem:[#allocation2 + $0x8a0] sm:$0xff]  ;;  %v380_v13 = vld [vmem:[#allocation2 + $0x9a8] sm:$0xff] }
  0xa8   :  { %3236 = vmatprep.subr.mxu0 %v281_v14  ;;  %3269 = vmatprep.subr.mxu1 %v314_v16  ;;  %v331_v14 = vld [vmem:[#allocation2 + $0x820] sm:$0xff]  ;;  %v364_v16 = vld [vmem:[#allocation2 + $0x928] sm:$0xff] }
  0xa9   :  { %3237 = vmatpush3.msra.mxu0 %v265_v17  ;;  %3270 = vmatpush3.msra.mxu1 %v298_v19  ;;  %v346_v17 = vld [vmem:[#allocation2 + $0x898] sm:$0xff] }
  0xaa   :  { %3238 = vmatprep.subr.mxu0 %v280_v20  ;;  %3271 = vmatprep.subr.mxu1 %v313_v21  ;;  %v330_v19 = vld [vmem:[#allocation2 + $0x818] sm:$0xff]  ;;  %v363_v20 = vld [vmem:[#allocation2 + $0x920] sm:$0xff]  ;;  %v345_v21 = vld [vmem:[#allocation2 + $0x890] sm:$0xff] }
  0xab   :  { %3239 = vmatpush3.msra.mxu0 %v264_v22  ;;  %3272 = vmatpush3.msra.mxu1 %v297_v23  ;;  %v943_v22 = vcombine.high %v62_v15, %v62_v15  ;;  %v378_v23 = vld [vmem:[#allocation2 + $0x998] sm:$0xff] }
  0xac   :  { %3240 = vmatprep.subr.mxu0 %v279_v24  ;;  %3273 = vmatprep.subr.mxu1 %v312_v26  ;;  %v329_v24 = vld [vmem:[#allocation2 + $0x810] sm:$0xff]  ;;  %v362_v26 = vld [vmem:[#allocation2 + $0x918] sm:$0xff] }
  0xad   :  { %3241 = vmatpush3.msra.mxu0 %v263_v27  ;;  %1619 = vmatprep.mubr.f32.mxu0 %v941_v28  ;;  %v344_v27 = vld [vmem:[#allocation2 + $0x888] sm:$0xff]  ;;  %v377_v28 = vld [vmem:[#allocation2 + $0x990] sm:$0xff] }
  0xae   :  { %3274 = vmatpush3.msra.mxu1 %v296_v29  ;;  %1620 = vmatmul.mubr.f32.vlgmr.msra.gmra.mxu0 %v933_v18  ;;  %v379_v18 = vld [vmem:[#allocation2 + $0x9a0] sm:$0xff]  ;;  %v328_v29 = vld [vmem:[#allocation2 + $0x808] sm:$0xff] }
  0xaf   :  { %3275 = vmatprep.subr.mxu1 %v311_v30  ;;  %3280 = vmatprep.subr.mxu0 %v358_v31  ;;  %v361_v30 = vld [vmem:[#allocation2 + $0x910] sm:$0xff]  ;;  %v343_v31 = vld [vmem:[#allocation2 + $0x880] sm:$0xff] }
  0xb0   :  { %3276 = vmatpush3.msra.mxu1 %v295_v32  ;;  %1689 = vmatprep.mubr.f32.mxu1 %v942_v33  ;;  %v957_v32 = vrot.slane %v943_v22, %v4099_v48  ;;  %v376_v33 = vld [vmem:[#allocation2 + $0x988] sm:$0xff] }
  0xb1   :  { %3281 = vmatpush3.msra.mxu0 %v342_v34  ;;  %1690 = vmatmul.mubr.f32.vlgmr.msra.gmra.mxu1 %v940_v25  ;;  %v950_v25 = vrot.slane %v62_v15, %v4099_v48  ;;  %v327_v34 = vld [vmem:[#allocation2 + $0x800] sm:$0xff]  ;;  %v412_v15 = vld [vmem:[#allocation2 + $0xaa8] sm:$0xff] }
  0xb2   :  { %3282 = vmatprep.subr.mxu0 %v357_v35  ;;  %3315 = vmatprep.subr.mxu1 %v390_v36  ;;  %v360_v36 = vld [vmem:[#allocation2 + $0x908] sm:$0xff] }
  0xb3   :  { %3283 = vmatpush3.msra.mxu0 %v341_v37  ;;  %3316 = vmatpush3.msra.mxu1 %v374_v38  ;;  %v958_v35 = vcombine.high %v950_v25, %v950_v25  ;;  %v375_v37 = vld [vmem:[#allocation2 + $0x980] sm:$0xff]  ;;  %v422_v38 = vld [vmem:[#allocation2 + $0xaf8] sm:$0xff]  ;;  %v63_v22 = vld [vmem:[%s4249_s0 + $0x28] sm:$0xff] }
  0xb4   :  { %3284 = vmatprep.subr.mxu0 %v356_v39  ;;  %3317 = vmatprep.subr.mxu1 %v389_v40  ;;  %v359_v39 = vld [vmem:[#allocation2 + $0x900] sm:$0xff]  ;;  %v959_v40 = vcombine.high %v957_v32, %v957_v32 }
  0xb5   :  { %3285 = vmatpush3.msra.mxu0 %v340_v41  ;;  %3318 = vmatpush3.msra.mxu1 %v373_v42  ;;  %v406_v41 = vld [vmem:[#allocation2 + $0xa78] sm:$0xff]  ;;  %v421_v42 = vld [vmem:[#allocation2 + $0xaf0] sm:$0xff] }
  0xb6   :  { %3286 = vmatprep.subr.mxu0 %v355_v43  ;;  %3319 = vmatprep.subr.mxu1 %v388_v44  ;;  %v454_v43 = vld [vmem:[#allocation2 + $0xbf8] sm:$0xff]  ;;  %v405_v44 = vld [vmem:[#allocation2 + $0xa70] sm:$0xff] }
  0xb7   :  { %3287 = vmatpush3.msra.mxu0 %v339_v45  ;;  %3320 = vmatpush3.msra.mxu1 %v372_v46  ;;  %v438_v45 = vld [vmem:[#allocation2 + $0xb78] sm:$0xff]  ;;  %v420_v46 = vld [vmem:[#allocation2 + $0xae8] sm:$0xff] }
  0xb8   :  { %3288 = vmatprep.subr.mxu0 %v354_v47  ;;  %3321 = vmatprep.subr.mxu1 %v387_v49  ;;  %v453_v47 = vld [vmem:[#allocation2 + $0xbf0] sm:$0xff]  ;;  %v404_v49 = vld [vmem:[#allocation2 + $0xa68] sm:$0xff] }
  0xb9   :  { %3289 = vmatpush3.msra.mxu0 %v338_v50  ;;  %3322 = vmatpush3.msra.mxu1 %v371_v51  ;;  %v437_v50 = vld [vmem:[#allocation2 + $0xb70] sm:$0xff]  ;;  %v419_v51 = vld [vmem:[#allocation2 + $0xae0] sm:$0xff] }
  0xba   :  { %3290 = vmatprep.subr.mxu0 %v353_v52  ;;  %3323 = vmatprep.subr.mxu1 %v386_v53  ;;  %v452_v52 = vld [vmem:[#allocation2 + $0xbe8] sm:$0xff]  ;;  %v403_v53 = vld [vmem:[#allocation2 + $0xa60] sm:$0xff] }
  0xbb   :  { %3291 = vmatpush3.msra.mxu0 %v337_v54  ;;  %3324 = vmatpush3.msra.mxu1 %v370_v55  ;;  %v436_v54 = vld [vmem:[#allocation2 + $0xb68] sm:$0xff]  ;;  %v418_v55 = vld [vmem:[#allocation2 + $0xad8] sm:$0xff] }
  0xbc   :  { %3292 = vmatprep.subr.mxu0 %v352_v56  ;;  %3325 = vmatprep.subr.mxu1 %v385_v57  ;;  %v451_v56 = vld [vmem:[#allocation2 + $0xbe0] sm:$0xff]  ;;  %v402_v57 = vld [vmem:[#allocation2 + $0xa58] sm:$0xff] }
  0xbd   :  { %3293 = vmatpush3.msra.mxu0 %v336_v58  ;;  %3326 = vmatpush3.msra.mxu1 %v369_v59  ;;  %v435_v58 = vld [vmem:[#allocation2 + $0xb60] sm:$0xff]  ;;  %v417_v59 = vld [vmem:[#allocation2 + $0xad0] sm:$0xff] }
  0xbe   :  { %3294 = vmatprep.subr.mxu0 %v351_v60  ;;  %3327 = vmatprep.subr.mxu1 %v384_v61  ;;  %v450_v60 = vld [vmem:[#allocation2 + $0xbd8] sm:$0xff]  ;;  %v401_v61 = vld [vmem:[#allocation2 + $0xa50] sm:$0xff] }
  0xbf   :  { %3295 = vmatpush3.msra.mxu0 %v335_v62  ;;  %3328 = vmatpush3.msra.mxu1 %v368_v63  ;;  %v434_v62 = vld [vmem:[#allocation2 + $0xb58] sm:$0xff]  ;;  %v416_v63 = vld [vmem:[#allocation2 + $0xac8] sm:$0xff] }
  0xc0   :  { %3296 = vmatprep.subr.mxu0 %v350_v0  ;;  %3329 = vmatprep.subr.mxu1 %v383_v1  ;;  %v449_v0 = vld [vmem:[#allocation2 + $0xbd0] sm:$0xff]  ;;  %v400_v1 = vld [vmem:[#allocation2 + $0xa48] sm:$0xff] }
  0xc1   :  { %3297 = vmatpush3.msra.mxu0 %v334_v2  ;;  %3330 = vmatpush3.msra.mxu1 %v367_v3  ;;  %v433_v2 = vld [vmem:[#allocation2 + $0xb50] sm:$0xff]  ;;  %v415_v3 = vld [vmem:[#allocation2 + $0xac0] sm:$0xff] }
  0xc2   :  { %3298 = vmatprep.subr.mxu0 %v349_v4  ;;  %3331 = vmatprep.subr.mxu1 %v382_v5  ;;  %v448_v4 = vld [vmem:[#allocation2 + $0xbc8] sm:$0xff]  ;;  %v399_v5 = vld [vmem:[#allocation2 + $0xa40] sm:$0xff] }
  0xc3   :  { %3299 = vmatpush3.msra.mxu0 %v333_v6  ;;  %3332 = vmatpush3.msra.mxu1 %v366_v7  ;;  %v432_v6 = vld [vmem:[#allocation2 + $0xb48] sm:$0xff]  ;;  %v414_v7 = vld [vmem:[#allocation2 + $0xab8] sm:$0xff] }
  0xc4   :  { %3300 = vmatprep.subr.mxu0 %v348_v8  ;;  %3333 = vmatprep.subr.mxu1 %v381_v9  ;;  %v447_v8 = vld [vmem:[#allocation2 + $0xbc0] sm:$0xff]  ;;  %v398_v9 = vld [vmem:[#allocation2 + $0xa38] sm:$0xff] }
  0xc5   :  { %3301 = vmatpush3.msra.mxu0 %v332_v10  ;;  %3334 = vmatpush3.msra.mxu1 %v365_v11  ;;  %v431_v10 = vld [vmem:[#allocation2 + $0xb40] sm:$0xff]  ;;  %v413_v11 = vld [vmem:[#allocation2 + $0xab0] sm:$0xff] }
  0xc6   :  { %3302 = vmatprep.subr.mxu0 %v347_v12  ;;  %3335 = vmatprep.subr.mxu1 %v380_v13  ;;  %v446_v12 = vld [vmem:[#allocation2 + $0xbb8] sm:$0xff]  ;;  %v397_v13 = vld [vmem:[#allocation2 + $0xa30] sm:$0xff] }
  0xc7   :  { %3303 = vmatpush3.msra.mxu0 %v331_v14  ;;  %3336 = vmatpush3.msra.mxu1 %v364_v16  ;;  %v430_v14 = vld [vmem:[#allocation2 + $0xb38] sm:$0xff]  ;;  %v445_v16 = vld [vmem:[#allocation2 + $0xbb0] sm:$0xff] }
  0xc8   :  { %3304 = vmatprep.subr.mxu0 %v346_v17  ;;  %3337 = vmatprep.subr.mxu1 %v379_v18  ;;  %v396_v17 = vld [vmem:[#allocation2 + $0xa28] sm:$0xff]  ;;  %v429_v18 = vld [vmem:[#allocation2 + $0xb30] sm:$0xff] }
  0xc9   :  { %3305 = vmatpush3.msra.mxu0 %v330_v19  ;;  %3338 = vmatpush3.msra.mxu1 %v363_v20  ;;  %v411_v19 = vld [vmem:[#allocation2 + $0xaa0] sm:$0xff]  ;;  %v444_v20 = vld [vmem:[#allocation2 + $0xba8] sm:$0xff] }
  0xca   :  { %3306 = vmatprep.subr.mxu0 %v345_v21  ;;  %3339 = vmatprep.subr.mxu1 %v378_v23  ;;  %v395_v21 = vld [vmem:[#allocation2 + $0xa20] sm:$0xff]  ;;  %v428_v23 = vld [vmem:[#allocation2 + $0xb28] sm:$0xff] }
  0xcb   :  { %3307 = vmatpush3.msra.mxu0 %v329_v24  ;;  %3340 = vmatpush3.msra.mxu1 %v362_v26  ;;  %v410_v24 = vld [vmem:[#allocation2 + $0xa98] sm:$0xff] }
  0xcc   :  { %3308 = vmatprep.subr.mxu0 %v344_v27  ;;  %3341 = vmatprep.subr.mxu1 %v377_v28  ;;  %v394_v26 = vld [vmem:[#allocation2 + $0xa18] sm:$0xff]  ;;  %v427_v27 = vld [vmem:[#allocation2 + $0xb20] sm:$0xff]  ;;  %v409_v28 = vld [vmem:[#allocation2 + $0xa90] sm:$0xff] }
  0xcd   :  { %3309 = vmatpush3.msra.mxu0 %v328_v29  ;;  %3342 = vmatpush3.msra.mxu1 %v361_v30  ;;  %v960_v29 = vcombine.high %v63_v22, %v63_v22  ;;  %v442_v30 = vld [vmem:[#allocation2 + $0xb98] sm:$0xff] }
  0xce   :  { %3310 = vmatprep.subr.mxu0 %v343_v31  ;;  %3343 = vmatprep.subr.mxu1 %v376_v33  ;;  %v393_v31 = vld [vmem:[#allocation2 + $0xa10] sm:$0xff]  ;;  %v426_v33 = vld [vmem:[#allocation2 + $0xb18] sm:$0xff] }
  0xcf   :  { %3311 = vmatpush3.msra.mxu0 %v327_v34  ;;  %1759 = vmatprep.mubr.f32.mxu0 %v958_v35  ;;  %v408_v34 = vld [vmem:[#allocation2 + $0xa88] sm:$0xff]  ;;  %v441_v35 = vld [vmem:[#allocation2 + $0xb90] sm:$0xff] }
  0xd0   :  { %3344 = vmatpush3.msra.mxu1 %v360_v36  ;;  %1760 = vmatmul.mubr.f32.vlgmr.msra.gmra.mxu0 %v950_v25  ;;  %v443_v25 = vld [vmem:[#allocation2 + $0xba0] sm:$0xff]  ;;  %v392_v36 = vld [vmem:[#allocation2 + $0xa08] sm:$0xff] }
  0xd1   :  { %3345 = vmatprep.subr.mxu1 %v375_v37  ;;  %3350 = vmatprep.subr.mxu0 %v422_v38  ;;  %v425_v37 = vld [vmem:[#allocation2 + $0xb10] sm:$0xff]  ;;  %v407_v38 = vld [vmem:[#allocation2 + $0xa80] sm:$0xff] }
  0xd2   :  { %3346 = vmatpush3.msra.mxu1 %v359_v39  ;;  %1829 = vmatprep.mubr.f32.mxu1 %v959_v40  ;;  %v974_v39 = vrot.slane %v960_v29, %v4099_v48  ;;  %v440_v40 = vld [vmem:[#allocation2 + $0xb88] sm:$0xff]  ;;  %v64_v29 = vld [vmem:[%s4249_s0 + $0x30] sm:$0xff] }
  0xd3   :  { %3351 = vmatpush3.msra.mxu0 %v406_v41  ;;  %1830 = vmatmul.mubr.f32.vlgmr.msra.gmra.mxu1 %v957_v32  ;;  %v967_v32 = vrot.slane %v63_v22, %v4099_v48  ;;  %v391_v41 = vld [vmem:[#allocation2 + $0xa00] sm:$0xff]  ;;  %v476_v22 = vld [vmem:[#allocation2 + $0xca8] sm:$0xff] }
  0xd4   :  { %3352 = vmatprep.subr.mxu0 %v421_v42  ;;  %3385 = vmatprep.subr.mxu1 %v454_v43  ;;  %v424_v43 = vld [vmem:[#allocation2 + $0xb08] sm:$0xff] }
  0xd5   :  { %3353 = vmatpush3.msra.mxu0 %v405_v44  ;;  %3386 = vmatpush3.msra.mxu1 %v438_v45  ;;  %v975_v42 = vcombine.high %v967_v32, %v967_v32  ;;  %v439_v44 = vld [vmem:[#allocation2 + $0xb80] sm:$0xff]  ;;  %v486_v45 = vld [vmem:[#allocation2 + $0xcf8] sm:$0xff] }
  0xd6   :  { %3354 = vmatprep.subr.mxu0 %v420_v46  ;;  %3387 = vmatprep.subr.mxu1 %v453_v47  ;;  %v423_v46 = vld [vmem:[#allocation2 + $0xb00] sm:$0xff]  ;;  %v976_v47 = vcombine.high %v974_v39, %v974_v39 }
  0xd7   :  { %3355 = vmatpush3.msra.mxu0 %v404_v49  ;;  %3388 = vmatpush3.msra.mxu1 %v437_v50  ;;  %v470_v49 = vld [vmem:[#allocation2 + $0xc78] sm:$0xff]  ;;  %v485_v50 = vld [vmem:[#allocation2 + $0xcf0] sm:$0xff] }
  0xd8   :  { %3356 = vmatprep.subr.mxu0 %v419_v51  ;;  %3389 = vmatprep.subr.mxu1 %v452_v52  ;;  %v518_v51 = vld [vmem:[#allocation2 + $0xdf8] sm:$0xff]  ;;  %v469_v52 = vld [vmem:[#allocation2 + $0xc70] sm:$0xff] }
  0xd9   :  { %3357 = vmatpush3.msra.mxu0 %v403_v53  ;;  %3390 = vmatpush3.msra.mxu1 %v436_v54  ;;  %v502_v53 = vld [vmem:[#allocation2 + $0xd78] sm:$0xff]  ;;  %v484_v54 = vld [vmem:[#allocation2 + $0xce8] sm:$0xff] }
  0xda   :  { %3358 = vmatprep.subr.mxu0 %v418_v55  ;;  %3391 = vmatprep.subr.mxu1 %v451_v56  ;;  %v517_v55 = vld [vmem:[#allocation2 + $0xdf0] sm:$0xff]  ;;  %v468_v56 = vld [vmem:[#allocation2 + $0xc68] sm:$0xff] }
  0xdb   :  { %3359 = vmatpush3.msra.mxu0 %v402_v57  ;;  %3392 = vmatpush3.msra.mxu1 %v435_v58  ;;  %v501_v57 = vld [vmem:[#allocation2 + $0xd70] sm:$0xff]  ;;  %v483_v58 = vld [vmem:[#allocation2 + $0xce0] sm:$0xff] }
  0xdc   :  { %3360 = vmatprep.subr.mxu0 %v417_v59  ;;  %3393 = vmatprep.subr.mxu1 %v450_v60  ;;  %v516_v59 = vld [vmem:[#allocation2 + $0xde8] sm:$0xff]  ;;  %v467_v60 = vld [vmem:[#allocation2 + $0xc60] sm:$0xff] }
  0xdd   :  { %3361 = vmatpush3.msra.mxu0 %v401_v61  ;;  %3394 = vmatpush3.msra.mxu1 %v434_v62  ;;  %v500_v61 = vld [vmem:[#allocation2 + $0xd68] sm:$0xff]  ;;  %v482_v62 = vld [vmem:[#allocation2 + $0xcd8] sm:$0xff] }
  0xde   :  { %3362 = vmatprep.subr.mxu0 %v416_v63  ;;  %3395 = vmatprep.subr.mxu1 %v449_v0  ;;  %v515_v63 = vld [vmem:[#allocation2 + $0xde0] sm:$0xff]  ;;  %v466_v0 = vld [vmem:[#allocation2 + $0xc58] sm:$0xff] }
  0xdf   :  { %3363 = vmatpush3.msra.mxu0 %v400_v1  ;;  %3396 = vmatpush3.msra.mxu1 %v433_v2  ;;  %v499_v1 = vld [vmem:[#allocation2 + $0xd60] sm:$0xff]  ;;  %v481_v2 = vld [vmem:[#allocation2 + $0xcd0] sm:$0xff] }
  0xe0   :  { %3364 = vmatprep.subr.mxu0 %v415_v3  ;;  %3397 = vmatprep.subr.mxu1 %v448_v4  ;;  %v514_v3 = vld [vmem:[#allocation2 + $0xdd8] sm:$0xff]  ;;  %v465_v4 = vld [vmem:[#allocation2 + $0xc50] sm:$0xff] }
  0xe1   :  { %3365 = vmatpush3.msra.mxu0 %v399_v5  ;;  %3398 = vmatpush3.msra.mxu1 %v432_v6  ;;  %v498_v5 = vld [vmem:[#allocation2 + $0xd58] sm:$0xff]  ;;  %v480_v6 = vld [vmem:[#allocation2 + $0xcc8] sm:$0xff] }
  0xe2   :  { %3366 = vmatprep.subr.mxu0 %v414_v7  ;;  %3399 = vmatprep.subr.mxu1 %v447_v8  ;;  %v513_v7 = vld [vmem:[#allocation2 + $0xdd0] sm:$0xff]  ;;  %v464_v8 = vld [vmem:[#allocation2 + $0xc48] sm:$0xff] }
  0xe3   :  { %3367 = vmatpush3.msra.mxu0 %v398_v9  ;;  %3400 = vmatpush3.msra.mxu1 %v431_v10  ;;  %v497_v9 = vld [vmem:[#allocation2 + $0xd50] sm:$0xff]  ;;  %v479_v10 = vld [vmem:[#allocation2 + $0xcc0] sm:$0xff] }
  0xe4   :  { %3368 = vmatprep.subr.mxu0 %v413_v11  ;;  %3401 = vmatprep.subr.mxu1 %v446_v12  ;;  %v512_v11 = vld [vmem:[#allocation2 + $0xdc8] sm:$0xff]  ;;  %v463_v12 = vld [vmem:[#allocation2 + $0xc40] sm:$0xff] }
  0xe5   :  { %3369 = vmatpush3.msra.mxu0 %v397_v13  ;;  %3402 = vmatpush3.msra.mxu1 %v430_v14  ;;  %v496_v13 = vld [vmem:[#allocation2 + $0xd48] sm:$0xff]  ;;  %v478_v14 = vld [vmem:[#allocation2 + $0xcb8] sm:$0xff] }
  0xe6   :  { %3370 = vmatprep.subr.mxu0 %v412_v15  ;;  %3403 = vmatprep.subr.mxu1 %v445_v16  ;;  %v511_v15 = vld [vmem:[#allocation2 + $0xdc0] sm:$0xff]  ;;  %v462_v16 = vld [vmem:[#allocation2 + $0xc38] sm:$0xff] }
  0xe7   :  { %3371 = vmatpush3.msra.mxu0 %v396_v17  ;;  %3404 = vmatpush3.msra.mxu1 %v429_v18  ;;  %v495_v17 = vld [vmem:[#allocation2 + $0xd40] sm:$0xff]  ;;  %v477_v18 = vld [vmem:[#allocation2 + $0xcb0] sm:$0xff] }
  0xe8   :  { %3372 = vmatprep.subr.mxu0 %v411_v19  ;;  %3405 = vmatprep.subr.mxu1 %v444_v20  ;;  %v510_v19 = vld [vmem:[#allocation2 + $0xdb8] sm:$0xff]  ;;  %v461_v20 = vld [vmem:[#allocation2 + $0xc30] sm:$0xff] }
  0xe9   :  { %3373 = vmatpush3.msra.mxu0 %v395_v21  ;;  %3406 = vmatpush3.msra.mxu1 %v428_v23  ;;  %v494_v21 = vld [vmem:[#allocation2 + $0xd38] sm:$0xff]  ;;  %v509_v23 = vld [vmem:[#allocation2 + $0xdb0] sm:$0xff] }
  0xea   :  { %3374 = vmatprep.subr.mxu0 %v410_v24  ;;  %3407 = vmatprep.subr.mxu1 %v443_v25  ;;  %v460_v24 = vld [vmem:[#allocation2 + $0xc28] sm:$0xff]  ;;  %v493_v25 = vld [vmem:[#allocation2 + $0xd30] sm:$0xff] }
  0xeb   :  { %3375 = vmatpush3.msra.mxu0 %v394_v26  ;;  %3408 = vmatpush3.msra.mxu1 %v427_v27  ;;  %v475_v26 = vld [vmem:[#allocation2 + $0xca0] sm:$0xff]  ;;  %v508_v27 = vld [vmem:[#allocation2 + $0xda8] sm:$0xff] }
  0xec   :  { %3376 = vmatprep.subr.mxu0 %v409_v28  ;;  %3409 = vmatprep.subr.mxu1 %v442_v30  ;;  %v459_v28 = vld [vmem:[#allocation2 + $0xc20] sm:$0xff]  ;;  %v492_v30 = vld [vmem:[#allocation2 + $0xd28] sm:$0xff] }
  0xed   :  { %3377 = vmatpush3.msra.mxu0 %v393_v31  ;;  %3410 = vmatpush3.msra.mxu1 %v426_v33  ;;  %v474_v31 = vld [vmem:[#allocation2 + $0xc98] sm:$0xff] }
  0xee   :  { %3378 = vmatprep.subr.mxu0 %v408_v34  ;;  %3411 = vmatprep.subr.mxu1 %v441_v35  ;;  %v458_v33 = vld [vmem:[#allocation2 + $0xc18] sm:$0xff]  ;;  %v491_v34 = vld [vmem:[#allocation2 + $0xd20] sm:$0xff]  ;;  %v473_v35 = vld [vmem:[#allocation2 + $0xc90] sm:$0xff] }
  0xef   :  { %3379 = vmatpush3.msra.mxu0 %v392_v36  ;;  %3412 = vmatpush3.msra.mxu1 %v425_v37  ;;  %v977_v36 = vcombine.high %v64_v29, %v64_v29  ;;  %v506_v37 = vld [vmem:[#allocation2 + $0xd98] sm:$0xff] }
  0xf0   :  { %3380 = vmatprep.subr.mxu0 %v407_v38  ;;  %3413 = vmatprep.subr.mxu1 %v440_v40  ;;  %v457_v38 = vld [vmem:[#allocation2 + $0xc10] sm:$0xff]  ;;  %v490_v40 = vld [vmem:[#allocation2 + $0xd18] sm:$0xff] }
  0xf1   :  { %3381 = vmatpush3.msra.mxu0 %v391_v41  ;;  %1899 = vmatprep.mubr.f32.mxu0 %v975_v42  ;;  %v472_v41 = vld [vmem:[#allocation2 + $0xc88] sm:$0xff]  ;;  %v505_v42 = vld [vmem:[#allocation2 + $0xd90] sm:$0xff] }
  0xf2   :  { %3414 = vmatpush3.msra.mxu1 %v424_v43  ;;  %1900 = vmatmul.mubr.f32.vlgmr.msra.gmra.mxu0 %v967_v32  ;;  %v507_v32 = vld [vmem:[#allocation2 + $0xda0] sm:$0xff]  ;;  %v456_v43 = vld [vmem:[#allocation2 + $0xc08] sm:$0xff] }
  0xf3   :  { %3415 = vmatprep.subr.mxu1 %v439_v44  ;;  %3420 = vmatprep.subr.mxu0 %v486_v45  ;;  %v489_v44 = vld [vmem:[#allocation2 + $0xd10] sm:$0xff]  ;;  %v471_v45 = vld [vmem:[#allocation2 + $0xc80] sm:$0xff] }
  0xf4   :  { %3416 = vmatpush3.msra.mxu1 %v423_v46  ;;  %1969 = vmatprep.mubr.f32.mxu1 %v976_v47  ;;  %v991_v46 = vrot.slane %v977_v36, %v4099_v48  ;;  %v504_v47 = vld [vmem:[#allocation2 + $0xd88] sm:$0xff]  ;;  %v65_v36 = vld [vmem:[%s4249_s0 + $0x38] sm:$0xff] }
  0xf5   :  { %3421 = vmatpush3.msra.mxu0 %v470_v49  ;;  %1970 = vmatmul.mubr.f32.vlgmr.msra.gmra.mxu1 %v974_v39  ;;  %v984_v39 = vrot.slane %v64_v29, %v4099_v48  ;;  %v455_v49 = vld [vmem:[#allocation2 + $0xc00] sm:$0xff]  ;;  %v540_v29 = vld [vmem:[#allocation2 + $0xea8] sm:$0xff] }
  0xf6   :  { %3422 = vmatprep.subr.mxu0 %v485_v50  ;;  %3455 = vmatprep.subr.mxu1 %v518_v51  ;;  %v488_v51 = vld [vmem:[#allocation2 + $0xd08] sm:$0xff] }
  0xf7   :  { %3423 = vmatpush3.msra.mxu0 %v469_v52  ;;  %3456 = vmatpush3.msra.mxu1 %v502_v53  ;;  %v992_v50 = vcombine.high %v984_v39, %v984_v39  ;;  %v503_v52 = vld [vmem:[#allocation2 + $0xd80] sm:$0xff]  ;;  %v550_v53 = vld [vmem:[#allocation2 + $0xef8] sm:$0xff] }
  0xf8   :  { %3424 = vmatprep.subr.mxu0 %v484_v54  ;;  %3457 = vmatprep.subr.mxu1 %v517_v55  ;;  %v487_v54 = vld [vmem:[#allocation2 + $0xd00] sm:$0xff]  ;;  %v993_v55 = vcombine.high %v991_v46, %v991_v46 }
  0xf9   :  { %3425 = vmatpush3.msra.mxu0 %v468_v56  ;;  %3458 = vmatpush3.msra.mxu1 %v501_v57  ;;  %v534_v56 = vld [vmem:[#allocation2 + $0xe78] sm:$0xff]  ;;  %v549_v57 = vld [vmem:[#allocation2 + $0xef0] sm:$0xff] }
  0xfa   :  { %3426 = vmatprep.subr.mxu0 %v483_v58  ;;  %3459 = vmatprep.subr.mxu1 %v516_v59  ;;  %v582_v58 = vld [vmem:[#allocation2 + $0xff8] sm:$0xff]  ;;  %v533_v59 = vld [vmem:[#allocation2 + $0xe70] sm:$0xff] }
  0xfb   :  { %3427 = vmatpush3.msra.mxu0 %v467_v60  ;;  %3460 = vmatpush3.msra.mxu1 %v500_v61  ;;  %v566_v60 = vld [vmem:[#allocation2 + $0xf78] sm:$0xff]  ;;  %v548_v61 = vld [vmem:[#allocation2 + $0xee8] sm:$0xff] }
  0xfc   :  { %3428 = vmatprep.subr.mxu0 %v482_v62  ;;  %3461 = vmatprep.subr.mxu1 %v515_v63  ;;  %v581_v62 = vld [vmem:[#allocation2 + $0xff0] sm:$0xff]  ;;  %v532_v63 = vld [vmem:[#allocation2 + $0xe68] sm:$0xff] }
  0xfd   :  { %3429 = vmatpush3.msra.mxu0 %v466_v0  ;;  %3462 = vmatpush3.msra.mxu1 %v499_v1  ;;  %v565_v0 = vld [vmem:[#allocation2 + $0xf70] sm:$0xff]  ;;  %v547_v1 = vld [vmem:[#allocation2 + $0xee0] sm:$0xff] }
  0xfe   :  { %3430 = vmatprep.subr.mxu0 %v481_v2  ;;  %3463 = vmatprep.subr.mxu1 %v514_v3  ;;  %v580_v2 = vld [vmem:[#allocation2 + $0xfe8] sm:$0xff]  ;;  %v531_v3 = vld [vmem:[#allocation2 + $0xe60] sm:$0xff] }
  0xff   :  { %3431 = vmatpush3.msra.mxu0 %v465_v4  ;;  %3464 = vmatpush3.msra.mxu1 %v498_v5  ;;  %v564_v4 = vld [vmem:[#allocation2 + $0xf68] sm:$0xff]  ;;  %v546_v5 = vld [vmem:[#allocation2 + $0xed8] sm:$0xff] }
 0x100   :  { %3432 = vmatprep.subr.mxu0 %v480_v6  ;;  %3465 = vmatprep.subr.mxu1 %v513_v7  ;;  %v579_v6 = vld [vmem:[#allocation2 + $0xfe0] sm:$0xff]  ;;  %v530_v7 = vld [vmem:[#allocation2 + $0xe58] sm:$0xff] }
 0x101   :  { %3433 = vmatpush3.msra.mxu0 %v464_v8  ;;  %3466 = vmatpush3.msra.mxu1 %v497_v9  ;;  %v563_v8 = vld [vmem:[#allocation2 + $0xf60] sm:$0xff]  ;;  %v545_v9 = vld [vmem:[#allocation2 + $0xed0] sm:$0xff] }
 0x102   :  { %3434 = vmatprep.subr.mxu0 %v479_v10  ;;  %3467 = vmatprep.subr.mxu1 %v512_v11  ;;  %v578_v10 = vld [vmem:[#allocation2 + $0xfd8] sm:$0xff]  ;;  %v529_v11 = vld [vmem:[#allocation2 + $0xe50] sm:$0xff] }
 0x103   :  { %3435 = vmatpush3.msra.mxu0 %v463_v12  ;;  %3468 = vmatpush3.msra.mxu1 %v496_v13  ;;  %v562_v12 = vld [vmem:[#allocation2 + $0xf58] sm:$0xff]  ;;  %v544_v13 = vld [vmem:[#allocation2 + $0xec8] sm:$0xff] }
 0x104   :  { %3436 = vmatprep.subr.mxu0 %v478_v14  ;;  %3469 = vmatprep.subr.mxu1 %v511_v15  ;;  %v577_v14 = vld [vmem:[#allocation2 + $0xfd0] sm:$0xff]  ;;  %v528_v15 = vld [vmem:[#allocation2 + $0xe48] sm:$0xff] }
 0x105   :  { %3437 = vmatpush3.msra.mxu0 %v462_v16  ;;  %3470 = vmatpush3.msra.mxu1 %v495_v17  ;;  %v561_v16 = vld [vmem:[#allocation2 + $0xf50] sm:$0xff]  ;;  %v543_v17 = vld [vmem:[#allocation2 + $0xec0] sm:$0xff] }
 0x106   :  { %3438 = vmatprep.subr.mxu0 %v477_v18  ;;  %3471 = vmatprep.subr.mxu1 %v510_v19  ;;  %v576_v18 = vld [vmem:[#allocation2 + $0xfc8] sm:$0xff]  ;;  %v527_v19 = vld [vmem:[#allocation2 + $0xe40] sm:$0xff] }
 0x107   :  { %3439 = vmatpush3.msra.mxu0 %v461_v20  ;;  %3472 = vmatpush3.msra.mxu1 %v494_v21  ;;  %v560_v20 = vld [vmem:[#allocation2 + $0xf48] sm:$0xff]  ;;  %v542_v21 = vld [vmem:[#allocation2 + $0xeb8] sm:$0xff] }
 0x108   :  { %3440 = vmatprep.subr.mxu0 %v476_v22  ;;  %3473 = vmatprep.subr.mxu1 %v509_v23  ;;  %v575_v22 = vld [vmem:[#allocation2 + $0xfc0] sm:$0xff]  ;;  %v526_v23 = vld [vmem:[#allocation2 + $0xe38] sm:$0xff] }
 0x109   :  { %3441 = vmatpush3.msra.mxu0 %v460_v24  ;;  %3474 = vmatpush3.msra.mxu1 %v493_v25  ;;  %v559_v24 = vld [vmem:[#allocation2 + $0xf40] sm:$0xff]  ;;  %v541_v25 = vld [vmem:[#allocation2 + $0xeb0] sm:$0xff] }
 0x10a   :  { %3442 = vmatprep.subr.mxu0 %v475_v26  ;;  %3475 = vmatprep.subr.mxu1 %v508_v27  ;;  %v574_v26 = vld [vmem:[#allocation2 + $0xfb8] sm:$0xff]  ;;  %v525_v27 = vld [vmem:[#allocation2 + $0xe30] sm:$0xff] }
 0x10b   :  { %3443 = vmatpush3.msra.mxu0 %v459_v28  ;;  %3476 = vmatpush3.msra.mxu1 %v492_v30  ;;  %v558_v28 = vld [vmem:[#allocation2 + $0xf38] sm:$0xff]  ;;  %v573_v30 = vld [vmem:[#allocation2 + $0xfb0] sm:$0xff] }
 0x10c   :  { %3444 = vmatprep.subr.mxu0 %v474_v31  ;;  %3477 = vmatprep.subr.mxu1 %v507_v32  ;;  %v524_v31 = vld [vmem:[#allocation2 + $0xe28] sm:$0xff]  ;;  %v557_v32 = vld [vmem:[#allocation2 + $0xf30] sm:$0xff] }
 0x10d   :  { %3445 = vmatpush3.msra.mxu0 %v458_v33  ;;  %3478 = vmatpush3.msra.mxu1 %v491_v34  ;;  %v539_v33 = vld [vmem:[#allocation2 + $0xea0] sm:$0xff]  ;;  %v572_v34 = vld [vmem:[#allocation2 + $0xfa8] sm:$0xff] }
 0x10e   :  { %3446 = vmatprep.subr.mxu0 %v473_v35  ;;  %3479 = vmatprep.subr.mxu1 %v506_v37  ;;  %v523_v35 = vld [vmem:[#allocation2 + $0xe20] sm:$0xff]  ;;  %v556_v37 = vld [vmem:[#allocation2 + $0xf28] sm:$0xff] }
 0x10f   :  { %3447 = vmatpush3.msra.mxu0 %v457_v38  ;;  %3480 = vmatpush3.msra.mxu1 %v490_v40  ;;  %v538_v38 = vld [vmem:[#allocation2 + $0xe98] sm:$0xff] }
 0x110   :  { %3448 = vmatprep.subr.mxu0 %v472_v41  ;;  %3481 = vmatprep.subr.mxu1 %v505_v42  ;;  %v522_v40 = vld [vmem:[#allocation2 + $0xe18] sm:$0xff]  ;;  %v555_v41 = vld [vmem:[#allocation2 + $0xf20] sm:$0xff]  ;;  %v537_v42 = vld [vmem:[#allocation2 + $0xe90] sm:$0xff] }
 0x111   :  { %3449 = vmatpush3.msra.mxu0 %v456_v43  ;;  %3482 = vmatpush3.msra.mxu1 %v489_v44  ;;  %v994_v43 = vcombine.high %v65_v36, %v65_v36  ;;  %v570_v44 = vld [vmem:[#allocation2 + $0xf98] sm:$0xff] }
 0x112   :  { %3450 = vmatprep.subr.mxu0 %v471_v45  ;;  %3483 = vmatprep.subr.mxu1 %v504_v47  ;;  %v521_v45 = vld [vmem:[#allocation2 + $0xe10] sm:$0xff]  ;;  %v554_v47 = vld [vmem:[#allocation2 + $0xf18] sm:$0xff] }
 0x113   :  { %3451 = vmatpush3.msra.mxu0 %v455_v49  ;;  %2039 = vmatprep.mubr.f32.mxu0 %v992_v50  ;;  %v536_v49 = vld [vmem:[#allocation2 + $0xe88] sm:$0xff]  ;;  %v569_v50 = vld [vmem:[#allocation2 + $0xf90] sm:$0xff] }
 0x114   :  { %3484 = vmatpush3.msra.mxu1 %v488_v51  ;;  %2040 = vmatmul.mubr.f32.vlgmr.msra.gmra.mxu0 %v984_v39  ;;  %v571_v39 = vld [vmem:[#allocation2 + $0xfa0] sm:$0xff]  ;;  %v520_v51 = vld [vmem:[#allocation2 + $0xe08] sm:$0xff] }
 0x115   :  { %3485 = vmatprep.subr.mxu1 %v503_v52  ;;  %3490 = vmatprep.subr.mxu0 %v550_v53  ;;  %v553_v52 = vld [vmem:[#allocation2 + $0xf10] sm:$0xff]  ;;  %v535_v53 = vld [vmem:[#allocation2 + $0xe80] sm:$0xff] }
 0x116   :  { %3486 = vmatpush3.msra.mxu1 %v487_v54  ;;  %2109 = vmatprep.mubr.f32.mxu1 %v993_v55  ;;  %v1008_v54 = vrot.slane %v994_v43, %v4099_v48  ;;  %v568_v55 = vld [vmem:[#allocation2 + $0xf88] sm:$0xff]  ;;  %v66_v43 = vld [vmem:[%s4249_s0 + $0x40] sm:$0xff] }
 0x117   :  { %3491 = vmatpush3.msra.mxu0 %v534_v56  ;;  %2110 = vmatmul.mubr.f32.vlgmr.msra.gmra.mxu1 %v991_v46  ;;  %v1001_v46 = vrot.slane %v65_v36, %v4099_v48  ;;  %v519_v56 = vld [vmem:[#allocation2 + $0xe00] sm:$0xff]  ;;  %v604_v36 = vld [vmem:[#allocation2 + $0x10a8] sm:$0xff] }
 0x118   :  { %3492 = vmatprep.subr.mxu0 %v549_v57  ;;  %3525 = vmatprep.subr.mxu1 %v582_v58  ;;  %v552_v58 = vld [vmem:[#allocation2 + $0xf08] sm:$0xff] }
 0x119   :  { %3493 = vmatpush3.msra.mxu0 %v533_v59  ;;  %3526 = vmatpush3.msra.mxu1 %v566_v60  ;;  %v1009_v57 = vcombine.high %v1001_v46, %v1001_v46  ;;  %v567_v59 = vld [vmem:[#allocation2 + $0xf80] sm:$0xff]  ;;  %v614_v60 = vld [vmem:[#allocation2 + $0x10f8] sm:$0xff] }
 0x11a   :  { %3494 = vmatprep.subr.mxu0 %v548_v61  ;;  %3527 = vmatprep.subr.mxu1 %v581_v62  ;;  %v551_v61 = vld [vmem:[#allocation2 + $0xf00] sm:$0xff]  ;;  %v1010_v62 = vcombine.high %v1008_v54, %v1008_v54 }
 0x11b   :  { %3495 = vmatpush3.msra.mxu0 %v532_v63  ;;  %3528 = vmatpush3.msra.mxu1 %v565_v0  ;;  %v598_v63 = vld [vmem:[#allocation2 + $0x1078] sm:$0xff]  ;;  %v613_v0 = vld [vmem:[#allocation2 + $0x10f0] sm:$0xff] }
 0x11c   :  { %3496 = vmatprep.subr.mxu0 %v547_v1  ;;  %3529 = vmatprep.subr.mxu1 %v580_v2  ;;  %v646_v1 = vld [vmem:[#allocation2 + $0x11f8] sm:$0xff]  ;;  %v597_v2 = vld [vmem:[#allocation2 + $0x1070] sm:$0xff] }
 0x11d   :  { %3497 = vmatpush3.msra.mxu0 %v531_v3  ;;  %3530 = vmatpush3.msra.mxu1 %v564_v4  ;;  %v630_v3 = vld [vmem:[#allocation2 + $0x1178] sm:$0xff]  ;;  %v612_v4 = vld [vmem:[#allocation2 + $0x10e8] sm:$0xff] }
 0x11e   :  { %3498 = vmatprep.subr.mxu0 %v546_v5  ;;  %3531 = vmatprep.subr.mxu1 %v579_v6  ;;  %v645_v5 = vld [vmem:[#allocation2 + $0x11f0] sm:$0xff]  ;;  %v596_v6 = vld [vmem:[#allocation2 + $0x1068] sm:$0xff] }
 0x11f   :  { %3499 = vmatpush3.msra.mxu0 %v530_v7  ;;  %3532 = vmatpush3.msra.mxu1 %v563_v8  ;;  %v629_v7 = vld [vmem:[#allocation2 + $0x1170] sm:$0xff]  ;;  %v611_v8 = vld [vmem:[#allocation2 + $0x10e0] sm:$0xff] }
 0x120   :  { %3500 = vmatprep.subr.mxu0 %v545_v9  ;;  %3533 = vmatprep.subr.mxu1 %v578_v10  ;;  %v644_v9 = vld [vmem:[#allocation2 + $0x11e8] sm:$0xff]  ;;  %v595_v10 = vld [vmem:[#allocation2 + $0x1060] sm:$0xff] }
 0x121   :  { %3501 = vmatpush3.msra.mxu0 %v529_v11  ;;  %3534 = vmatpush3.msra.mxu1 %v562_v12  ;;  %v628_v11 = vld [vmem:[#allocation2 + $0x1168] sm:$0xff]  ;;  %v610_v12 = vld [vmem:[#allocation2 + $0x10d8] sm:$0xff] }
 0x122   :  { %3502 = vmatprep.subr.mxu0 %v544_v13  ;;  %3535 = vmatprep.subr.mxu1 %v577_v14  ;;  %v643_v13 = vld [vmem:[#allocation2 + $0x11e0] sm:$0xff]  ;;  %v594_v14 = vld [vmem:[#allocation2 + $0x1058] sm:$0xff] }
 0x123   :  { %3503 = vmatpush3.msra.mxu0 %v528_v15  ;;  %3536 = vmatpush3.msra.mxu1 %v561_v16  ;;  %v627_v15 = vld [vmem:[#allocation2 + $0x1160] sm:$0xff]  ;;  %v609_v16 = vld [vmem:[#allocation2 + $0x10d0] sm:$0xff] }
 0x124   :  { %3504 = vmatprep.subr.mxu0 %v543_v17  ;;  %3537 = vmatprep.subr.mxu1 %v576_v18  ;;  %v642_v17 = vld [vmem:[#allocation2 + $0x11d8] sm:$0xff]  ;;  %v593_v18 = vld [vmem:[#allocation2 + $0x1050] sm:$0xff] }
 0x125   :  { %3505 = vmatpush3.msra.mxu0 %v527_v19  ;;  %3538 = vmatpush3.msra.mxu1 %v560_v20  ;;  %v626_v19 = vld [vmem:[#allocation2 + $0x1158] sm:$0xff]  ;;  %v608_v20 = vld [vmem:[#allocation2 + $0x10c8] sm:$0xff] }
 0x126   :  { %3506 = vmatprep.subr.mxu0 %v542_v21  ;;  %3539 = vmatprep.subr.mxu1 %v575_v22  ;;  %v641_v21 = vld [vmem:[#allocation2 + $0x11d0] sm:$0xff]  ;;  %v592_v22 = vld [vmem:[#allocation2 + $0x1048] sm:$0xff] }
 0x127   :  { %3507 = vmatpush3.msra.mxu0 %v526_v23  ;;  %3540 = vmatpush3.msra.mxu1 %v559_v24  ;;  %v625_v23 = vld [vmem:[#allocation2 + $0x1150] sm:$0xff]  ;;  %v607_v24 = vld [vmem:[#allocation2 + $0x10c0] sm:$0xff] }
 0x128   :  { %3508 = vmatprep.subr.mxu0 %v541_v25  ;;  %3541 = vmatprep.subr.mxu1 %v574_v26  ;;  %v640_v25 = vld [vmem:[#allocation2 + $0x11c8] sm:$0xff]  ;;  %v591_v26 = vld [vmem:[#allocation2 + $0x1040] sm:$0xff] }
 0x129   :  { %3509 = vmatpush3.msra.mxu0 %v525_v27  ;;  %3542 = vmatpush3.msra.mxu1 %v558_v28  ;;  %v624_v27 = vld [vmem:[#allocation2 + $0x1148] sm:$0xff]  ;;  %v606_v28 = vld [vmem:[#allocation2 + $0x10b8] sm:$0xff] }
 0x12a   :  { %3510 = vmatprep.subr.mxu0 %v540_v29  ;;  %3543 = vmatprep.subr.mxu1 %v573_v30  ;;  %v639_v29 = vld [vmem:[#allocation2 + $0x11c0] sm:$0xff]  ;;  %v590_v30 = vld [vmem:[#allocation2 + $0x1038] sm:$0xff] }
 0x12b   :  { %3511 = vmatpush3.msra.mxu0 %v524_v31  ;;  %3544 = vmatpush3.msra.mxu1 %v557_v32  ;;  %v623_v31 = vld [vmem:[#allocation2 + $0x1140] sm:$0xff]  ;;  %v605_v32 = vld [vmem:[#allocation2 + $0x10b0] sm:$0xff] }
 0x12c   :  { %3512 = vmatprep.subr.mxu0 %v539_v33  ;;  %3545 = vmatprep.subr.mxu1 %v572_v34  ;;  %v638_v33 = vld [vmem:[#allocation2 + $0x11b8] sm:$0xff]  ;;  %v589_v34 = vld [vmem:[#allocation2 + $0x1030] sm:$0xff] }
 0x12d   :  { %3513 = vmatpush3.msra.mxu0 %v523_v35  ;;  %3546 = vmatpush3.msra.mxu1 %v556_v37  ;;  %v622_v35 = vld [vmem:[#allocation2 + $0x1138] sm:$0xff]  ;;  %v637_v37 = vld [vmem:[#allocation2 + $0x11b0] sm:$0xff] }
 0x12e   :  { %3514 = vmatprep.subr.mxu0 %v538_v38  ;;  %3547 = vmatprep.subr.mxu1 %v571_v39  ;;  %v588_v38 = vld [vmem:[#allocation2 + $0x1028] sm:$0xff]  ;;  %v621_v39 = vld [vmem:[#allocation2 + $0x1130] sm:$0xff] }
 0x12f   :  { %3515 = vmatpush3.msra.mxu0 %v522_v40  ;;  %3548 = vmatpush3.msra.mxu1 %v555_v41  ;;  %v603_v40 = vld [vmem:[#allocation2 + $0x10a0] sm:$0xff]  ;;  %v636_v41 = vld [vmem:[#allocation2 + $0x11a8] sm:$0xff] }
 0x130   :  { %3516 = vmatprep.subr.mxu0 %v537_v42  ;;  %3549 = vmatprep.subr.mxu1 %v570_v44  ;;  %v587_v42 = vld [vmem:[#allocation2 + $0x1020] sm:$0xff]  ;;  %v620_v44 = vld [vmem:[#allocation2 + $0x1128] sm:$0xff] }
 0x131   :  { %3517 = vmatpush3.msra.mxu0 %v521_v45  ;;  %3550 = vmatpush3.msra.mxu1 %v554_v47  ;;  %v602_v45 = vld [vmem:[#allocation2 + $0x1098] sm:$0xff] }
 0x132   :  { %3518 = vmatprep.subr.mxu0 %v536_v49  ;;  %3551 = vmatprep.subr.mxu1 %v569_v50  ;;  %v586_v47 = vld [vmem:[#allocation2 + $0x1018] sm:$0xff]  ;;  %v619_v49 = vld [vmem:[#allocation2 + $0x1120] sm:$0xff]  ;;  %v601_v50 = vld [vmem:[#allocation2 + $0x1090] sm:$0xff] }
 0x133   :  { %3519 = vmatpush3.msra.mxu0 %v520_v51  ;;  %3552 = vmatpush3.msra.mxu1 %v553_v52  ;;  %v1011_v51 = vcombine.high %v66_v43, %v66_v43  ;;  %v634_v52 = vld [vmem:[#allocation2 + $0x1198] sm:$0xff] }
 0x134   :  { %3520 = vmatprep.subr.mxu0 %v535_v53  ;;  %3553 = vmatprep.subr.mxu1 %v568_v55  ;;  %v585_v53 = vld [vmem:[#allocation2 + $0x1010] sm:$0xff]  ;;  %v618_v55 = vld [vmem:[#allocation2 + $0x1118] sm:$0xff] }
 0x135   :  { %3521 = vmatpush3.msra.mxu0 %v519_v56  ;;  %2179 = vmatprep.mubr.f32.mxu0 %v1009_v57  ;;  %v600_v56 = vld [vmem:[#allocation2 + $0x1088] sm:$0xff]  ;;  %v633_v57 = vld [vmem:[#allocation2 + $0x1190] sm:$0xff] }
 0x136   :  { %3554 = vmatpush3.msra.mxu1 %v552_v58  ;;  %2180 = vmatmul.mubr.f32.vlgmr.msra.gmra.mxu0 %v1001_v46  ;;  %v635_v46 = vld [vmem:[#allocation2 + $0x11a0] sm:$0xff]  ;;  %v584_v58 = vld [vmem:[#allocation2 + $0x1008] sm:$0xff] }
 0x137   :  { %3555 = vmatprep.subr.mxu1 %v567_v59  ;;  %3560 = vmatprep.subr.mxu0 %v614_v60  ;;  %v617_v59 = vld [vmem:[#allocation2 + $0x1110] sm:$0xff]  ;;  %v599_v60 = vld [vmem:[#allocation2 + $0x1080] sm:$0xff] }
 0x138   :  { %3556 = vmatpush3.msra.mxu1 %v551_v61  ;;  %2249 = vmatprep.mubr.f32.mxu1 %v1010_v62  ;;  %v1025_v61 = vrot.slane %v1011_v51, %v4099_v48  ;;  %v632_v62 = vld [vmem:[#allocation2 + $0x1188] sm:$0xff] }
 0x139   :  { %3561 = vmatpush3.msra.mxu0 %v598_v63  ;;  %2250 = vmatmul.mubr.f32.vlgmr.msra.gmra.mxu1 %v1008_v54  ;;  %v1018_v54 = vrot.slane %v66_v43, %v4099_v48  ;;  %v583_v63 = vld [vmem:[#allocation2 + $0x1000] sm:$0xff]  ;;  %v668_v43 = vld [vmem:[#allocation2 + $0x12a8] sm:$0xff] }
 0x13a   :  { %3562 = vmatprep.subr.mxu0 %v613_v0  ;;  %3595 = vmatprep.subr.mxu1 %v646_v1  ;;  %v616_v1 = vld [vmem:[#allocation2 + $0x1108] sm:$0xff] }
 0x13b   :  { %3563 = vmatpush3.msra.mxu0 %v597_v2  ;;  %3596 = vmatpush3.msra.mxu1 %v630_v3  ;;  %v1026_v0 = vcombine.high %v1018_v54, %v1018_v54  ;;  %v631_v2 = vld [vmem:[#allocation2 + $0x1180] sm:$0xff]  ;;  %v678_v3 = vld [vmem:[#allocation2 + $0x12f8] sm:$0xff]  ;;  %v67_v51 = vld [vmem:[%s4249_s0 + $0x48] sm:$0xff] }
 0x13c   :  { %3564 = vmatprep.subr.mxu0 %v612_v4  ;;  %3597 = vmatprep.subr.mxu1 %v645_v5  ;;  %v615_v4 = vld [vmem:[#allocation2 + $0x1100] sm:$0xff]  ;;  %v1027_v5 = vcombine.high %v1025_v61, %v1025_v61 }
 0x13d   :  { %3565 = vmatpush3.msra.mxu0 %v596_v6  ;;  %3598 = vmatpush3.msra.mxu1 %v629_v7  ;;  %v662_v6 = vld [vmem:[#allocation2 + $0x1278] sm:$0xff]  ;;  %v677_v7 = vld [vmem:[#allocation2 + $0x12f0] sm:$0xff] }
 0x13e   :  { %3566 = vmatprep.subr.mxu0 %v611_v8  ;;  %3599 = vmatprep.subr.mxu1 %v644_v9  ;;  %v710_v8 = vld [vmem:[#allocation2 + $0x13f8] sm:$0xff]  ;;  %v661_v9 = vld [vmem:[#allocation2 + $0x1270] sm:$0xff] }
 0x13f   :  { %3567 = vmatpush3.msra.mxu0 %v595_v10  ;;  %3600 = vmatpush3.msra.mxu1 %v628_v11  ;;  %v694_v10 = vld [vmem:[#allocation2 + $0x1378] sm:$0xff]  ;;  %v676_v11 = vld [vmem:[#allocation2 + $0x12e8] sm:$0xff] }
 0x140   :  { %3568 = vmatprep.subr.mxu0 %v610_v12  ;;  %3601 = vmatprep.subr.mxu1 %v643_v13  ;;  %v709_v12 = vld [vmem:[#allocation2 + $0x13f0] sm:$0xff]  ;;  %v660_v13 = vld [vmem:[#allocation2 + $0x1268] sm:$0xff] }
 0x141   :  { %3569 = vmatpush3.msra.mxu0 %v594_v14  ;;  %3602 = vmatpush3.msra.mxu1 %v627_v15  ;;  %v693_v14 = vld [vmem:[#allocation2 + $0x1370] sm:$0xff]  ;;  %v675_v15 = vld [vmem:[#allocation2 + $0x12e0] sm:$0xff] }
 0x142   :  { %3570 = vmatprep.subr.mxu0 %v609_v16  ;;  %3603 = vmatprep.subr.mxu1 %v642_v17  ;;  %v708_v16 = vld [vmem:[#allocation2 + $0x13e8] sm:$0xff]  ;;  %v659_v17 = vld [vmem:[#allocation2 + $0x1260] sm:$0xff] }
 0x143   :  { %3571 = vmatpush3.msra.mxu0 %v593_v18  ;;  %3604 = vmatpush3.msra.mxu1 %v626_v19  ;;  %v692_v18 = vld [vmem:[#allocation2 + $0x1368] sm:$0xff]  ;;  %v674_v19 = vld [vmem:[#allocation2 + $0x12d8] sm:$0xff] }
 0x144   :  { %3572 = vmatprep.subr.mxu0 %v608_v20  ;;  %3605 = vmatprep.subr.mxu1 %v641_v21  ;;  %v707_v20 = vld [vmem:[#allocation2 + $0x13e0] sm:$0xff]  ;;  %v658_v21 = vld [vmem:[#allocation2 + $0x1258] sm:$0xff] }
 0x145   :  { %3573 = vmatpush3.msra.mxu0 %v592_v22  ;;  %3606 = vmatpush3.msra.mxu1 %v625_v23  ;;  %v691_v22 = vld [vmem:[#allocation2 + $0x1360] sm:$0xff]  ;;  %v673_v23 = vld [vmem:[#allocation2 + $0x12d0] sm:$0xff] }
 0x146   :  { %3574 = vmatprep.subr.mxu0 %v607_v24  ;;  %3607 = vmatprep.subr.mxu1 %v640_v25  ;;  %v706_v24 = vld [vmem:[#allocation2 + $0x13d8] sm:$0xff]  ;;  %v657_v25 = vld [vmem:[#allocation2 + $0x1250] sm:$0xff] }
 0x147   :  { %3575 = vmatpush3.msra.mxu0 %v591_v26  ;;  %3608 = vmatpush3.msra.mxu1 %v624_v27  ;;  %v690_v26 = vld [vmem:[#allocation2 + $0x1358] sm:$0xff]  ;;  %v672_v27 = vld [vmem:[#allocation2 + $0x12c8] sm:$0xff] }
 0x148   :  { %3576 = vmatprep.subr.mxu0 %v606_v28  ;;  %3609 = vmatprep.subr.mxu1 %v639_v29  ;;  %v705_v28 = vld [vmem:[#allocation2 + $0x13d0] sm:$0xff]  ;;  %v656_v29 = vld [vmem:[#allocation2 + $0x1248] sm:$0xff] }
 0x149   :  { %3577 = vmatpush3.msra.mxu0 %v590_v30  ;;  %3610 = vmatpush3.msra.mxu1 %v623_v31  ;;  %v689_v30 = vld [vmem:[#allocation2 + $0x1350] sm:$0xff]  ;;  %v671_v31 = vld [vmem:[#allocation2 + $0x12c0] sm:$0xff] }
 0x14a   :  { %3578 = vmatprep.subr.mxu0 %v605_v32  ;;  %3611 = vmatprep.subr.mxu1 %v638_v33  ;;  %v704_v32 = vld [vmem:[#allocation2 + $0x13c8] sm:$0xff]  ;;  %v655_v33 = vld [vmem:[#allocation2 + $0x1240] sm:$0xff] }
 0x14b   :  { %3579 = vmatpush3.msra.mxu0 %v589_v34  ;;  %3612 = vmatpush3.msra.mxu1 %v622_v35  ;;  %v688_v34 = vld [vmem:[#allocation2 + $0x1348] sm:$0xff]  ;;  %v670_v35 = vld [vmem:[#allocation2 + $0x12b8] sm:$0xff] }
 0x14c   :  { %3580 = vmatprep.subr.mxu0 %v604_v36  ;;  %3613 = vmatprep.subr.mxu1 %v637_v37  ;;  %v703_v36 = vld [vmem:[#allocation2 + $0x13c0] sm:$0xff]  ;;  %v654_v37 = vld [vmem:[#allocation2 + $0x1238] sm:$0xff] }
 0x14d   :  { %3581 = vmatpush3.msra.mxu0 %v588_v38  ;;  %3614 = vmatpush3.msra.mxu1 %v621_v39  ;;  %v687_v38 = vld [vmem:[#allocation2 + $0x1340] sm:$0xff]  ;;  %v669_v39 = vld [vmem:[#allocation2 + $0x12b0] sm:$0xff] }
 0x14e   :  { %3582 = vmatprep.subr.mxu0 %v603_v40  ;;  %3615 = vmatprep.subr.mxu1 %v636_v41  ;;  %v702_v40 = vld [vmem:[#allocation2 + $0x13b8] sm:$0xff]  ;;  %v653_v41 = vld [vmem:[#allocation2 + $0x1230] sm:$0xff] }
 0x14f   :  { %3583 = vmatpush3.msra.mxu0 %v587_v42  ;;  %3616 = vmatpush3.msra.mxu1 %v620_v44  ;;  %v686_v42 = vld [vmem:[#allocation2 + $0x1338] sm:$0xff]  ;;  %v701_v44 = vld [vmem:[#allocation2 + $0x13b0] sm:$0xff] }
 0x150   :  { %3584 = vmatprep.subr.mxu0 %v602_v45  ;;  %3617 = vmatprep.subr.mxu1 %v635_v46  ;;  %v652_v45 = vld [vmem:[#allocation2 + $0x1228] sm:$0xff]  ;;  %v685_v46 = vld [vmem:[#allocation2 + $0x1330] sm:$0xff] }
 0x151   :  { %3585 = vmatpush3.msra.mxu0 %v586_v47  ;;  %3618 = vmatpush3.msra.mxu1 %v619_v49  ;;  %v667_v47 = vld [vmem:[#allocation2 + $0x12a0] sm:$0xff]  ;;  %v700_v49 = vld [vmem:[#allocation2 + $0x13a8] sm:$0xff] }
 0x152   :  { %3586 = vmatprep.subr.mxu0 %v601_v50  ;;  %3619 = vmatprep.subr.mxu1 %v634_v52  ;;  %v651_v50 = vld [vmem:[#allocation2 + $0x1220] sm:$0xff]  ;;  %v684_v52 = vld [vmem:[#allocation2 + $0x1328] sm:$0xff] }
 0x153   :  { %3587 = vmatpush3.msra.mxu0 %v585_v53  ;;  %3620 = vmatpush3.msra.mxu1 %v618_v55  ;;  %v666_v53 = vld [vmem:[#allocation2 + $0x1298] sm:$0xff] }
 0x154   :  { %3588 = vmatprep.subr.mxu0 %v600_v56  ;;  %3621 = vmatprep.subr.mxu1 %v633_v57  ;;  %v650_v55 = vld [vmem:[#allocation2 + $0x1218] sm:$0xff]  ;;  %v683_v56 = vld [vmem:[#allocation2 + $0x1320] sm:$0xff]  ;;  %v665_v57 = vld [vmem:[#allocation2 + $0x1290] sm:$0xff] }
 0x155   :  { %3589 = vmatpush3.msra.mxu0 %v584_v58  ;;  %3622 = vmatpush3.msra.mxu1 %v617_v59  ;;  %v1028_v58 = vcombine.high %v67_v51, %v67_v51  ;;  %v698_v59 = vld [vmem:[#allocation2 + $0x1398] sm:$0xff] }
 0x156   :  { %3590 = vmatprep.subr.mxu0 %v599_v60  ;;  %3623 = vmatprep.subr.mxu1 %v632_v62  ;;  %v649_v60 = vld [vmem:[#allocation2 + $0x1210] sm:$0xff]  ;;  %v682_v62 = vld [vmem:[#allocation2 + $0x1318] sm:$0xff] }
 0x157   :  { %3591 = vmatpush3.msra.mxu0 %v583_v63  ;;  %2319 = vmatprep.mubr.f32.mxu0 %v1026_v0  ;;  %v664_v63 = vld [vmem:[#allocation2 + $0x1288] sm:$0xff]  ;;  %v697_v0 = vld [vmem:[#allocation2 + $0x1390] sm:$0xff] }
 0x158   :  { %3624 = vmatpush3.msra.mxu1 %v616_v1  ;;  %2320 = vmatmul.mubr.f32.vlgmr.msra.gmra.mxu0 %v1018_v54  ;;  %v699_v54 = vld [vmem:[#allocation2 + $0x13a0] sm:$0xff]  ;;  %v648_v1 = vld [vmem:[#allocation2 + $0x1208] sm:$0xff] }
 0x159   :  { %3625 = vmatprep.subr.mxu1 %v631_v2  ;;  %3630 = vmatprep.subr.mxu0 %v678_v3  ;;  %v681_v2 = vld [vmem:[#allocation2 + $0x1310] sm:$0xff]  ;;  %v663_v3 = vld [vmem:[#allocation2 + $0x1280] sm:$0xff] }
 0x15a   :  { %3626 = vmatpush3.msra.mxu1 %v615_v4  ;;  %2389 = vmatprep.mubr.f32.mxu1 %v1027_v5  ;;  %v1042_v4 = vrot.slane %v1028_v58, %v4099_v48  ;;  %v696_v5 = vld [vmem:[#allocation2 + $0x1388] sm:$0xff]  ;;  %v68_v58 = vld [vmem:[%s4249_s0 + $0x50] sm:$0xff] }
 0x15b   :  { %3631 = vmatpush3.msra.mxu0 %v662_v6  ;;  %2390 = vmatmul.mubr.f32.vlgmr.msra.gmra.mxu1 %v1025_v61  ;;  %v1035_v61 = vrot.slane %v67_v51, %v4099_v48  ;;  %v647_v6 = vld [vmem:[#allocation2 + $0x1200] sm:$0xff]  ;;  %v732_v51 = vld [vmem:[#allocation2 + $0x14a8] sm:$0xff] }
 0x15c   :  { %3632 = vmatprep.subr.mxu0 %v677_v7  ;;  %3665 = vmatprep.subr.mxu1 %v710_v8  ;;  %v680_v8 = vld [vmem:[#allocation2 + $0x1308] sm:$0xff] }
 0x15d   :  { %3633 = vmatpush3.msra.mxu0 %v661_v9  ;;  %3666 = vmatpush3.msra.mxu1 %v694_v10  ;;  %v1043_v7 = vcombine.high %v1035_v61, %v1035_v61  ;;  %v695_v9 = vld [vmem:[#allocation2 + $0x1380] sm:$0xff]  ;;  %v742_v10 = vld [vmem:[#allocation2 + $0x14f8] sm:$0xff] }
 0x15e   :  { %3634 = vmatprep.subr.mxu0 %v676_v11  ;;  %3667 = vmatprep.subr.mxu1 %v709_v12  ;;  %v679_v11 = vld [vmem:[#allocation2 + $0x1300] sm:$0xff]  ;;  %v1044_v12 = vcombine.high %v1042_v4, %v1042_v4 }
 0x15f   :  { %3635 = vmatpush3.msra.mxu0 %v660_v13  ;;  %3668 = vmatpush3.msra.mxu1 %v693_v14  ;;  %v726_v13 = vld [vmem:[#allocation2 + $0x1478] sm:$0xff]  ;;  %v741_v14 = vld [vmem:[#allocation2 + $0x14f0] sm:$0xff] }
 0x160   :  { %3636 = vmatprep.subr.mxu0 %v675_v15  ;;  %3669 = vmatprep.subr.mxu1 %v708_v16  ;;  %v774_v15 = vld [vmem:[#allocation2 + $0x15f8] sm:$0xff]  ;;  %v725_v16 = vld [vmem:[#allocation2 + $0x1470] sm:$0xff] }
 0x161   :  { %3637 = vmatpush3.msra.mxu0 %v659_v17  ;;  %3670 = vmatpush3.msra.mxu1 %v692_v18  ;;  %v758_v17 = vld [vmem:[#allocation2 + $0x1578] sm:$0xff]  ;;  %v740_v18 = vld [vmem:[#allocation2 + $0x14e8] sm:$0xff] }
 0x162   :  { %3638 = vmatprep.subr.mxu0 %v674_v19  ;;  %3671 = vmatprep.subr.mxu1 %v707_v20  ;;  %v773_v19 = vld [vmem:[#allocation2 + $0x15f0] sm:$0xff]  ;;  %v724_v20 = vld [vmem:[#allocation2 + $0x1468] sm:$0xff] }
 0x163   :  { %3639 = vmatpush3.msra.mxu0 %v658_v21  ;;  %3672 = vmatpush3.msra.mxu1 %v691_v22  ;;  %v757_v21 = vld [vmem:[#allocation2 + $0x1570] sm:$0xff]  ;;  %v739_v22 = vld [vmem:[#allocation2 + $0x14e0] sm:$0xff] }
 0x164   :  { %3640 = vmatprep.subr.mxu0 %v673_v23  ;;  %3673 = vmatprep.subr.mxu1 %v706_v24  ;;  %v772_v23 = vld [vmem:[#allocation2 + $0x15e8] sm:$0xff]  ;;  %v723_v24 = vld [vmem:[#allocation2 + $0x1460] sm:$0xff] }
 0x165   :  { %3641 = vmatpush3.msra.mxu0 %v657_v25  ;;  %3674 = vmatpush3.msra.mxu1 %v690_v26  ;;  %v756_v25 = vld [vmem:[#allocation2 + $0x1568] sm:$0xff]  ;;  %v738_v26 = vld [vmem:[#allocation2 + $0x14d8] sm:$0xff] }
 0x166   :  { %3642 = vmatprep.subr.mxu0 %v672_v27  ;;  %3675 = vmatprep.subr.mxu1 %v705_v28  ;;  %v771_v27 = vld [vmem:[#allocation2 + $0x15e0] sm:$0xff]  ;;  %v722_v28 = vld [vmem:[#allocation2 + $0x1458] sm:$0xff] }
 0x167   :  { %3643 = vmatpush3.msra.mxu0 %v656_v29  ;;  %3676 = vmatpush3.msra.mxu1 %v689_v30  ;;  %v755_v29 = vld [vmem:[#allocation2 + $0x1560] sm:$0xff]  ;;  %v737_v30 = vld [vmem:[#allocation2 + $0x14d0] sm:$0xff] }
 0x168   :  { %3644 = vmatprep.subr.mxu0 %v671_v31  ;;  %3677 = vmatprep.subr.mxu1 %v704_v32  ;;  %v770_v31 = vld [vmem:[#allocation2 + $0x15d8] sm:$0xff]  ;;  %v721_v32 = vld [vmem:[#allocation2 + $0x1450] sm:$0xff] }
 0x169   :  { %3645 = vmatpush3.msra.mxu0 %v655_v33  ;;  %3678 = vmatpush3.msra.mxu1 %v688_v34  ;;  %v754_v33 = vld [vmem:[#allocation2 + $0x1558] sm:$0xff]  ;;  %v736_v34 = vld [vmem:[#allocation2 + $0x14c8] sm:$0xff] }
 0x16a   :  { %3646 = vmatprep.subr.mxu0 %v670_v35  ;;  %3679 = vmatprep.subr.mxu1 %v703_v36  ;;  %v769_v35 = vld [vmem:[#allocation2 + $0x15d0] sm:$0xff]  ;;  %v720_v36 = vld [vmem:[#allocation2 + $0x1448] sm:$0xff] }
 0x16b   :  { %3647 = vmatpush3.msra.mxu0 %v654_v37  ;;  %3680 = vmatpush3.msra.mxu1 %v687_v38  ;;  %v753_v37 = vld [vmem:[#allocation2 + $0x1550] sm:$0xff]  ;;  %v735_v38 = vld [vmem:[#allocation2 + $0x14c0] sm:$0xff] }
 0x16c   :  { %3648 = vmatprep.subr.mxu0 %v669_v39  ;;  %3681 = vmatprep.subr.mxu1 %v702_v40  ;;  %v768_v39 = vld [vmem:[#allocation2 + $0x15c8] sm:$0xff]  ;;  %v719_v40 = vld [vmem:[#allocation2 + $0x1440] sm:$0xff] }
 0x16d   :  { %3649 = vmatpush3.msra.mxu0 %v653_v41  ;;  %3682 = vmatpush3.msra.mxu1 %v686_v42  ;;  %v752_v41 = vld [vmem:[#allocation2 + $0x1548] sm:$0xff]  ;;  %v734_v42 = vld [vmem:[#allocation2 + $0x14b8] sm:$0xff] }
 0x16e   :  { %3650 = vmatprep.subr.mxu0 %v668_v43  ;;  %3683 = vmatprep.subr.mxu1 %v701_v44  ;;  %v767_v43 = vld [vmem:[#allocation2 + $0x15c0] sm:$0xff]  ;;  %v718_v44 = vld [vmem:[#allocation2 + $0x1438] sm:$0xff] }
 0x16f   :  { %3651 = vmatpush3.msra.mxu0 %v652_v45  ;;  %3684 = vmatpush3.msra.mxu1 %v685_v46  ;;  %v751_v45 = vld [vmem:[#allocation2 + $0x1540] sm:$0xff]  ;;  %v733_v46 = vld [vmem:[#allocation2 + $0x14b0] sm:$0xff] }
 0x170   :  { %3652 = vmatprep.subr.mxu0 %v667_v47  ;;  %3685 = vmatprep.subr.mxu1 %v700_v49  ;;  %v766_v47 = vld [vmem:[#allocation2 + $0x15b8] sm:$0xff]  ;;  %v717_v49 = vld [vmem:[#allocation2 + $0x1430] sm:$0xff] }
 0x171   :  { %3653 = vmatpush3.msra.mxu0 %v651_v50  ;;  %3686 = vmatpush3.msra.mxu1 %v684_v52  ;;  %v750_v50 = vld [vmem:[#allocation2 + $0x1538] sm:$0xff]  ;;  %v765_v52 = vld [vmem:[#allocation2 + $0x15b0] sm:$0xff] }
 0x172   :  { %3654 = vmatprep.subr.mxu0 %v666_v53  ;;  %3687 = vmatprep.subr.mxu1 %v699_v54  ;;  %v716_v53 = vld [vmem:[#allocation2 + $0x1428] sm:$0xff]  ;;  %v749_v54 = vld [vmem:[#allocation2 + $0x1530] sm:$0xff] }
 0x173   :  { %3655 = vmatpush3.msra.mxu0 %v650_v55  ;;  %3688 = vmatpush3.msra.mxu1 %v683_v56  ;;  %v731_v55 = vld [vmem:[#allocation2 + $0x14a0] sm:$0xff]  ;;  %v764_v56 = vld [vmem:[#allocation2 + $0x15a8] sm:$0xff] }
 0x174   :  { %3656 = vmatprep.subr.mxu0 %v665_v57  ;;  %3689 = vmatprep.subr.mxu1 %v698_v59  ;;  %v715_v57 = vld [vmem:[#allocation2 + $0x1420] sm:$0xff]  ;;  %v748_v59 = vld [vmem:[#allocation2 + $0x1528] sm:$0xff] }
 0x175   :  { %3657 = vmatpush3.msra.mxu0 %v649_v60  ;;  %3690 = vmatpush3.msra.mxu1 %v682_v62  ;;  %v730_v60 = vld [vmem:[#allocation2 + $0x1498] sm:$0xff] }
 0x176   :  { %3658 = vmatprep.subr.mxu0 %v664_v63  ;;  %3691 = vmatprep.subr.mxu1 %v697_v0  ;;  %v714_v62 = vld [vmem:[#allocation2 + $0x1418] sm:$0xff]  ;;  %v747_v63 = vld [vmem:[#allocation2 + $0x1520] sm:$0xff]  ;;  %v729_v0 = vld [vmem:[#allocation2 + $0x1490] sm:$0xff] }
 0x177   :  { %3659 = vmatpush3.msra.mxu0 %v648_v1  ;;  %3692 = vmatpush3.msra.mxu1 %v681_v2  ;;  %v1045_v1 = vcombine.high %v68_v58, %v68_v58  ;;  %v762_v2 = vld [vmem:[#allocation2 + $0x1598] sm:$0xff] }
 0x178   :  { %3660 = vmatprep.subr.mxu0 %v663_v3  ;;  %3693 = vmatprep.subr.mxu1 %v696_v5  ;;  %v713_v3 = vld [vmem:[#allocation2 + $0x1410] sm:$0xff]  ;;  %v746_v5 = vld [vmem:[#allocation2 + $0x1518] sm:$0xff] }
 0x179   :  { %3661 = vmatpush3.msra.mxu0 %v647_v6  ;;  %2459 = vmatprep.mubr.f32.mxu0 %v1043_v7  ;;  %v728_v6 = vld [vmem:[#allocation2 + $0x1488] sm:$0xff]  ;;  %v761_v7 = vld [vmem:[#allocation2 + $0x1590] sm:$0xff] }
 0x17a   :  { %3694 = vmatpush3.msra.mxu1 %v680_v8  ;;  %2460 = vmatmul.mubr.f32.vlgmr.msra.gmra.mxu0 %v1035_v61  ;;  %v763_v61 = vld [vmem:[#allocation2 + $0x15a0] sm:$0xff]  ;;  %v712_v8 = vld [vmem:[#allocation2 + $0x1408] sm:$0xff] }
 0x17b   :  { %3695 = vmatprep.subr.mxu1 %v695_v9  ;;  %3700 = vmatprep.subr.mxu0 %v742_v10  ;;  %v745_v9 = vld [vmem:[#allocation2 + $0x1510] sm:$0xff]  ;;  %v727_v10 = vld [vmem:[#allocation2 + $0x1480] sm:$0xff] }
 0x17c   :  { %3696 = vmatpush3.msra.mxu1 %v679_v11  ;;  %2529 = vmatprep.mubr.f32.mxu1 %v1044_v12  ;;  %v1059_v11 = vrot.slane %v1045_v1, %v4099_v48  ;;  %v760_v12 = vld [vmem:[#allocation2 + $0x1588] sm:$0xff]  ;;  %v69_v1 = vld [vmem:[%s4249_s0 + $0x58] sm:$0xff] }
 0x17d   :  { %3701 = vmatpush3.msra.mxu0 %v726_v13  ;;  %2530 = vmatmul.mubr.f32.vlgmr.msra.gmra.mxu1 %v1042_v4  ;;  %v1052_v4 = vrot.slane %v68_v58, %v4099_v48  ;;  %v711_v13 = vld [vmem:[#allocation2 + $0x1400] sm:$0xff]  ;;  %v796_v58 = vld [vmem:[#allocation2 + $0x16a8] sm:$0xff] }
 0x17e   :  { %3702 = vmatprep.subr.mxu0 %v741_v14  ;;  %3735 = vmatprep.subr.mxu1 %v774_v15  ;;  %v744_v15 = vld [vmem:[#allocation2 + $0x1508] sm:$0xff] }
 0x17f   :  { %3703 = vmatpush3.msra.mxu0 %v725_v16  ;;  %3736 = vmatpush3.msra.mxu1 %v758_v17  ;;  %v1060_v14 = vcombine.high %v1052_v4, %v1052_v4  ;;  %v759_v16 = vld [vmem:[#allocation2 + $0x1580] sm:$0xff]  ;;  %v806_v17 = vld [vmem:[#allocation2 + $0x16f8] sm:$0xff] }
 0x180   :  { %3704 = vmatprep.subr.mxu0 %v740_v18  ;;  %3737 = vmatprep.subr.mxu1 %v773_v19  ;;  %v743_v18 = vld [vmem:[#allocation2 + $0x1500] sm:$0xff]  ;;  %v1061_v19 = vcombine.high %v1059_v11, %v1059_v11 }
 0x181   :  { %3705 = vmatpush3.msra.mxu0 %v724_v20  ;;  %3738 = vmatpush3.msra.mxu1 %v757_v21  ;;  %v790_v20 = vld [vmem:[#allocation2 + $0x1678] sm:$0xff]  ;;  %v805_v21 = vld [vmem:[#allocation2 + $0x16f0] sm:$0xff] }
 0x182   :  { %3706 = vmatprep.subr.mxu0 %v739_v22  ;;  %3739 = vmatprep.subr.mxu1 %v772_v23  ;;  %v838_v22 = vld [vmem:[#allocation2 + $0x17f8] sm:$0xff]  ;;  %v789_v23 = vld [vmem:[#allocation2 + $0x1670] sm:$0xff] }
 0x183   :  { %3707 = vmatpush3.msra.mxu0 %v723_v24  ;;  %3740 = vmatpush3.msra.mxu1 %v756_v25  ;;  %v822_v24 = vld [vmem:[#allocation2 + $0x1778] sm:$0xff]  ;;  %v804_v25 = vld [vmem:[#allocation2 + $0x16e8] sm:$0xff] }
 0x184   :  { %3708 = vmatprep.subr.mxu0 %v738_v26  ;;  %3741 = vmatprep.subr.mxu1 %v771_v27  ;;  %v837_v26 = vld [vmem:[#allocation2 + $0x17f0] sm:$0xff]  ;;  %v788_v27 = vld [vmem:[#allocation2 + $0x1668] sm:$0xff] }
 0x185   :  { %3709 = vmatpush3.msra.mxu0 %v722_v28  ;;  %3742 = vmatpush3.msra.mxu1 %v755_v29  ;;  %v821_v28 = vld [vmem:[#allocation2 + $0x1770] sm:$0xff]  ;;  %v803_v29 = vld [vmem:[#allocation2 + $0x16e0] sm:$0xff] }
 0x186   :  { %3710 = vmatprep.subr.mxu0 %v737_v30  ;;  %3743 = vmatprep.subr.mxu1 %v770_v31  ;;  %v836_v30 = vld [vmem:[#allocation2 + $0x17e8] sm:$0xff]  ;;  %v787_v31 = vld [vmem:[#allocation2 + $0x1660] sm:$0xff] }
 0x187   :  { %3711 = vmatpush3.msra.mxu0 %v721_v32  ;;  %3744 = vmatpush3.msra.mxu1 %v754_v33  ;;  %v820_v32 = vld [vmem:[#allocation2 + $0x1768] sm:$0xff]  ;;  %v802_v33 = vld [vmem:[#allocation2 + $0x16d8] sm:$0xff] }
 0x188   :  { %3712 = vmatprep.subr.mxu0 %v736_v34  ;;  %3745 = vmatprep.subr.mxu1 %v769_v35  ;;  %v835_v34 = vld [vmem:[#allocation2 + $0x17e0] sm:$0xff]  ;;  %v786_v35 = vld [vmem:[#allocation2 + $0x1658] sm:$0xff] }
 0x189   :  { %3713 = vmatpush3.msra.mxu0 %v720_v36  ;;  %3746 = vmatpush3.msra.mxu1 %v753_v37  ;;  %v819_v36 = vld [vmem:[#allocation2 + $0x1760] sm:$0xff]  ;;  %v801_v37 = vld [vmem:[#allocation2 + $0x16d0] sm:$0xff] }
 0x18a   :  { %3714 = vmatprep.subr.mxu0 %v735_v38  ;;  %3747 = vmatprep.subr.mxu1 %v768_v39  ;;  %v834_v38 = vld [vmem:[#allocation2 + $0x17d8] sm:$0xff]  ;;  %v785_v39 = vld [vmem:[#allocation2 + $0x1650] sm:$0xff] }
 0x18b   :  { %3715 = vmatpush3.msra.mxu0 %v719_v40  ;;  %3748 = vmatpush3.msra.mxu1 %v752_v41  ;;  %v818_v40 = vld [vmem:[#allocation2 + $0x1758] sm:$0xff]  ;;  %v800_v41 = vld [vmem:[#allocation2 + $0x16c8] sm:$0xff] }
 0x18c   :  { %3716 = vmatprep.subr.mxu0 %v734_v42  ;;  %3749 = vmatprep.subr.mxu1 %v767_v43  ;;  %v833_v42 = vld [vmem:[#allocation2 + $0x17d0] sm:$0xff]  ;;  %v784_v43 = vld [vmem:[#allocation2 + $0x1648] sm:$0xff] }
 0x18d   :  { %3717 = vmatpush3.msra.mxu0 %v718_v44  ;;  %3750 = vmatpush3.msra.mxu1 %v751_v45  ;;  %v817_v44 = vld [vmem:[#allocation2 + $0x1750] sm:$0xff]  ;;  %v799_v45 = vld [vmem:[#allocation2 + $0x16c0] sm:$0xff] }
 0x18e   :  { %3718 = vmatprep.subr.mxu0 %v733_v46  ;;  %3751 = vmatprep.subr.mxu1 %v766_v47  ;;  %v832_v46 = vld [vmem:[#allocation2 + $0x17c8] sm:$0xff]  ;;  %v783_v47 = vld [vmem:[#allocation2 + $0x1640] sm:$0xff] }
 0x18f   :  { %3719 = vmatpush3.msra.mxu0 %v717_v49  ;;  %3752 = vmatpush3.msra.mxu1 %v750_v50  ;;  %v816_v49 = vld [vmem:[#allocation2 + $0x1748] sm:$0xff]  ;;  %v798_v50 = vld [vmem:[#allocation2 + $0x16b8] sm:$0xff] }
 0x190   :  { %3720 = vmatprep.subr.mxu0 %v732_v51  ;;  %3753 = vmatprep.subr.mxu1 %v765_v52  ;;  %v831_v51 = vld [vmem:[#allocation2 + $0x17c0] sm:$0xff]  ;;  %v782_v52 = vld [vmem:[#allocation2 + $0x1638] sm:$0xff] }
 0x191   :  { %3721 = vmatpush3.msra.mxu0 %v716_v53  ;;  %3754 = vmatpush3.msra.mxu1 %v749_v54  ;;  %v815_v53 = vld [vmem:[#allocation2 + $0x1740] sm:$0xff]  ;;  %v797_v54 = vld [vmem:[#allocation2 + $0x16b0] sm:$0xff] }
 0x192   :  { %3722 = vmatprep.subr.mxu0 %v731_v55  ;;  %3755 = vmatprep.subr.mxu1 %v764_v56  ;;  %v830_v55 = vld [vmem:[#allocation2 + $0x17b8] sm:$0xff]  ;;  %v781_v56 = vld [vmem:[#allocation2 + $0x1630] sm:$0xff] }
 0x193   :  { %3723 = vmatpush3.msra.mxu0 %v715_v57  ;;  %3756 = vmatpush3.msra.mxu1 %v748_v59  ;;  %v814_v57 = vld [vmem:[#allocation2 + $0x1738] sm:$0xff]  ;;  %v829_v59 = vld [vmem:[#allocation2 + $0x17b0] sm:$0xff] }
 0x194   :  { %3724 = vmatprep.subr.mxu0 %v730_v60  ;;  %3757 = vmatprep.subr.mxu1 %v763_v61  ;;  %v780_v60 = vld [vmem:[#allocation2 + $0x1628] sm:$0xff]  ;;  %v813_v61 = vld [vmem:[#allocation2 + $0x1730] sm:$0xff] }
 0x195   :  { %3725 = vmatpush3.msra.mxu0 %v714_v62  ;;  %3758 = vmatpush3.msra.mxu1 %v747_v63  ;;  %v795_v62 = vld [vmem:[#allocation2 + $0x16a0] sm:$0xff]  ;;  %v828_v63 = vld [vmem:[#allocation2 + $0x17a8] sm:$0xff] }
 0x196   :  { %3726 = vmatprep.subr.mxu0 %v729_v0  ;;  %3759 = vmatprep.subr.mxu1 %v762_v2  ;;  %v779_v0 = vld [vmem:[#allocation2 + $0x1620] sm:$0xff]  ;;  %v812_v2 = vld [vmem:[#allocation2 + $0x1728] sm:$0xff] }
 0x197   :  { %3727 = vmatpush3.msra.mxu0 %v713_v3  ;;  %3760 = vmatpush3.msra.mxu1 %v746_v5  ;;  %v794_v3 = vld [vmem:[#allocation2 + $0x1698] sm:$0xff] }
 0x198   :  { %3728 = vmatprep.subr.mxu0 %v728_v6  ;;  %3761 = vmatprep.subr.mxu1 %v761_v7  ;;  %v778_v5 = vld [vmem:[#allocation2 + $0x1618] sm:$0xff]  ;;  %v811_v6 = vld [vmem:[#allocation2 + $0x1720] sm:$0xff]  ;;  %v793_v7 = vld [vmem:[#allocation2 + $0x1690] sm:$0xff] }
 0x199   :  { %3729 = vmatpush3.msra.mxu0 %v712_v8  ;;  %3762 = vmatpush3.msra.mxu1 %v745_v9  ;;  %v1062_v8 = vcombine.high %v69_v1, %v69_v1  ;;  %v826_v9 = vld [vmem:[#allocation2 + $0x1798] sm:$0xff] }
 0x19a   :  { %3730 = vmatprep.subr.mxu0 %v727_v10  ;;  %3763 = vmatprep.subr.mxu1 %v760_v12  ;;  %v777_v10 = vld [vmem:[#allocation2 + $0x1610] sm:$0xff]  ;;  %v810_v12 = vld [vmem:[#allocation2 + $0x1718] sm:$0xff] }
 0x19b   :  { %3731 = vmatpush3.msra.mxu0 %v711_v13  ;;  %2599 = vmatprep.mubr.f32.mxu0 %v1060_v14  ;;  %v792_v13 = vld [vmem:[#allocation2 + $0x1688] sm:$0xff]  ;;  %v825_v14 = vld [vmem:[#allocation2 + $0x1790] sm:$0xff] }
 0x19c   :  { %3764 = vmatpush3.msra.mxu1 %v744_v15  ;;  %2600 = vmatmul.mubr.f32.vlgmr.msra.gmra.mxu0 %v1052_v4  ;;  %v827_v4 = vld [vmem:[#allocation2 + $0x17a0] sm:$0xff]  ;;  %v776_v15 = vld [vmem:[#allocation2 + $0x1608] sm:$0xff] }
 0x19d   :  { %3765 = vmatprep.subr.mxu1 %v759_v16  ;;  %3770 = vmatprep.subr.mxu0 %v806_v17  ;;  %v809_v16 = vld [vmem:[#allocation2 + $0x1710] sm:$0xff]  ;;  %v791_v17 = vld [vmem:[#allocation2 + $0x1680] sm:$0xff] }
 0x19e   :  { %3766 = vmatpush3.msra.mxu1 %v743_v18  ;;  %2669 = vmatprep.mubr.f32.mxu1 %v1061_v19  ;;  %v1076_v18 = vrot.slane %v1062_v8, %v4099_v48  ;;  %v824_v19 = vld [vmem:[#allocation2 + $0x1788] sm:$0xff] }
 0x19f   :  { %3771 = vmatpush3.msra.mxu0 %v790_v20  ;;  %2670 = vmatmul.mubr.f32.vlgmr.msra.gmra.mxu1 %v1059_v11  ;;  %v1069_v11 = vrot.slane %v69_v1, %v4099_v48  ;;  %v775_v20 = vld [vmem:[#allocation2 + $0x1600] sm:$0xff]  ;;  %v4057_v48 = vmov 0.0  }
 0x1a0   :  { %3772 = vmatprep.subr.mxu0 %v805_v21  ;;  %3805 = vmatprep.subr.mxu1 %v838_v22  ;;  %v808_v22 = vld [vmem:[#allocation2 + $0x1708] sm:$0xff]  ;;  %v2997_v1 = vld [vmem:[#allocation5] ss:$0 sm:$0xff] }
 0x1a1   :  { %3773 = vmatpush3.msra.mxu0 %v789_v23  ;;  %3806 = vmatpush3.msra.mxu1 %v822_v24  ;;  %v1077_v21 = vcombine.high %v1069_v11, %v1069_v11  ;;  %v823_v23 = vld [vmem:[#allocation2 + $0x1780] sm:$0xff] }
 0x1a2   :  { %3774 = vmatprep.subr.mxu0 %v804_v25  ;;  %3807 = vmatprep.subr.mxu1 %v837_v26  ;;  %v807_v24 = vld [vmem:[#allocation2 + $0x1700] sm:$0xff]  ;;  %v1078_v25 = vcombine.high %v1076_v18, %v1076_v18  ;;  %v854_v26 = vld [vmem:[#allocation2 + $0x1878] sm:$0xff] }
 0x1a3   :  { %3775 = vmatpush3.msra.mxu0 %v788_v27  ;;  %3808 = vmatpush3.msra.mxu1 %v821_v28  ;;  %v853_v27 = vld [vmem:[#allocation2 + $0x1870] sm:$0xff]  ;;  %v852_v28 = vld [vmem:[#allocation2 + $0x1868] sm:$0xff] }
 0x1a4   :  { %3776 = vmatprep.subr.mxu0 %v803_v29  ;;  %3809 = vmatprep.subr.mxu1 %v836_v30  ;;  %v851_v29 = vld [vmem:[#allocation2 + $0x1860] sm:$0xff]  ;;  %v850_v30 = vld [vmem:[#allocation2 + $0x1858] sm:$0xff] }
 0x1a5   :  { %3777 = vmatpush3.msra.mxu0 %v787_v31  ;;  %3810 = vmatpush3.msra.mxu1 %v820_v32  ;;  %v849_v31 = vld [vmem:[#allocation2 + $0x1850] sm:$0xff]  ;;  %v848_v32 = vld [vmem:[#allocation2 + $0x1848] sm:$0xff] }
 0x1a6   :  { %3778 = vmatprep.subr.mxu0 %v802_v33  ;;  %3811 = vmatprep.subr.mxu1 %v835_v34  ;;  %v847_v33 = vld [vmem:[#allocation2 + $0x1840] sm:$0xff]  ;;  %v846_v34 = vld [vmem:[#allocation2 + $0x1838] sm:$0xff] }
 0x1a7   :  { %3779 = vmatpush3.msra.mxu0 %v786_v35  ;;  %3812 = vmatpush3.msra.mxu1 %v819_v36  ;;  %v845_v35 = vld [vmem:[#allocation2 + $0x1830] sm:$0xff]  ;;  %v844_v36 = vld [vmem:[#allocation2 + $0x1828] sm:$0xff] }
 0x1a8   :  { %3780 = vmatprep.subr.mxu0 %v801_v37  ;;  %3813 = vmatprep.subr.mxu1 %v834_v38  ;;  %v843_v37 = vld [vmem:[#allocation2 + $0x1820] sm:$0xff]  ;;  %v842_v38 = vld [vmem:[#allocation2 + $0x1818] sm:$0xff] }
 0x1a9   :  { %3781 = vmatpush3.msra.mxu0 %v785_v39  ;;  %3814 = vmatpush3.msra.mxu1 %v818_v40  ;;  %v841_v39 = vld [vmem:[#allocation2 + $0x1810] sm:$0xff]  ;;  %v840_v40 = vld [vmem:[#allocation2 + $0x1808] sm:$0xff] }
 0x1aa   :  { %3782 = vmatprep.subr.mxu0 %v800_v41  ;;  %3815 = vmatprep.subr.mxu1 %v833_v42  ;;  %v839_v41 = vld [vmem:[#allocation2 + $0x1800] sm:$0xff] }
 0x1ab   :  { %3783 = vmatpush3.msra.mxu0 %v784_v43  ;;  %3816 = vmatpush3.msra.mxu1 %v817_v44  ;;  %v2998_v42 = vld.sshfl [vmem:[%s4249_s0 + $0x60] sm:$0x3 pattern:$0x76325410]  ;;  %v2901_v43 = vld [vmem:[%s4252_s3 + $0x78] sm:$0xff]  ;;  %v2900_v44 = vld [vmem:[%s4252_s3 + $0x70] sm:$0xff] }
 0x1ac   :  { %3784 = vmatprep.subr.mxu0 %v799_v45  ;;  %3817 = vmatprep.subr.mxu1 %v832_v46  ;;  %v2899_v45 = vld [vmem:[%s4252_s3 + $0x68] sm:$0xff]  ;;  %v2898_v46 = vld [vmem:[%s4252_s3 + $0x60] sm:$0xff] }
 0x1ad   :  { %3785 = vmatpush3.msra.mxu0 %v783_v47  ;;  %3818 = vmatpush3.msra.mxu1 %v816_v49  ;;  %v2897_v47 = vld [vmem:[%s4252_s3 + $0x58] sm:$0xff]  ;;  %v2896_v49 = vld [vmem:[%s4252_s3 + $0x50] sm:$0xff] }
 0x1ae   :  { %3786 = vmatprep.subr.mxu0 %v798_v50  ;;  %3819 = vmatprep.subr.mxu1 %v831_v51  ;;  %v2895_v50 = vld [vmem:[%s4252_s3 + $0x48] sm:$0xff]  ;;  %v2894_v51 = vld [vmem:[%s4252_s3 + $0x40] sm:$0xff] }
 0x1af   :  { %3787 = vmatpush3.msra.mxu0 %v782_v52  ;;  %3820 = vmatpush3.msra.mxu1 %v815_v53  ;;  %v2893_v52 = vld [vmem:[%s4252_s3 + $0x38] sm:$0xff]  ;;  %v2892_v53 = vld [vmem:[%s4252_s3 + $0x30] sm:$0xff] }
 0x1b0   :  { %3788 = vmatprep.subr.mxu0 %v797_v54  ;;  %3821 = vmatprep.subr.mxu1 %v830_v55  ;;  %v2891_v54 = vld [vmem:[%s4252_s3 + $0x28] sm:$0xff]  ;;  %v2890_v55 = vld [vmem:[%s4252_s3 + $0x20] sm:$0xff] }
 0x1b1   :  { %3789 = vmatpush3.msra.mxu0 %v781_v56  ;;  %3822 = vmatpush3.msra.mxu1 %v814_v57  ;;  %v2889_v56 = vld [vmem:[%s4252_s3 + $0x18] sm:$0xff]  ;;  %v2888_v57 = vld [vmem:[%s4252_s3 + $0x10] sm:$0xff] }
 0x1b2   :  { %3790 = vmatprep.subr.mxu0 %v796_v58  ;;  %3823 = vmatprep.subr.mxu1 %v829_v59  ;;  %v2887_v58 = vld [vmem:[%s4252_s3 + $0x8] sm:$0xff]  ;;  %v2886_v59 = vld [vmem:[%s4252_s3] sm:$0xff]  ;;  %s4059_s3 = smov [#allocation8]  }
 0x1b3   :  { %3791 = vmatpush3.msra.mxu0 %v780_v60  ;;  %3824 = vmatpush3.msra.mxu1 %v813_v61  ;;  %v3032_v60 = vpop.f32.mrf.mxu0  ;;  %s2987_s4 = sshll.u32 %s4059_s3, 4  ;;  %s2988_s4 = int_to_ptr.vmem [resolvable:$true] %s2987_s4 }
 0x1b4   :  { %3792 = vmatprep.subr.mxu0 %v795_v62  ;;  %3825 = vmatprep.subr.mxu1 %v828_v63  ;;  %v3067_v62 = vpop.f32.mrf.mxu1  ;;  %s4025_s11 = scalar_lea.vmem %s2988_s4, 32  ;;  %p4030_p2 = scmp.lt.s32.totalorder %s2988_s4, %s2988_s4 }
 0x1b5   :  { %3793 = vmatpush3.msra.mxu0 %v779_v0  ;;  %3826 = vmatpush3.msra.mxu1 %v812_v2  ;;  %v3033_v61 = vpop.f32.mrf.mxu0  ;;  %p4026_p1 = scmp.ne.s32.totalorder %s2988_s4, %s4025_s11  ;;  %p4031_p3 = scmp.lt.s32.totalorder %s4025_s11, %s4025_s11 }
 0x1b6   :  { %3794 = vmatprep.subr.mxu0 %v794_v3  ;;  %3827 = vmatprep.subr.mxu1 %v827_v4  ;;  %v3034_v0 = vadd.f32 %v3033_v61, %v3032_v60  ;;  %v3068_v2 = vpop.f32.mrf.mxu1 }
 0x1b7   :  { %3795 = vmatpush3.msra.mxu0 %v778_v5  ;;  %3828 = vmatpush3.msra.mxu1 %v811_v6  ;;  %v3102_v63 = vpop.f32.mrf.mxu0  ;;  %v3069_v6 = vadd.f32 %v3068_v2, %v3067_v62  ;;  %p4032_p4 = por %p4031_p3, %p4030_p2 }
 0x1b8   :  { %3796 = vmatprep.subr.mxu0 %v793_v7  ;;  %3829 = vmatprep.subr.mxu1 %v826_v9  ;;  %v3137_v4 = vpop.f32.mrf.mxu1  ;;  %v1202_v5 = vadd.f32 %v3034_v0, %v2997_v1 }
 0x1b9   :  { %3797 = vmatpush3.msra.mxu0 %v777_v10  ;;  %3830 = vmatpush3.msra.mxu1 %v810_v12  ;;  %v3103_v3 = vpop.f32.mrf.mxu0  ;;  %p4033_p5 = pnand %p4032_p4, %p4026_p1 }
 0x1ba   :  { %3798 = vmatprep.subr.mxu0 %v792_v13  ;;  %3831 = vmatprep.subr.mxu1 %v825_v14  ;;  %v3104_v8 = vadd.f32 %v3103_v3, %v3102_v63  ;;  %v3138_v9 = vpop.f32.mrf.mxu1  ;;  %v1272_v10 = vadd.f32 %v3069_v6, %v1202_v5 }
 0x1bb   :  { %3799 = vmatpush3.msra.mxu0 %v776_v15  ;;  %3832 = vmatpush3.msra.mxu1 %v809_v16  ;;  %v3172_v7 = vpop.f32.mrf.mxu0  ;;  %v3139_v14 = vadd.f32 %v3138_v9, %v3137_v4 }
 0x1bc   :  { %3800 = vmatprep.subr.mxu0 %v791_v17  ;;  %3833 = vmatprep.subr.mxu1 %v824_v19  ;;  %v3207_v12 = vpop.f32.mrf.mxu1  ;;  %v1342_v13 = vadd.f32 %v3104_v8, %v1272_v10 }
 0x1bd   :  { %3801 = vmatpush3.msra.mxu0 %v775_v20  ;;  %2739 = vmatprep.mubr.f32.mxu0 %v1077_v21 }
 0x1be   :  { %3834 = vmatpush3.msra.mxu1 %v808_v22  ;;  %2740 = vmatmul.mubr.f32.vlgmr.msra.gmra.mxu0 %v1069_v11  ;;  %v3173_v11 = vpop.f32.mrf.mxu0  ;;  %v3208_v17 = vpop.f32.mrf.mxu1 }
 0x1bf   :  { %3835 = vmatprep.subr.mxu1 %v823_v23  ;;  %3874 = vmatprep.subr.mxu0 %v4057_v48  ;;  %v3174_v16 = vadd.f32 %v3173_v11, %v3172_v7  ;;  %v3209_v22 = vadd.f32 %v3208_v17, %v3207_v12 }
 0x1c0   :  { %3836 = vmatpush3.msra.mxu1 %v807_v24  ;;  %2809 = vmatprep.mubr.f32.mxu1 %v1078_v25  ;;  %v3242_v15 = vpop.f32.mrf.mxu0  ;;  %v3277_v20 = vpop.f32.mrf.mxu1 }
 0x1c1   :  { %3875 = vmatpush3.msra.mxu0 %v854_v26  ;;  %2810 = vmatmul.mubr.f32.vlgmr.msra.gmra.mxu1 %v1076_v18  ;;  %v1412_v18 = vadd.f32 %v3139_v14, %v1342_v13 }
 0x1c2   :  { %3876 = vmatprep.subr.mxu0 %v4057_v48  ;;  %3906 = vmatprep.mubr.msk.f32.mxu0 %vm4058_vm0, %v4057_v48  ;;  %v3243_v19 = vpop.f32.mrf.mxu0  ;;  %v3278_v25 = vpop.f32.mrf.mxu1 }
 0x1c3   :  { %3877 = vmatpush3.msra.mxu0 %v853_v27  ;;  %3909 = vmatprep.subr.mxu1 %v4057_v48  ;;  %v1482_v21 = vadd.f32 %v3174_v16, %v1412_v18  ;;  %v3244_v24 = vadd.f32 %v3243_v19, %v3242_v15 }
 0x1c4   :  { %3878 = vmatprep.subr.mxu0 %v4057_v48  ;;  %3941 = vmatprep.mubr.msk.f32.mxu1 %vm4058_vm0, %v4057_v48  ;;  %v3312_v23 = vpop.f32.mrf.mxu0  ;;  %v3347_v27 = vpop.f32.mrf.mxu1 }
 0x1c5   :  { %3879 = vmatpush3.msra.mxu0 %v852_v28  ;;  %3910 = vmatpush3.msra.mxu1 %v2901_v43  ;;  %v1552_v26 = vadd.f32 %v3209_v22, %v1482_v21 }
 0x1c6   :  { %3880 = vmatprep.subr.mxu0 %v4057_v48  ;;  %3911 = vmatprep.subr.mxu1 %v4057_v48 }
 0x1c7   :  { %3881 = vmatpush3.msra.mxu0 %v851_v29  ;;  %3912 = vmatpush3.msra.mxu1 %v2900_v44  ;;  %v1622_v28 = vadd.f32 %v3244_v24, %v1552_v26  ;;  %v3279_v29 = vadd.f32 %v3278_v25, %v3277_v20 }
 0x1c8   :  { %3882 = vmatprep.subr.mxu0 %v4057_v48  ;;  %3913 = vmatprep.subr.mxu1 %v4057_v48 }
 0x1c9   :  { %3883 = vmatpush3.msra.mxu0 %v850_v30  ;;  %3914 = vmatpush3.msra.mxu1 %v2899_v45 }
 0x1ca   :  { %3884 = vmatprep.subr.mxu0 %v4057_v48  ;;  %3915 = vmatprep.subr.mxu1 %v4057_v48 }
 0x1cb   :  { %3885 = vmatpush3.msra.mxu0 %v849_v31  ;;  %3916 = vmatpush3.msra.mxu1 %v2898_v46 }
 0x1cc   :  { %3886 = vmatprep.subr.mxu0 %v4057_v48  ;;  %3917 = vmatprep.subr.mxu1 %v4057_v48 }
 0x1cd   :  { %3887 = vmatpush3.msra.mxu0 %v848_v32  ;;  %3918 = vmatpush3.msra.mxu1 %v2897_v47  ;;  %v3348_v32 = vpop.f32.mrf.mxu1 }
 0x1ce   :  { %3888 = vmatprep.subr.mxu0 %v4057_v48  ;;  %3919 = vmatprep.subr.mxu1 %v4057_v48 }
 0x1cf   :  { %3889 = vmatpush3.msra.mxu0 %v847_v33  ;;  %3920 = vmatpush3.msra.mxu1 %v2896_v49  ;;  %v1692_v33 = vadd.f32 %v3279_v29, %v1622_v28 }
 0x1d0   :  { %3890 = vmatprep.subr.mxu0 %v4057_v48  ;;  %3921 = vmatprep.subr.mxu1 %v4057_v48 }
 0x1d1   :  { %3891 = vmatpush3.msra.mxu0 %v846_v34  ;;  %3922 = vmatpush3.msra.mxu1 %v2895_v50 }
 0x1d2   :  { %3892 = vmatprep.subr.mxu0 %v4057_v48  ;;  %3923 = vmatprep.subr.mxu1 %v4057_v48 }
 0x1d3   :  { %3893 = vmatpush3.msra.mxu0 %v845_v35  ;;  %3924 = vmatpush3.msra.mxu1 %v2894_v51  ;;  %v3417_v35 = vpop.f32.mrf.mxu1 }
 0x1d4   :  { %3894 = vmatprep.subr.mxu0 %v4057_v48  ;;  %3925 = vmatprep.subr.mxu1 %v4057_v48 }
 0x1d5   :  { %3895 = vmatpush3.msra.mxu0 %v844_v36  ;;  %3926 = vmatpush3.msra.mxu1 %v2893_v52 }
 0x1d6   :  { %3896 = vmatprep.subr.mxu0 %v4057_v48  ;;  %3927 = vmatprep.subr.mxu1 %v4057_v48 }
 0x1d7   :  { %3897 = vmatpush3.msra.mxu0 %v843_v37  ;;  %3928 = vmatpush3.msra.mxu1 %v2892_v53  ;;  %v3349_v37 = vadd.f32 %v3348_v32, %v3347_v27  ;;  %v2999_v32 = vld [vmem:[#allocation7] ss:$0 sm:$0xff] }
 0x1d8   :  { %3898 = vmatprep.subr.mxu0 %v4057_v48  ;;  %3929 = vmatprep.subr.mxu1 %v4057_v48 }
 0x1d9   :  { %3899 = vmatpush3.msra.mxu0 %v842_v38  ;;  %3930 = vmatpush3.msra.mxu1 %v2891_v54 }
 0x1da   :  { %3900 = vmatprep.subr.mxu0 %v4057_v48  ;;  %3931 = vmatprep.subr.mxu1 %v4057_v48 }
 0x1db   :  { %3901 = vmatpush3.msra.mxu0 %v841_v39  ;;  %3932 = vmatpush3.msra.mxu1 %v2890_v55 }
 0x1dc   :  { %3902 = vmatprep.subr.mxu0 %v4057_v48  ;;  %3933 = vmatprep.subr.mxu1 %v4057_v48 }
 0x1dd   :  { %3903 = vmatpush3.msra.mxu0 %v840_v40  ;;  %3934 = vmatpush3.msra.mxu1 %v2889_v56  ;;  %v3418_v40 = vpop.f32.mrf.mxu1 }
 0x1de   :  { %3904 = vmatprep.subr.mxu0 %v4057_v48  ;;  %3935 = vmatprep.subr.mxu1 %v4057_v48  ;;  %v3419_v45 = vadd.f32 %v3418_v40, %v3417_v35 }
 0x1df   :  { %3905 = vmatpush3.msra.mxu0 %v839_v41  ;;  %3936 = vmatpush3.msra.mxu1 %v2888_v57  ;;  %v3487_v43 = vpop.f32.mrf.mxu1 }
 0x1e0   :  { %3907 = vmatmul.mubr.f32.vlgmr.msra.gmra.mxu0 %v2998_v42  ;;  %3937 = vmatprep.subr.mxu1 %v4057_v48 }
 0x1e1   :  { %3938 = vmatpush3.msra.mxu1 %v2887_v58  ;;  %v3488_v49 = vpop.f32.mrf.mxu1 }
 0x1e2   :  { %3939 = vmatprep.subr.mxu1 %v4057_v48  ;;  %v3313_v48 = vpop.f32.mrf.mxu0  ;;  %v3489_v54 = vadd.f32 %v3488_v49, %v3487_v43 }
 0x1e3   :  { %3940 = vmatpush3.msra.mxu1 %v2886_v59  ;;  %v3314_v31 = vadd.f32 %v3313_v48, %v3312_v23 }
 0x1e4   :  { %v3382_v30 = vpop.f32.mrf.mxu0 }
 0x1e5   :  { %v1762_v36 = vadd.f32 %v3314_v31, %v1692_v33 }
 0x1e6   :  { %v3383_v34 = vpop.f32.mrf.mxu0 }
 0x1e7   :  { %v3384_v39 = vadd.f32 %v3383_v34, %v3382_v30  ;;  %v1832_v41 = vadd.f32 %v3349_v37, %v1762_v36 }
 0x1e8   :  { %v3452_v38 = vpop.f32.mrf.mxu0 }
 0x1e9   :  { %v1902_v44 = vadd.f32 %v3384_v39, %v1832_v41 }
 0x1ea   :  { %v3453_v42 = vpop.f32.mrf.mxu0 }
 0x1eb   :  { %v3454_v47 = vadd.f32 %v3453_v42, %v3452_v38  ;;  %v1972_v50 = vadd.f32 %v3419_v45, %v1902_v44 }
 0x1ed   :  { %v2042_v53 = vadd.f32 %v3454_v47, %v1972_v50 }
 0x1ef   :  { %v2112_v58 = vadd.f32 %v3489_v54, %v2042_v53 }
 0x1f6   :  { %v3522_v46 = vpop.f32.mrf.mxu0 }
 0x1f8   :  { %v3523_v51 = vpop.f32.mrf.mxu0 }
 0x1f9   :  { %v3557_v52 = vpop.f32.mrf.mxu1  ;;  %v3524_v56 = vadd.f32 %v3523_v51, %v3522_v46 }
 0x1fb   :  { %v3558_v57 = vpop.f32.mrf.mxu1  ;;  %v2182_v61 = vadd.f32 %v3524_v56, %v2112_v58 }
 0x1fc   :  { %v3559_v62 = vadd.f32 %v3558_v57, %v3557_v52 }
 0x1fe   :  { %v2252_v2 = vadd.f32 %v3559_v62, %v2182_v61 }
 0x218   :  { %v3592_v55 = vpop.f32.mrf.mxu0 }
 0x21a   :  { %v3593_v59 = vpop.f32.mrf.mxu0 }
 0x21b   :  { %v3627_v60 = vpop.f32.mrf.mxu1  ;;  %v3594_v0 = vadd.f32 %v3593_v59, %v3592_v55 }
 0x21d   :  { %v3628_v1 = vpop.f32.mrf.mxu1  ;;  %v2322_v5 = vadd.f32 %v3594_v0, %v2252_v2 }
 0x21e   :  { %v3629_v6 = vadd.f32 %v3628_v1, %v3627_v60 }
 0x220   :  { %v2392_v10 = vadd.f32 %v3629_v6, %v2322_v5 }
 0x23a   :  { %v3662_v63 = vpop.f32.mrf.mxu0 }
 0x23c   :  { %v3663_v3 = vpop.f32.mrf.mxu0 }
 0x23d   :  { %v3697_v4 = vpop.f32.mrf.mxu1  ;;  %v3664_v8 = vadd.f32 %v3663_v3, %v3662_v63 }
 0x23f   :  { %v3698_v9 = vpop.f32.mrf.mxu1  ;;  %v2462_v13 = vadd.f32 %v3664_v8, %v2392_v10 }
 0x240   :  { %v3699_v14 = vadd.f32 %v3698_v9, %v3697_v4 }
 0x242   :  { %v2532_v18 = vadd.f32 %v3699_v14, %v2462_v13 }
 0x25c   :  { %v3732_v7 = vpop.f32.mrf.mxu0 }
 0x25e   :  { %v3733_v11 = vpop.f32.mrf.mxu0 }
 0x25f   :  { %v3767_v12 = vpop.f32.mrf.mxu1  ;;  %v3734_v16 = vadd.f32 %v3733_v11, %v3732_v7 }
 0x261   :  { %v3768_v17 = vpop.f32.mrf.mxu1  ;;  %v2602_v21 = vadd.f32 %v3734_v16, %v2532_v18 }
 0x262   :  { %v3769_v22 = vadd.f32 %v3768_v17, %v3767_v12 }
 0x264   :  { %v2672_v25 = vadd.f32 %v3769_v22, %v2602_v21 }
 0x27e   :  { %v3802_v15 = vpop.f32.mrf.mxu0 }
 0x280   :  { %v3803_v19 = vpop.f32.mrf.mxu0 }
 0x281   :  { %v3837_v20 = vpop.f32.mrf.mxu1  ;;  %v3804_v23 = vadd.f32 %v3803_v19, %v3802_v15 }
 0x283   :  { %v3838_v24 = vpop.f32.mrf.mxu1  ;;  %v2742_v26 = vadd.f32 %v3804_v23, %v2672_v25 }
 0x284   :  { %v3839_v48 = vadd.f32 %v3838_v24, %v3837_v20 }
 0x286   :  { %v2812_v27 = vadd.f32 %v3839_v48, %v2742_v26 }
 0x2a0   :  { %v2881_v28 = vpop.f32.mrf.mxu0 }
 0x2a1   :  { %v2882_v29 = vadd.f32 %v2881_v28, %v2812_v27 }
 0x2a2   :  { %v3908_v30 = vpop.f32.mrf.mxu0 }
 0x2a3   :  { %v2885_v31 = vmax.f32 %v2882_v29, 0.0 }
 0x2a5   :  { %3942 = vmatmul.mubr.f32.vlgmr.msra.gmra.mxu1 %v2885_v31 }
 0x365   :  { %v2975_v33 = vpop.f32.mrf.mxu1 }
 0x366   :  { %v2976_v34 = vadd.f32 %v2999_v32, %v2975_v33 }
 0x367   :  { %v3943_v35 = vpop.f32.mrf.mxu1 }
 0x368   :  { %2980 = vst.msk [vmem:[#allocation8] sm:$0x3] %vm2979_vm1, %v2976_v34 }
 0x369   :  { %4036 = shalt.err (!%p4033_p5)
}
 0x36a   :  { %2990 = dma.vmem_to_hbm [thread:$0]  %s2988_s4, 32, %s4254_s5, [#allocation4]  }
 0x36b   :  { %4049 = dma.done.wait [#allocation4], 32  }
 0x36c   :  { %4050 = vsyncadd [#allocation4], 4294967264 }
 0x36d   :  { %2994 = vsyncpa [#allocation3], 1 }
 0x36e   :  { %2995 = vsyncpa [#allocation6], 1 }
 0x36f   :  { %2996 = vsyncpa [#allocation4], 1 }

</bundles_post_ra>
